<compile_context>
chip_gen: v7x
topology: tpu7x:2x2x1
jax: 0.10.0
libtpu: 0.0.40
codegen_flags: <defaults>
</compile_context>

<pallas_src>
import functools
import math

import jax
import jax.numpy as jnp
from jax.experimental import pallas as pl
from jax.experimental.pallas import tpu as pltpu


def _gauss_1d(size: int, sigma: float):
    """Same as _fspecial_gauss_1d, returned as a tuple of Python floats so the
    taps become scalar immediates inside the kernel."""
    center = size // 2
    g = [math.exp(-((i - center) ** 2) / (2.0 * float(sigma) ** 2)) for i in range(size)]
    s = sum(g)
    return tuple(v / s for v in g)


def _ssim_kernel(x1_ref, x2_ref, out_ref, *, window, ws, c1, c2,
                 non_negative_ssim, bc_total, tbc, hout, wout):
    x1 = x1_ref[...].astype(jnp.float32)   # (TBC, H, W)
    x2 = x2_ref[...].astype(jnp.float32)   # (TBC, H, W)

    def blur(x):
        # Valid separable Gaussian blur as an unrolled tap loop (VPU).
        # H taps (sublane shifts):
        acc = window[0] * x[:, 0:hout, :]
        for t in range(1, ws):
            acc = acc + window[t] * x[:, t:t + hout, :]
        # W taps (lane shifts):
        out = window[0] * acc[:, :, 0:wout]
        for t in range(1, ws):
            out = out + window[t] * acc[:, :, t:t + wout]
        return out                            # (TBC, Hout, Wout)

    mu1 = blur(x1)
    mu2 = blur(x2)
    mu1_sq = mu1 * mu1
    mu2_sq = mu2 * mu2
    mu1_mu2 = mu1 * mu2

    sigma1_sq = blur(x1 * x1) - mu1_sq        # compensation == 1.0
    sigma2_sq = blur(x2 * x2) - mu2_sq
    sigma12 = blur(x1 * x2) - mu1_mu2

    # ssim_map = (2*mu1mu2+c1)/(mu1_sq+mu2_sq+c1) * (2*sigma12+c2)/(sig1+sig2+c2)
    # fused into a single reciprocal (exact; approx=True can break the 1e-4 check).
    num = (2.0 * mu1_mu2 + c1) * (2.0 * sigma12 + c2)
    den = (mu1_sq + mu2_sq + c1) * (sigma1_sq + sigma2_sq + c2)
    ssim_map = num * pl.reciprocal(den, approx=False)

    # torch.flatten(ssim_map, 2).mean(-1): per-(n,c) spatial mean.
    per_ch = jnp.sum(jnp.sum(ssim_map, axis=2), axis=1, keepdims=True)   # (TBC, 1)
    per_ch = per_ch * (1.0 / float(hout * wout))
    if non_negative_ssim:
        per_ch = jnp.maximum(per_ch, 0.0)     # relu BEFORE averaging (matches torch)

    # Mask out channels that only exist due to padding of the last tile.
    start = pl.program_id(0) * tbc
    ch_idx = start + jax.lax.broadcasted_iota(jnp.int32, (tbc, 1), 0)
    per_ch = jnp.where(ch_idx < bc_total, per_ch, 0.0)

    partial = jnp.sum(per_ch)                 # scalar partial sum for this tile
    out_ref[...] = jnp.broadcast_to(partial, (1, 8, 128)).astype(jnp.float32)


def _pick_block_channels(bc: int, h: int, w: int) -> int:
    # Conservative f32 working-set estimate per channel inside one block
    # (double-buffered inputs + products + blur intermediates/outputs).
    per_ch_bytes = 16 * h * w * 4
    budget = 12 * 1024 * 1024        # fits the 32 MiB scoped limit on all gens (incl. v7x)
    tbc = max(1, budget // per_ch_bytes)
    return int(max(1, min(bc, tbc, 128)))


class CustomSSIM:
    """Pallas-TPU equivalent of the PyTorch CustomSSIM module (size_average=True)."""

    def __init__(self, data_range: float = 255, size_average: bool = True,
                 window_size: int = 11, window_sigma: float = 1.5,
                 channel: int = 3, spatial_dims: int = 2,
                 k=(0.01, 0.03), non_negative_ssim: bool = False,
                 block_channels: int | None = None):
        assert window_size % 2 == 1, "`window_size` must be odd."
        assert spatial_dims == 2, "only 2D (NCHW) inputs supported here"
        # TODO(synk): size_average=False per-image output path not implemented.
        assert size_average, "only size_average=True is implemented"
        self.data_range = float(data_range)
        self.window_size = int(window_size)
        self.window_sigma = float(window_sigma)
        self.k = (float(k[0]), float(k[1]))
        self.non_negative_ssim = bool(non_negative_ssim)
        self.block_channels = block_channels
        # Deterministic "parameter": 1D Gaussian window (shared across channels,
        # equivalent to the module's repeated (C,1,1,WS) depthwise weight).
        self.window = _gauss_1d(self.window_size, self.window_sigma)

    def __call__(self, image1: jnp.ndarray, image2: jnp.ndarray) -> jnp.ndarray:
        if image1.shape != image2.shape:
            raise ValueError("image1 and image2 must have the same dimensions")
        if image1.ndim != 4:
            raise ValueError("expected 4D NCHW inputs")
        n, c, h, w = image1.shape
        ws = self.window_size
        # The reference only convolves along dims with size >= window_size;
        # here we require both spatial dims to be large enough.
        assert h >= ws and w >= ws
        hout, wout = h - ws + 1, w - ws + 1

        bc = n * c
        tbc = self.block_channels if self.block_channels else _pick_block_channels(bc, h, w)
        tbc = int(max(1, min(tbc, bc)))
        num_tiles = -(-bc // tbc)
        bc_pad = num_tiles * tbc
        # TODO(synk): very large single-channel images (per-channel working set
        # > ~12 MiB) would need spatial (H/W) tiling with ws-1 halos.

        # Keep native dtype across the HBM->VMEM DMA; cast inside the kernel.
        x1 = image1.reshape(bc, h, w)
        x2 = image2.reshape(bc, h, w)
        if bc_pad != bc:
            pad = ((0, bc_pad - bc), (0, 0), (0, 0))
            x1 = jnp.pad(x1, pad)
            x2 = jnp.pad(x2, pad)

        c1 = (self.k[0] * self.data_range) ** 2
        c2 = (self.k[1] * self.data_range) ** 2
        kernel = functools.partial(
            _ssim_kernel, window=self.window, ws=ws, c1=c1, c2=c2,
            non_negative_ssim=self.non_negative_ssim,
            bc_total=bc, tbc=tbc, hout=hout, wout=wout)

        # Advisory cost hint for XLA's scheduler.
        blur_flops = 2 * ws * (hout * w + hout * wout)          # per channel per blur
        flops = int(bc * (5 * blur_flops + 30 * hout * wout))
        bytes_acc = int(2 * bc * h * w * jnp.dtype(image1.dtype).itemsize
                        + num_tiles * 8 * 128 * 4)
        trans = int(bc * hout * wout)

        grid_spec = pltpu.PrefetchScalarGridSpec(
            num_scalar_prefetch=0,
            grid=(num_tiles,),
            in_specs=[pl.BlockSpec((tbc, h, w), lambda i: (i, 0, 0)),
                      pl.BlockSpec((tbc, h, w), lambda i: (i, 0, 0))],
            out_specs=pl.BlockSpec((1, 8, 128), lambda i: (i, 0, 0)),
        )

        out = pl.pallas_call(
            kernel,
            out_shape=jax.ShapeDtypeStruct((num_tiles, 8, 128), jnp.float32),
            grid_spec=grid_spec,
            compiler_params=pltpu.CompilerParams(
                dimension_semantics=("parallel",),
                vmem_limit_bytes=32 * 1024 * 1024),
            cost_estimate=pl.CostEstimate(
                flops=flops, transcendentals=trans, bytes_accessed=bytes_acc),
        )(x1, x2)

        # size_average=True -> scalar mean over all (n, c) channels.
        return jnp.sum(out[:, 0, 0]) / float(bc)


def _reference_ssim(image1, image2, window, data_range, k):
    """Independent pure-JAX reference (tap-loop separable conv) for validation."""
    ws = window.shape[0]
    k1, k2 = k
    c1 = (k1 * data_range) ** 2
    c2 = (k2 * data_range) ** 2
    x1 = image1.astype(jnp.float32)
    x2 = image2.astype(jnp.float32)

    def blur(x):
        n, c, h, w = x.shape
        ho, wo = h - ws + 1, w - ws + 1
        out = jnp.zeros((n, c, ho, w), jnp.float32)
        for t in range(ws):
            out = out + x[:, :, t:t + ho, :] * window[t]
        out2 = jnp.zeros((n, c, ho, wo), jnp.float32)
        for t in range(ws):
            out2 = out2 + out[:, :, :, t:t + wo] * window[t]
        return out2

    mu1, mu2 = blur(x1), blur(x2)
    sigma1_sq = blur(x1 * x1) - mu1 * mu1
    sigma2_sq = blur(x2 * x2) - mu2 * mu2
    sigma12 = blur(x1 * x2) - mu1 * mu2
    cs_map = (2 * sigma12 + c2) / (sigma1_sq + sigma2_sq + c2)
    ssim_map = (2 * mu1 * mu2 + c1) / (mu1 * mu1 + mu2 * mu2 + c1) * cs_map
    return jnp.mean(ssim_map.reshape(ssim_map.shape[0], ssim_map.shape[1], -1).mean(-1))


if __name__ == "__main__":
    key = jax.random.PRNGKey(0)
    k1, k2 = jax.random.split(key)
    # Small shapes consistent with the module defaults (channel=3, NCHW, H/W >= 11).
    shape = (2, 3, 16, 16)
    data_range = 255.0
    image1 = jax.random.uniform(k1, shape, dtype=jnp.float32) * data_range
    image2 = jax.random.uniform(k2, shape, dtype=jnp.float32) * data_range

    window = jnp.asarray(_gauss_1d(11, 1.5), dtype=jnp.float32)
    ref = _reference_ssim(image1, image2, window, data_range, (0.01, 0.03))

    # 1) Default tiling (single tile for this tiny input).
    module = CustomSSIM(data_range=data_range, channel=3)
    result = jax.block_until_ready(jax.jit(module.__call__)(image1, image2))
    assert result.shape == ()
    assert jnp.isfinite(result)
    assert jnp.allclose(result, ref, rtol=1e-4, atol=1e-5), (result, ref)

    # 2) Force multiple tiles (BC=6 padded to 8) to exercise the parallel grid
    #    + padded-channel masking path.
    module2 = CustomSSIM(data_range=data_range, channel=3, block_channels=4)
    result2 = jax.block_until_ready(jax.jit(module2.__call__)(image1, image2))
    assert jnp.allclose(result2, ref, rtol=1e-4, atol=1e-5), (result2, ref)

    print("KERNEL_OK")
</pallas_src>

<mosaic_0001>
module attributes {stable_mosaic.version = 11 : i64} {
  func.func @_ssim_kernel(%arg0: i32, %arg1: memref<6x16x16xf32, #tpu.memory_space<vmem>>, %arg2: memref<6x16x16xf32, #tpu.memory_space<vmem>>, %arg3: memref<1x8x128xf32, #tpu.memory_space<vmem>>) attributes {dimension_semantics = [#tpu.dimension_semantics<parallel>], iteration_bounds = array<i64: 1>, scalar_prefetch = 0 : i64, scratch_operands = 0 : i64, tpu.core_type = #tpu.core_type<tc>, window_params = [{transform_indices = @transform_0, window_bounds = array<i64: 6, 16, 16>}, {transform_indices = @transform_1, window_bounds = array<i64: 6, 16, 16>}, {transform_indices = @transform_2, window_bounds = array<i64: 1, 8, 128>}]} {
    %c0 = arith.constant 0 : index
    %c0_0 = arith.constant 0 : index
    %c0_1 = arith.constant 0 : index
    %0 = vector.load %arg1[%c0, %c0_0, %c0_1] : memref<6x16x16xf32, #tpu.memory_space<vmem>>, vector<6x16x16xf32>
    %c0_2 = arith.constant 0 : index
    %c0_3 = arith.constant 0 : index
    %c0_4 = arith.constant 0 : index
    %1 = vector.load %arg2[%c0_2, %c0_3, %c0_4] : memref<6x16x16xf32, #tpu.memory_space<vmem>>, vector<6x16x16xf32>
    %2 = vector.extract_strided_slice %0 {offsets = [0, 0, 0], sizes = [6, 6, 16], strides = [1, 1, 1]} : vector<6x16x16xf32> to vector<6x6x16xf32>
    %cst = arith.constant 0.00102838012 : f32
    %3 = vector.broadcast %cst : f32 to vector<6x6x16xf32>
    %4 = arith.mulf %3, %2 : vector<6x6x16xf32>
    %5 = vector.extract_strided_slice %0 {offsets = [0, 1, 0], sizes = [6, 6, 16], strides = [1, 1, 1]} : vector<6x16x16xf32> to vector<6x6x16xf32>
    %cst_5 = arith.constant 0.00759875821 : f32
    %6 = vector.broadcast %cst_5 : f32 to vector<6x6x16xf32>
    %7 = arith.mulf %6, %5 : vector<6x6x16xf32>
    %8 = arith.addf %4, %7 : vector<6x6x16xf32>
    %9 = vector.extract_strided_slice %0 {offsets = [0, 2, 0], sizes = [6, 6, 16], strides = [1, 1, 1]} : vector<6x16x16xf32> to vector<6x6x16xf32>
    %cst_6 = arith.constant 0.0360007733 : f32
    %10 = vector.broadcast %cst_6 : f32 to vector<6x6x16xf32>
    %11 = arith.mulf %10, %9 : vector<6x6x16xf32>
    %12 = arith.addf %8, %11 : vector<6x6x16xf32>
    %13 = vector.extract_strided_slice %0 {offsets = [0, 3, 0], sizes = [6, 6, 16], strides = [1, 1, 1]} : vector<6x16x16xf32> to vector<6x6x16xf32>
    %cst_7 = arith.constant 0.109360687 : f32
    %14 = vector.broadcast %cst_7 : f32 to vector<6x6x16xf32>
    %15 = arith.mulf %14, %13 : vector<6x6x16xf32>
    %16 = arith.addf %12, %15 : vector<6x6x16xf32>
    %17 = vector.extract_strided_slice %0 {offsets = [0, 4, 0], sizes = [6, 6, 16], strides = [1, 1, 1]} : vector<6x16x16xf32> to vector<6x6x16xf32>
    %cst_8 = arith.constant 0.213005543 : f32
    %18 = vector.broadcast %cst_8 : f32 to vector<6x6x16xf32>
    %19 = arith.mulf %18, %17 : vector<6x6x16xf32>
    %20 = arith.addf %16, %19 : vector<6x6x16xf32>
    %21 = vector.extract_strided_slice %0 {offsets = [0, 5, 0], sizes = [6, 6, 16], strides = [1, 1, 1]} : vector<6x16x16xf32> to vector<6x6x16xf32>
    %cst_9 = arith.constant 0.266011715 : f32
    %22 = vector.broadcast %cst_9 : f32 to vector<6x6x16xf32>
    %23 = arith.mulf %22, %21 : vector<6x6x16xf32>
    %24 = arith.addf %20, %23 : vector<6x6x16xf32>
    %25 = vector.extract_strided_slice %0 {offsets = [0, 6, 0], sizes = [6, 6, 16], strides = [1, 1, 1]} : vector<6x16x16xf32> to vector<6x6x16xf32>
    %cst_10 = arith.constant 0.213005543 : f32
    %26 = vector.broadcast %cst_10 : f32 to vector<6x6x16xf32>
    %27 = arith.mulf %26, %25 : vector<6x6x16xf32>
    %28 = arith.addf %24, %27 : vector<6x6x16xf32>
    %29 = vector.extract_strided_slice %0 {offsets = [0, 7, 0], sizes = [6, 6, 16], strides = [1, 1, 1]} : vector<6x16x16xf32> to vector<6x6x16xf32>
    %cst_11 = arith.constant 0.109360687 : f32
    %30 = vector.broadcast %cst_11 : f32 to vector<6x6x16xf32>
    %31 = arith.mulf %30, %29 : vector<6x6x16xf32>
    %32 = arith.addf %28, %31 : vector<6x6x16xf32>
    %33 = vector.extract_strided_slice %0 {offsets = [0, 8, 0], sizes = [6, 6, 16], strides = [1, 1, 1]} : vector<6x16x16xf32> to vector<6x6x16xf32>
    %cst_12 = arith.constant 0.0360007733 : f32
    %34 = vector.broadcast %cst_12 : f32 to vector<6x6x16xf32>
    %35 = arith.mulf %34, %33 : vector<6x6x16xf32>
    %36 = arith.addf %32, %35 : vector<6x6x16xf32>
    %37 = vector.extract_strided_slice %0 {offsets = [0, 9, 0], sizes = [6, 6, 16], strides = [1, 1, 1]} : vector<6x16x16xf32> to vector<6x6x16xf32>
    %cst_13 = arith.constant 0.00759875821 : f32
    %38 = vector.broadcast %cst_13 : f32 to vector<6x6x16xf32>
    %39 = arith.mulf %38, %37 : vector<6x6x16xf32>
    %40 = arith.addf %36, %39 : vector<6x6x16xf32>
    %41 = vector.extract_strided_slice %0 {offsets = [0, 10, 0], sizes = [6, 6, 16], strides = [1, 1, 1]} : vector<6x16x16xf32> to vector<6x6x16xf32>
    %cst_14 = arith.constant 0.00102838012 : f32
    %42 = vector.broadcast %cst_14 : f32 to vector<6x6x16xf32>
    %43 = arith.mulf %42, %41 : vector<6x6x16xf32>
    %44 = arith.addf %40, %43 : vector<6x6x16xf32>
    %45 = vector.extract_strided_slice %44 {offsets = [0, 0, 0], sizes = [6, 6, 6], strides = [1, 1, 1]} : vector<6x6x16xf32> to vector<6x6x6xf32>
    %cst_15 = arith.constant 0.00102838012 : f32
    %46 = vector.broadcast %cst_15 : f32 to vector<6x6x6xf32>
    %47 = arith.mulf %46, %45 : vector<6x6x6xf32>
    %48 = vector.extract_strided_slice %44 {offsets = [0, 0, 1], sizes = [6, 6, 6], strides = [1, 1, 1]} : vector<6x6x16xf32> to vector<6x6x6xf32>
    %cst_16 = arith.constant 0.00759875821 : f32
    %49 = vector.broadcast %cst_16 : f32 to vector<6x6x6xf32>
    %50 = arith.mulf %49, %48 : vector<6x6x6xf32>
    %51 = arith.addf %47, %50 : vector<6x6x6xf32>
    %52 = vector.extract_strided_slice %44 {offsets = [0, 0, 2], sizes = [6, 6, 6], strides = [1, 1, 1]} : vector<6x6x16xf32> to vector<6x6x6xf32>
    %cst_17 = arith.constant 0.0360007733 : f32
    %53 = vector.broadcast %cst_17 : f32 to vector<6x6x6xf32>
    %54 = arith.mulf %53, %52 : vector<6x6x6xf32>
    %55 = arith.addf %51, %54 : vector<6x6x6xf32>
    %56 = vector.extract_strided_slice %44 {offsets = [0, 0, 3], sizes = [6, 6, 6], strides = [1, 1, 1]} : vector<6x6x16xf32> to vector<6x6x6xf32>
    %cst_18 = arith.constant 0.109360687 : f32
    %57 = vector.broadcast %cst_18 : f32 to vector<6x6x6xf32>
    %58 = arith.mulf %57, %56 : vector<6x6x6xf32>
    %59 = arith.addf %55, %58 : vector<6x6x6xf32>
    %60 = vector.extract_strided_slice %44 {offsets = [0, 0, 4], sizes = [6, 6, 6], strides = [1, 1, 1]} : vector<6x6x16xf32> to vector<6x6x6xf32>
    %cst_19 = arith.constant 0.213005543 : f32
    %61 = vector.broadcast %cst_19 : f32 to vector<6x6x6xf32>
    %62 = arith.mulf %61, %60 : vector<6x6x6xf32>
    %63 = arith.addf %59, %62 : vector<6x6x6xf32>
    %64 = vector.extract_strided_slice %44 {offsets = [0, 0, 5], sizes = [6, 6, 6], strides = [1, 1, 1]} : vector<6x6x16xf32> to vector<6x6x6xf32>
    %cst_20 = arith.constant 0.266011715 : f32
    %65 = vector.broadcast %cst_20 : f32 to vector<6x6x6xf32>
    %66 = arith.mulf %65, %64 : vector<6x6x6xf32>
    %67 = arith.addf %63, %66 : vector<6x6x6xf32>
    %68 = vector.extract_strided_slice %44 {offsets = [0, 0, 6], sizes = [6, 6, 6], strides = [1, 1, 1]} : vector<6x6x16xf32> to vector<6x6x6xf32>
    %cst_21 = arith.constant 0.213005543 : f32
    %69 = vector.broadcast %cst_21 : f32 to vector<6x6x6xf32>
    %70 = arith.mulf %69, %68 : vector<6x6x6xf32>
    %71 = arith.addf %67, %70 : vector<6x6x6xf32>
    %72 = vector.extract_strided_slice %44 {offsets = [0, 0, 7], sizes = [6, 6, 6], strides = [1, 1, 1]} : vector<6x6x16xf32> to vector<6x6x6xf32>
    %cst_22 = arith.constant 0.109360687 : f32
    %73 = vector.broadcast %cst_22 : f32 to vector<6x6x6xf32>
    %74 = arith.mulf %73, %72 : vector<6x6x6xf32>
    %75 = arith.addf %71, %74 : vector<6x6x6xf32>
    %76 = vector.extract_strided_slice %44 {offsets = [0, 0, 8], sizes = [6, 6, 6], strides = [1, 1, 1]} : vector<6x6x16xf32> to vector<6x6x6xf32>
    %cst_23 = arith.constant 0.0360007733 : f32
    %77 = vector.broadcast %cst_23 : f32 to vector<6x6x6xf32>
    %78 = arith.mulf %77, %76 : vector<6x6x6xf32>
    %79 = arith.addf %75, %78 : vector<6x6x6xf32>
    %80 = vector.extract_strided_slice %44 {offsets = [0, 0, 9], sizes = [6, 6, 6], strides = [1, 1, 1]} : vector<6x6x16xf32> to vector<6x6x6xf32>
    %cst_24 = arith.constant 0.00759875821 : f32
    %81 = vector.broadcast %cst_24 : f32 to vector<6x6x6xf32>
    %82 = arith.mulf %81, %80 : vector<6x6x6xf32>
    %83 = arith.addf %79, %82 : vector<6x6x6xf32>
    %84 = vector.extract_strided_slice %44 {offsets = [0, 0, 10], sizes = [6, 6, 6], strides = [1, 1, 1]} : vector<6x6x16xf32> to vector<6x6x6xf32>
    %cst_25 = arith.constant 0.00102838012 : f32
    %85 = vector.broadcast %cst_25 : f32 to vector<6x6x6xf32>
    %86 = arith.mulf %85, %84 : vector<6x6x6xf32>
    %87 = arith.addf %83, %86 : vector<6x6x6xf32>
    %88 = vector.extract_strided_slice %1 {offsets = [0, 0, 0], sizes = [6, 6, 16], strides = [1, 1, 1]} : vector<6x16x16xf32> to vector<6x6x16xf32>
    %cst_26 = arith.constant 0.00102838012 : f32
    %89 = vector.broadcast %cst_26 : f32 to vector<6x6x16xf32>
    %90 = arith.mulf %89, %88 : vector<6x6x16xf32>
    %91 = vector.extract_strided_slice %1 {offsets = [0, 1, 0], sizes = [6, 6, 16], strides = [1, 1, 1]} : vector<6x16x16xf32> to vector<6x6x16xf32>
    %cst_27 = arith.constant 0.00759875821 : f32
    %92 = vector.broadcast %cst_27 : f32 to vector<6x6x16xf32>
    %93 = arith.mulf %92, %91 : vector<6x6x16xf32>
    %94 = arith.addf %90, %93 : vector<6x6x16xf32>
    %95 = vector.extract_strided_slice %1 {offsets = [0, 2, 0], sizes = [6, 6, 16], strides = [1, 1, 1]} : vector<6x16x16xf32> to vector<6x6x16xf32>
    %cst_28 = arith.constant 0.0360007733 : f32
    %96 = vector.broadcast %cst_28 : f32 to vector<6x6x16xf32>
    %97 = arith.mulf %96, %95 : vector<6x6x16xf32>
    %98 = arith.addf %94, %97 : vector<6x6x16xf32>
    %99 = vector.extract_strided_slice %1 {offsets = [0, 3, 0], sizes = [6, 6, 16], strides = [1, 1, 1]} : vector<6x16x16xf32> to vector<6x6x16xf32>
    %cst_29 = arith.constant 0.109360687 : f32
    %100 = vector.broadcast %cst_29 : f32 to vector<6x6x16xf32>
    %101 = arith.mulf %100, %99 : vector<6x6x16xf32>
    %102 = arith.addf %98, %101 : vector<6x6x16xf32>
    %103 = vector.extract_strided_slice %1 {offsets = [0, 4, 0], sizes = [6, 6, 16], strides = [1, 1, 1]} : vector<6x16x16xf32> to vector<6x6x16xf32>
    %cst_30 = arith.constant 0.213005543 : f32
    %104 = vector.broadcast %cst_30 : f32 to vector<6x6x16xf32>
    %105 = arith.mulf %104, %103 : vector<6x6x16xf32>
    %106 = arith.addf %102, %105 : vector<6x6x16xf32>
    %107 = vector.extract_strided_slice %1 {offsets = [0, 5, 0], sizes = [6, 6, 16], strides = [1, 1, 1]} : vector<6x16x16xf32> to vector<6x6x16xf32>
    %cst_31 = arith.constant 0.266011715 : f32
    %108 = vector.broadcast %cst_31 : f32 to vector<6x6x16xf32>
    %109 = arith.mulf %108, %107 : vector<6x6x16xf32>
    %110 = arith.addf %106, %109 : vector<6x6x16xf32>
    %111 = vector.extract_strided_slice %1 {offsets = [0, 6, 0], sizes = [6, 6, 16], strides = [1, 1, 1]} : vector<6x16x16xf32> to vector<6x6x16xf32>
    %cst_32 = arith.constant 0.213005543 : f32
    %112 = vector.broadcast %cst_32 : f32 to vector<6x6x16xf32>
    %113 = arith.mulf %112, %111 : vector<6x6x16xf32>
    %114 = arith.addf %110, %113 : vector<6x6x16xf32>
    %115 = vector.extract_strided_slice %1 {offsets = [0, 7, 0], sizes = [6, 6, 16], strides = [1, 1, 1]} : vector<6x16x16xf32> to vector<6x6x16xf32>
    %cst_33 = arith.constant 0.109360687 : f32
    %116 = vector.broadcast %cst_33 : f32 to vector<6x6x16xf32>
    %117 = arith.mulf %116, %115 : vector<6x6x16xf32>
    %118 = arith.addf %114, %117 : vector<6x6x16xf32>
    %119 = vector.extract_strided_slice %1 {offsets = [0, 8, 0], sizes = [6, 6, 16], strides = [1, 1, 1]} : vector<6x16x16xf32> to vector<6x6x16xf32>
    %cst_34 = arith.constant 0.0360007733 : f32
    %120 = vector.broadcast %cst_34 : f32 to vector<6x6x16xf32>
    %121 = arith.mulf %120, %119 : vector<6x6x16xf32>
    %122 = arith.addf %118, %121 : vector<6x6x16xf32>
    %123 = vector.extract_strided_slice %1 {offsets = [0, 9, 0], sizes = [6, 6, 16], strides = [1, 1, 1]} : vector<6x16x16xf32> to vector<6x6x16xf32>
    %cst_35 = arith.constant 0.00759875821 : f32
    %124 = vector.broadcast %cst_35 : f32 to vector<6x6x16xf32>
    %125 = arith.mulf %124, %123 : vector<6x6x16xf32>
    %126 = arith.addf %122, %125 : vector<6x6x16xf32>
    %127 = vector.extract_strided_slice %1 {offsets = [0, 10, 0], sizes = [6, 6, 16], strides = [1, 1, 1]} : vector<6x16x16xf32> to vector<6x6x16xf32>
    %cst_36 = arith.constant 0.00102838012 : f32
    %128 = vector.broadcast %cst_36 : f32 to vector<6x6x16xf32>
    %129 = arith.mulf %128, %127 : vector<6x6x16xf32>
    %130 = arith.addf %126, %129 : vector<6x6x16xf32>
    %131 = vector.extract_strided_slice %130 {offsets = [0, 0, 0], sizes = [6, 6, 6], strides = [1, 1, 1]} : vector<6x6x16xf32> to vector<6x6x6xf32>
    %cst_37 = arith.constant 0.00102838012 : f32
    %132 = vector.broadcast %cst_37 : f32 to vector<6x6x6xf32>
    %133 = arith.mulf %132, %131 : vector<6x6x6xf32>
    %134 = vector.extract_strided_slice %130 {offsets = [0, 0, 1], sizes = [6, 6, 6], strides = [1, 1, 1]} : vector<6x6x16xf32> to vector<6x6x6xf32>
    %cst_38 = arith.constant 0.00759875821 : f32
    %135 = vector.broadcast %cst_38 : f32 to vector<6x6x6xf32>
    %136 = arith.mulf %135, %134 : vector<6x6x6xf32>
    %137 = arith.addf %133, %136 : vector<6x6x6xf32>
    %138 = vector.extract_strided_slice %130 {offsets = [0, 0, 2], sizes = [6, 6, 6], strides = [1, 1, 1]} : vector<6x6x16xf32> to vector<6x6x6xf32>
    %cst_39 = arith.constant 0.0360007733 : f32
    %139 = vector.broadcast %cst_39 : f32 to vector<6x6x6xf32>
    %140 = arith.mulf %139, %138 : vector<6x6x6xf32>
    %141 = arith.addf %137, %140 : vector<6x6x6xf32>
    %142 = vector.extract_strided_slice %130 {offsets = [0, 0, 3], sizes = [6, 6, 6], strides = [1, 1, 1]} : vector<6x6x16xf32> to vector<6x6x6xf32>
    %cst_40 = arith.constant 0.109360687 : f32
    %143 = vector.broadcast %cst_40 : f32 to vector<6x6x6xf32>
    %144 = arith.mulf %143, %142 : vector<6x6x6xf32>
    %145 = arith.addf %141, %144 : vector<6x6x6xf32>
    %146 = vector.extract_strided_slice %130 {offsets = [0, 0, 4], sizes = [6, 6, 6], strides = [1, 1, 1]} : vector<6x6x16xf32> to vector<6x6x6xf32>
    %cst_41 = arith.constant 0.213005543 : f32
    %147 = vector.broadcast %cst_41 : f32 to vector<6x6x6xf32>
    %148 = arith.mulf %147, %146 : vector<6x6x6xf32>
    %149 = arith.addf %145, %148 : vector<6x6x6xf32>
    %150 = vector.extract_strided_slice %130 {offsets = [0, 0, 5], sizes = [6, 6, 6], strides = [1, 1, 1]} : vector<6x6x16xf32> to vector<6x6x6xf32>
    %cst_42 = arith.constant 0.266011715 : f32
    %151 = vector.broadcast %cst_42 : f32 to vector<6x6x6xf32>
    %152 = arith.mulf %151, %150 : vector<6x6x6xf32>
    %153 = arith.addf %149, %152 : vector<6x6x6xf32>
    %154 = vector.extract_strided_slice %130 {offsets = [0, 0, 6], sizes = [6, 6, 6], strides = [1, 1, 1]} : vector<6x6x16xf32> to vector<6x6x6xf32>
    %cst_43 = arith.constant 0.213005543 : f32
    %155 = vector.broadcast %cst_43 : f32 to vector<6x6x6xf32>
    %156 = arith.mulf %155, %154 : vector<6x6x6xf32>
    %157 = arith.addf %153, %156 : vector<6x6x6xf32>
    %158 = vector.extract_strided_slice %130 {offsets = [0, 0, 7], sizes = [6, 6, 6], strides = [1, 1, 1]} : vector<6x6x16xf32> to vector<6x6x6xf32>
    %cst_44 = arith.constant 0.109360687 : f32
    %159 = vector.broadcast %cst_44 : f32 to vector<6x6x6xf32>
    %160 = arith.mulf %159, %158 : vector<6x6x6xf32>
    %161 = arith.addf %157, %160 : vector<6x6x6xf32>
    %162 = vector.extract_strided_slice %130 {offsets = [0, 0, 8], sizes = [6, 6, 6], strides = [1, 1, 1]} : vector<6x6x16xf32> to vector<6x6x6xf32>
    %cst_45 = arith.constant 0.0360007733 : f32
    %163 = vector.broadcast %cst_45 : f32 to vector<6x6x6xf32>
    %164 = arith.mulf %163, %162 : vector<6x6x6xf32>
    %165 = arith.addf %161, %164 : vector<6x6x6xf32>
    %166 = vector.extract_strided_slice %130 {offsets = [0, 0, 9], sizes = [6, 6, 6], strides = [1, 1, 1]} : vector<6x6x16xf32> to vector<6x6x6xf32>
    %cst_46 = arith.constant 0.00759875821 : f32
    %167 = vector.broadcast %cst_46 : f32 to vector<6x6x6xf32>
    %168 = arith.mulf %167, %166 : vector<6x6x6xf32>
    %169 = arith.addf %165, %168 : vector<6x6x6xf32>
    %170 = vector.extract_strided_slice %130 {offsets = [0, 0, 10], sizes = [6, 6, 6], strides = [1, 1, 1]} : vector<6x6x16xf32> to vector<6x6x6xf32>
    %cst_47 = arith.constant 0.00102838012 : f32
    %171 = vector.broadcast %cst_47 : f32 to vector<6x6x6xf32>
    %172 = arith.mulf %171, %170 : vector<6x6x6xf32>
    %173 = arith.addf %169, %172 : vector<6x6x6xf32>
    %174 = arith.mulf %87, %87 : vector<6x6x6xf32>
    %175 = arith.mulf %173, %173 : vector<6x6x6xf32>
    %176 = arith.mulf %87, %173 : vector<6x6x6xf32>
    %177 = arith.mulf %0, %0 : vector<6x16x16xf32>
    %178 = vector.extract_strided_slice %177 {offsets = [0, 0, 0], sizes = [6, 6, 16], strides = [1, 1, 1]} : vector<6x16x16xf32> to vector<6x6x16xf32>
    %cst_48 = arith.constant 0.00102838012 : f32
    %179 = vector.broadcast %cst_48 : f32 to vector<6x6x16xf32>
    %180 = arith.mulf %179, %178 : vector<6x6x16xf32>
    %181 = vector.extract_strided_slice %177 {offsets = [0, 1, 0], sizes = [6, 6, 16], strides = [1, 1, 1]} : vector<6x16x16xf32> to vector<6x6x16xf32>
    %cst_49 = arith.constant 0.00759875821 : f32
    %182 = vector.broadcast %cst_49 : f32 to vector<6x6x16xf32>
    %183 = arith.mulf %182, %181 : vector<6x6x16xf32>
    %184 = arith.addf %180, %183 : vector<6x6x16xf32>
    %185 = vector.extract_strided_slice %177 {offsets = [0, 2, 0], sizes = [6, 6, 16], strides = [1, 1, 1]} : vector<6x16x16xf32> to vector<6x6x16xf32>
    %cst_50 = arith.constant 0.0360007733 : f32
    %186 = vector.broadcast %cst_50 : f32 to vector<6x6x16xf32>
    %187 = arith.mulf %186, %185 : vector<6x6x16xf32>
    %188 = arith.addf %184, %187 : vector<6x6x16xf32>
    %189 = vector.extract_strided_slice %177 {offsets = [0, 3, 0], sizes = [6, 6, 16], strides = [1, 1, 1]} : vector<6x16x16xf32> to vector<6x6x16xf32>
    %cst_51 = arith.constant 0.109360687 : f32
    %190 = vector.broadcast %cst_51 : f32 to vector<6x6x16xf32>
    %191 = arith.mulf %190, %189 : vector<6x6x16xf32>
    %192 = arith.addf %188, %191 : vector<6x6x16xf32>
    %193 = vector.extract_strided_slice %177 {offsets = [0, 4, 0], sizes = [6, 6, 16], strides = [1, 1, 1]} : vector<6x16x16xf32> to vector<6x6x16xf32>
    %cst_52 = arith.constant 0.213005543 : f32
    %194 = vector.broadcast %cst_52 : f32 to vector<6x6x16xf32>
    %195 = arith.mulf %194, %193 : vector<6x6x16xf32>
    %196 = arith.addf %192, %195 : vector<6x6x16xf32>
    %197 = vector.extract_strided_slice %177 {offsets = [0, 5, 0], sizes = [6, 6, 16], strides = [1, 1, 1]} : vector<6x16x16xf32> to vector<6x6x16xf32>
    %cst_53 = arith.constant 0.266011715 : f32
    %198 = vector.broadcast %cst_53 : f32 to vector<6x6x16xf32>
    %199 = arith.mulf %198, %197 : vector<6x6x16xf32>
    %200 = arith.addf %196, %199 : vector<6x6x16xf32>
    %201 = vector.extract_strided_slice %177 {offsets = [0, 6, 0], sizes = [6, 6, 16], strides = [1, 1, 1]} : vector<6x16x16xf32> to vector<6x6x16xf32>
    %cst_54 = arith.constant 0.213005543 : f32
    %202 = vector.broadcast %cst_54 : f32 to vector<6x6x16xf32>
    %203 = arith.mulf %202, %201 : vector<6x6x16xf32>
    %204 = arith.addf %200, %203 : vector<6x6x16xf32>
    %205 = vector.extract_strided_slice %177 {offsets = [0, 7, 0], sizes = [6, 6, 16], strides = [1, 1, 1]} : vector<6x16x16xf32> to vector<6x6x16xf32>
    %cst_55 = arith.constant 0.109360687 : f32
    %206 = vector.broadcast %cst_55 : f32 to vector<6x6x16xf32>
    %207 = arith.mulf %206, %205 : vector<6x6x16xf32>
    %208 = arith.addf %204, %207 : vector<6x6x16xf32>
    %209 = vector.extract_strided_slice %177 {offsets = [0, 8, 0], sizes = [6, 6, 16], strides = [1, 1, 1]} : vector<6x16x16xf32> to vector<6x6x16xf32>
    %cst_56 = arith.constant 0.0360007733 : f32
    %210 = vector.broadcast %cst_56 : f32 to vector<6x6x16xf32>
    %211 = arith.mulf %210, %209 : vector<6x6x16xf32>
    %212 = arith.addf %208, %211 : vector<6x6x16xf32>
    %213 = vector.extract_strided_slice %177 {offsets = [0, 9, 0], sizes = [6, 6, 16], strides = [1, 1, 1]} : vector<6x16x16xf32> to vector<6x6x16xf32>
    %cst_57 = arith.constant 0.00759875821 : f32
    %214 = vector.broadcast %cst_57 : f32 to vector<6x6x16xf32>
    %215 = arith.mulf %214, %213 : vector<6x6x16xf32>
    %216 = arith.addf %212, %215 : vector<6x6x16xf32>
    %217 = vector.extract_strided_slice %177 {offsets = [0, 10, 0], sizes = [6, 6, 16], strides = [1, 1, 1]} : vector<6x16x16xf32> to vector<6x6x16xf32>
    %cst_58 = arith.constant 0.00102838012 : f32
    %218 = vector.broadcast %cst_58 : f32 to vector<6x6x16xf32>
    %219 = arith.mulf %218, %217 : vector<6x6x16xf32>
    %220 = arith.addf %216, %219 : vector<6x6x16xf32>
    %221 = vector.extract_strided_slice %220 {offsets = [0, 0, 0], sizes = [6, 6, 6], strides = [1, 1, 1]} : vector<6x6x16xf32> to vector<6x6x6xf32>
    %cst_59 = arith.constant 0.00102838012 : f32
    %222 = vector.broadcast %cst_59 : f32 to vector<6x6x6xf32>
    %223 = arith.mulf %222, %221 : vector<6x6x6xf32>
    %224 = vector.extract_strided_slice %220 {offsets = [0, 0, 1], sizes = [6, 6, 6], strides = [1, 1, 1]} : vector<6x6x16xf32> to vector<6x6x6xf32>
    %cst_60 = arith.constant 0.00759875821 : f32
    %225 = vector.broadcast %cst_60 : f32 to vector<6x6x6xf32>
    %226 = arith.mulf %225, %224 : vector<6x6x6xf32>
    %227 = arith.addf %223, %226 : vector<6x6x6xf32>
    %228 = vector.extract_strided_slice %220 {offsets = [0, 0, 2], sizes = [6, 6, 6], strides = [1, 1, 1]} : vector<6x6x16xf32> to vector<6x6x6xf32>
    %cst_61 = arith.constant 0.0360007733 : f32
    %229 = vector.broadcast %cst_61 : f32 to vector<6x6x6xf32>
    %230 = arith.mulf %229, %228 : vector<6x6x6xf32>
    %231 = arith.addf %227, %230 : vector<6x6x6xf32>
    %232 = vector.extract_strided_slice %220 {offsets = [0, 0, 3], sizes = [6, 6, 6], strides = [1, 1, 1]} : vector<6x6x16xf32> to vector<6x6x6xf32>
    %cst_62 = arith.constant 0.109360687 : f32
    %233 = vector.broadcast %cst_62 : f32 to vector<6x6x6xf32>
    %234 = arith.mulf %233, %232 : vector<6x6x6xf32>
    %235 = arith.addf %231, %234 : vector<6x6x6xf32>
    %236 = vector.extract_strided_slice %220 {offsets = [0, 0, 4], sizes = [6, 6, 6], strides = [1, 1, 1]} : vector<6x6x16xf32> to vector<6x6x6xf32>
    %cst_63 = arith.constant 0.213005543 : f32
    %237 = vector.broadcast %cst_63 : f32 to vector<6x6x6xf32>
    %238 = arith.mulf %237, %236 : vector<6x6x6xf32>
    %239 = arith.addf %235, %238 : vector<6x6x6xf32>
    %240 = vector.extract_strided_slice %220 {offsets = [0, 0, 5], sizes = [6, 6, 6], strides = [1, 1, 1]} : vector<6x6x16xf32> to vector<6x6x6xf32>
    %cst_64 = arith.constant 0.266011715 : f32
    %241 = vector.broadcast %cst_64 : f32 to vector<6x6x6xf32>
    %242 = arith.mulf %241, %240 : vector<6x6x6xf32>
    %243 = arith.addf %239, %242 : vector<6x6x6xf32>
    %244 = vector.extract_strided_slice %220 {offsets = [0, 0, 6], sizes = [6, 6, 6], strides = [1, 1, 1]} : vector<6x6x16xf32> to vector<6x6x6xf32>
    %cst_65 = arith.constant 0.213005543 : f32
    %245 = vector.broadcast %cst_65 : f32 to vector<6x6x6xf32>
    %246 = arith.mulf %245, %244 : vector<6x6x6xf32>
    %247 = arith.addf %243, %246 : vector<6x6x6xf32>
    %248 = vector.extract_strided_slice %220 {offsets = [0, 0, 7], sizes = [6, 6, 6], strides = [1, 1, 1]} : vector<6x6x16xf32> to vector<6x6x6xf32>
    %cst_66 = arith.constant 0.109360687 : f32
    %249 = vector.broadcast %cst_66 : f32 to vector<6x6x6xf32>
    %250 = arith.mulf %249, %248 : vector<6x6x6xf32>
    %251 = arith.addf %247, %250 : vector<6x6x6xf32>
    %252 = vector.extract_strided_slice %220 {offsets = [0, 0, 8], sizes = [6, 6, 6], strides = [1, 1, 1]} : vector<6x6x16xf32> to vector<6x6x6xf32>
    %cst_67 = arith.constant 0.0360007733 : f32
    %253 = vector.broadcast %cst_67 : f32 to vector<6x6x6xf32>
    %254 = arith.mulf %253, %252 : vector<6x6x6xf32>
    %255 = arith.addf %251, %254 : vector<6x6x6xf32>
    %256 = vector.extract_strided_slice %220 {offsets = [0, 0, 9], sizes = [6, 6, 6], strides = [1, 1, 1]} : vector<6x6x16xf32> to vector<6x6x6xf32>
    %cst_68 = arith.constant 0.00759875821 : f32
    %257 = vector.broadcast %cst_68 : f32 to vector<6x6x6xf32>
    %258 = arith.mulf %257, %256 : vector<6x6x6xf32>
    %259 = arith.addf %255, %258 : vector<6x6x6xf32>
    %260 = vector.extract_strided_slice %220 {offsets = [0, 0, 10], sizes = [6, 6, 6], strides = [1, 1, 1]} : vector<6x6x16xf32> to vector<6x6x6xf32>
    %cst_69 = arith.constant 0.00102838012 : f32
    %261 = vector.broadcast %cst_69 : f32 to vector<6x6x6xf32>
    %262 = arith.mulf %261, %260 : vector<6x6x6xf32>
    %263 = arith.addf %259, %262 : vector<6x6x6xf32>
    %264 = arith.subf %263, %174 : vector<6x6x6xf32>
    %265 = arith.mulf %1, %1 : vector<6x16x16xf32>
    %266 = vector.extract_strided_slice %265 {offsets = [0, 0, 0], sizes = [6, 6, 16], strides = [1, 1, 1]} : vector<6x16x16xf32> to vector<6x6x16xf32>
    %cst_70 = arith.constant 0.00102838012 : f32
    %267 = vector.broadcast %cst_70 : f32 to vector<6x6x16xf32>
    %268 = arith.mulf %267, %266 : vector<6x6x16xf32>
    %269 = vector.extract_strided_slice %265 {offsets = [0, 1, 0], sizes = [6, 6, 16], strides = [1, 1, 1]} : vector<6x16x16xf32> to vector<6x6x16xf32>
    %cst_71 = arith.constant 0.00759875821 : f32
    %270 = vector.broadcast %cst_71 : f32 to vector<6x6x16xf32>
    %271 = arith.mulf %270, %269 : vector<6x6x16xf32>
    %272 = arith.addf %268, %271 : vector<6x6x16xf32>
    %273 = vector.extract_strided_slice %265 {offsets = [0, 2, 0], sizes = [6, 6, 16], strides = [1, 1, 1]} : vector<6x16x16xf32> to vector<6x6x16xf32>
    %cst_72 = arith.constant 0.0360007733 : f32
    %274 = vector.broadcast %cst_72 : f32 to vector<6x6x16xf32>
    %275 = arith.mulf %274, %273 : vector<6x6x16xf32>
    %276 = arith.addf %272, %275 : vector<6x6x16xf32>
    %277 = vector.extract_strided_slice %265 {offsets = [0, 3, 0], sizes = [6, 6, 16], strides = [1, 1, 1]} : vector<6x16x16xf32> to vector<6x6x16xf32>
    %cst_73 = arith.constant 0.109360687 : f32
    %278 = vector.broadcast %cst_73 : f32 to vector<6x6x16xf32>
    %279 = arith.mulf %278, %277 : vector<6x6x16xf32>
    %280 = arith.addf %276, %279 : vector<6x6x16xf32>
    %281 = vector.extract_strided_slice %265 {offsets = [0, 4, 0], sizes = [6, 6, 16], strides = [1, 1, 1]} : vector<6x16x16xf32> to vector<6x6x16xf32>
    %cst_74 = arith.constant 0.213005543 : f32
    %282 = vector.broadcast %cst_74 : f32 to vector<6x6x16xf32>
    %283 = arith.mulf %282, %281 : vector<6x6x16xf32>
    %284 = arith.addf %280, %283 : vector<6x6x16xf32>
    %285 = vector.extract_strided_slice %265 {offsets = [0, 5, 0], sizes = [6, 6, 16], strides = [1, 1, 1]} : vector<6x16x16xf32> to vector<6x6x16xf32>
    %cst_75 = arith.constant 0.266011715 : f32
    %286 = vector.broadcast %cst_75 : f32 to vector<6x6x16xf32>
    %287 = arith.mulf %286, %285 : vector<6x6x16xf32>
    %288 = arith.addf %284, %287 : vector<6x6x16xf32>
    %289 = vector.extract_strided_slice %265 {offsets = [0, 6, 0], sizes = [6, 6, 16], strides = [1, 1, 1]} : vector<6x16x16xf32> to vector<6x6x16xf32>
    %cst_76 = arith.constant 0.213005543 : f32
    %290 = vector.broadcast %cst_76 : f32 to vector<6x6x16xf32>
    %291 = arith.mulf %290, %289 : vector<6x6x16xf32>
    %292 = arith.addf %288, %291 : vector<6x6x16xf32>
    %293 = vector.extract_strided_slice %265 {offsets = [0, 7, 0], sizes = [6, 6, 16], strides = [1, 1, 1]} : vector<6x16x16xf32> to vector<6x6x16xf32>
    %cst_77 = arith.constant 0.109360687 : f32
    %294 = vector.broadcast %cst_77 : f32 to vector<6x6x16xf32>
    %295 = arith.mulf %294, %293 : vector<6x6x16xf32>
    %296 = arith.addf %292, %295 : vector<6x6x16xf32>
    %297 = vector.extract_strided_slice %265 {offsets = [0, 8, 0], sizes = [6, 6, 16], strides = [1, 1, 1]} : vector<6x16x16xf32> to vector<6x6x16xf32>
    %cst_78 = arith.constant 0.0360007733 : f32
    %298 = vector.broadcast %cst_78 : f32 to vector<6x6x16xf32>
    %299 = arith.mulf %298, %297 : vector<6x6x16xf32>
    %300 = arith.addf %296, %299 : vector<6x6x16xf32>
    %301 = vector.extract_strided_slice %265 {offsets = [0, 9, 0], sizes = [6, 6, 16], strides = [1, 1, 1]} : vector<6x16x16xf32> to vector<6x6x16xf32>
    %cst_79 = arith.constant 0.00759875821 : f32
    %302 = vector.broadcast %cst_79 : f32 to vector<6x6x16xf32>
    %303 = arith.mulf %302, %301 : vector<6x6x16xf32>
    %304 = arith.addf %300, %303 : vector<6x6x16xf32>
    %305 = vector.extract_strided_slice %265 {offsets = [0, 10, 0], sizes = [6, 6, 16], strides = [1, 1, 1]} : vector<6x16x16xf32> to vector<6x6x16xf32>
    %cst_80 = arith.constant 0.00102838012 : f32
    %306 = vector.broadcast %cst_80 : f32 to vector<6x6x16xf32>
    %307 = arith.mulf %306, %305 : vector<6x6x16xf32>
    %308 = arith.addf %304, %307 : vector<6x6x16xf32>
    %309 = vector.extract_strided_slice %308 {offsets = [0, 0, 0], sizes = [6, 6, 6], strides = [1, 1, 1]} : vector<6x6x16xf32> to vector<6x6x6xf32>
    %cst_81 = arith.constant 0.00102838012 : f32
    %310 = vector.broadcast %cst_81 : f32 to vector<6x6x6xf32>
    %311 = arith.mulf %310, %309 : vector<6x6x6xf32>
    %312 = vector.extract_strided_slice %308 {offsets = [0, 0, 1], sizes = [6, 6, 6], strides = [1, 1, 1]} : vector<6x6x16xf32> to vector<6x6x6xf32>
    %cst_82 = arith.constant 0.00759875821 : f32
    %313 = vector.broadcast %cst_82 : f32 to vector<6x6x6xf32>
    %314 = arith.mulf %313, %312 : vector<6x6x6xf32>
    %315 = arith.addf %311, %314 : vector<6x6x6xf32>
    %316 = vector.extract_strided_slice %308 {offsets = [0, 0, 2], sizes = [6, 6, 6], strides = [1, 1, 1]} : vector<6x6x16xf32> to vector<6x6x6xf32>
    %cst_83 = arith.constant 0.0360007733 : f32
    %317 = vector.broadcast %cst_83 : f32 to vector<6x6x6xf32>
    %318 = arith.mulf %317, %316 : vector<6x6x6xf32>
    %319 = arith.addf %315, %318 : vector<6x6x6xf32>
    %320 = vector.extract_strided_slice %308 {offsets = [0, 0, 3], sizes = [6, 6, 6], strides = [1, 1, 1]} : vector<6x6x16xf32> to vector<6x6x6xf32>
    %cst_84 = arith.constant 0.109360687 : f32
    %321 = vector.broadcast %cst_84 : f32 to vector<6x6x6xf32>
    %322 = arith.mulf %321, %320 : vector<6x6x6xf32>
    %323 = arith.addf %319, %322 : vector<6x6x6xf32>
    %324 = vector.extract_strided_slice %308 {offsets = [0, 0, 4], sizes = [6, 6, 6], strides = [1, 1, 1]} : vector<6x6x16xf32> to vector<6x6x6xf32>
    %cst_85 = arith.constant 0.213005543 : f32
    %325 = vector.broadcast %cst_85 : f32 to vector<6x6x6xf32>
    %326 = arith.mulf %325, %324 : vector<6x6x6xf32>
    %327 = arith.addf %323, %326 : vector<6x6x6xf32>
    %328 = vector.extract_strided_slice %308 {offsets = [0, 0, 5], sizes = [6, 6, 6], strides = [1, 1, 1]} : vector<6x6x16xf32> to vector<6x6x6xf32>
    %cst_86 = arith.constant 0.266011715 : f32
    %329 = vector.broadcast %cst_86 : f32 to vector<6x6x6xf32>
    %330 = arith.mulf %329, %328 : vector<6x6x6xf32>
    %331 = arith.addf %327, %330 : vector<6x6x6xf32>
    %332 = vector.extract_strided_slice %308 {offsets = [0, 0, 6], sizes = [6, 6, 6], strides = [1, 1, 1]} : vector<6x6x16xf32> to vector<6x6x6xf32>
    %cst_87 = arith.constant 0.213005543 : f32
    %333 = vector.broadcast %cst_87 : f32 to vector<6x6x6xf32>
    %334 = arith.mulf %333, %332 : vector<6x6x6xf32>
    %335 = arith.addf %331, %334 : vector<6x6x6xf32>
    %336 = vector.extract_strided_slice %308 {offsets = [0, 0, 7], sizes = [6, 6, 6], strides = [1, 1, 1]} : vector<6x6x16xf32> to vector<6x6x6xf32>
    %cst_88 = arith.constant 0.109360687 : f32
    %337 = vector.broadcast %cst_88 : f32 to vector<6x6x6xf32>
    %338 = arith.mulf %337, %336 : vector<6x6x6xf32>
    %339 = arith.addf %335, %338 : vector<6x6x6xf32>
    %340 = vector.extract_strided_slice %308 {offsets = [0, 0, 8], sizes = [6, 6, 6], strides = [1, 1, 1]} : vector<6x6x16xf32> to vector<6x6x6xf32>
    %cst_89 = arith.constant 0.0360007733 : f32
    %341 = vector.broadcast %cst_89 : f32 to vector<6x6x6xf32>
    %342 = arith.mulf %341, %340 : vector<6x6x6xf32>
    %343 = arith.addf %339, %342 : vector<6x6x6xf32>
    %344 = vector.extract_strided_slice %308 {offsets = [0, 0, 9], sizes = [6, 6, 6], strides = [1, 1, 1]} : vector<6x6x16xf32> to vector<6x6x6xf32>
    %cst_90 = arith.constant 0.00759875821 : f32
    %345 = vector.broadcast %cst_90 : f32 to vector<6x6x6xf32>
    %346 = arith.mulf %345, %344 : vector<6x6x6xf32>
    %347 = arith.addf %343, %346 : vector<6x6x6xf32>
    %348 = vector.extract_strided_slice %308 {offsets = [0, 0, 10], sizes = [6, 6, 6], strides = [1, 1, 1]} : vector<6x6x16xf32> to vector<6x6x6xf32>
    %cst_91 = arith.constant 0.00102838012 : f32
    %349 = vector.broadcast %cst_91 : f32 to vector<6x6x6xf32>
    %350 = arith.mulf %349, %348 : vector<6x6x6xf32>
    %351 = arith.addf %347, %350 : vector<6x6x6xf32>
    %352 = arith.subf %351, %175 : vector<6x6x6xf32>
    %353 = arith.mulf %0, %1 : vector<6x16x16xf32>
    %354 = vector.extract_strided_slice %353 {offsets = [0, 0, 0], sizes = [6, 6, 16], strides = [1, 1, 1]} : vector<6x16x16xf32> to vector<6x6x16xf32>
    %cst_92 = arith.constant 0.00102838012 : f32
    %355 = vector.broadcast %cst_92 : f32 to vector<6x6x16xf32>
    %356 = arith.mulf %355, %354 : vector<6x6x16xf32>
    %357 = vector.extract_strided_slice %353 {offsets = [0, 1, 0], sizes = [6, 6, 16], strides = [1, 1, 1]} : vector<6x16x16xf32> to vector<6x6x16xf32>
    %cst_93 = arith.constant 0.00759875821 : f32
    %358 = vector.broadcast %cst_93 : f32 to vector<6x6x16xf32>
    %359 = arith.mulf %358, %357 : vector<6x6x16xf32>
    %360 = arith.addf %356, %359 : vector<6x6x16xf32>
    %361 = vector.extract_strided_slice %353 {offsets = [0, 2, 0], sizes = [6, 6, 16], strides = [1, 1, 1]} : vector<6x16x16xf32> to vector<6x6x16xf32>
    %cst_94 = arith.constant 0.0360007733 : f32
    %362 = vector.broadcast %cst_94 : f32 to vector<6x6x16xf32>
    %363 = arith.mulf %362, %361 : vector<6x6x16xf32>
    %364 = arith.addf %360, %363 : vector<6x6x16xf32>
    %365 = vector.extract_strided_slice %353 {offsets = [0, 3, 0], sizes = [6, 6, 16], strides = [1, 1, 1]} : vector<6x16x16xf32> to vector<6x6x16xf32>
    %cst_95 = arith.constant 0.109360687 : f32
    %366 = vector.broadcast %cst_95 : f32 to vector<6x6x16xf32>
    %367 = arith.mulf %366, %365 : vector<6x6x16xf32>
    %368 = arith.addf %364, %367 : vector<6x6x16xf32>
    %369 = vector.extract_strided_slice %353 {offsets = [0, 4, 0], sizes = [6, 6, 16], strides = [1, 1, 1]} : vector<6x16x16xf32> to vector<6x6x16xf32>
    %cst_96 = arith.constant 0.213005543 : f32
    %370 = vector.broadcast %cst_96 : f32 to vector<6x6x16xf32>
    %371 = arith.mulf %370, %369 : vector<6x6x16xf32>
    %372 = arith.addf %368, %371 : vector<6x6x16xf32>
    %373 = vector.extract_strided_slice %353 {offsets = [0, 5, 0], sizes = [6, 6, 16], strides = [1, 1, 1]} : vector<6x16x16xf32> to vector<6x6x16xf32>
    %cst_97 = arith.constant 0.266011715 : f32
    %374 = vector.broadcast %cst_97 : f32 to vector<6x6x16xf32>
    %375 = arith.mulf %374, %373 : vector<6x6x16xf32>
    %376 = arith.addf %372, %375 : vector<6x6x16xf32>
    %377 = vector.extract_strided_slice %353 {offsets = [0, 6, 0], sizes = [6, 6, 16], strides = [1, 1, 1]} : vector<6x16x16xf32> to vector<6x6x16xf32>
    %cst_98 = arith.constant 0.213005543 : f32
    %378 = vector.broadcast %cst_98 : f32 to vector<6x6x16xf32>
    %379 = arith.mulf %378, %377 : vector<6x6x16xf32>
    %380 = arith.addf %376, %379 : vector<6x6x16xf32>
    %381 = vector.extract_strided_slice %353 {offsets = [0, 7, 0], sizes = [6, 6, 16], strides = [1, 1, 1]} : vector<6x16x16xf32> to vector<6x6x16xf32>
    %cst_99 = arith.constant 0.109360687 : f32
    %382 = vector.broadcast %cst_99 : f32 to vector<6x6x16xf32>
    %383 = arith.mulf %382, %381 : vector<6x6x16xf32>
    %384 = arith.addf %380, %383 : vector<6x6x16xf32>
    %385 = vector.extract_strided_slice %353 {offsets = [0, 8, 0], sizes = [6, 6, 16], strides = [1, 1, 1]} : vector<6x16x16xf32> to vector<6x6x16xf32>
    %cst_100 = arith.constant 0.0360007733 : f32
    %386 = vector.broadcast %cst_100 : f32 to vector<6x6x16xf32>
    %387 = arith.mulf %386, %385 : vector<6x6x16xf32>
    %388 = arith.addf %384, %387 : vector<6x6x16xf32>
    %389 = vector.extract_strided_slice %353 {offsets = [0, 9, 0], sizes = [6, 6, 16], strides = [1, 1, 1]} : vector<6x16x16xf32> to vector<6x6x16xf32>
    %cst_101 = arith.constant 0.00759875821 : f32
    %390 = vector.broadcast %cst_101 : f32 to vector<6x6x16xf32>
    %391 = arith.mulf %390, %389 : vector<6x6x16xf32>
    %392 = arith.addf %388, %391 : vector<6x6x16xf32>
    %393 = vector.extract_strided_slice %353 {offsets = [0, 10, 0], sizes = [6, 6, 16], strides = [1, 1, 1]} : vector<6x16x16xf32> to vector<6x6x16xf32>
    %cst_102 = arith.constant 0.00102838012 : f32
    %394 = vector.broadcast %cst_102 : f32 to vector<6x6x16xf32>
    %395 = arith.mulf %394, %393 : vector<6x6x16xf32>
    %396 = arith.addf %392, %395 : vector<6x6x16xf32>
    %397 = vector.extract_strided_slice %396 {offsets = [0, 0, 0], sizes = [6, 6, 6], strides = [1, 1, 1]} : vector<6x6x16xf32> to vector<6x6x6xf32>
    %cst_103 = arith.constant 0.00102838012 : f32
    %398 = vector.broadcast %cst_103 : f32 to vector<6x6x6xf32>
    %399 = arith.mulf %398, %397 : vector<6x6x6xf32>
    %400 = vector.extract_strided_slice %396 {offsets = [0, 0, 1], sizes = [6, 6, 6], strides = [1, 1, 1]} : vector<6x6x16xf32> to vector<6x6x6xf32>
    %cst_104 = arith.constant 0.00759875821 : f32
    %401 = vector.broadcast %cst_104 : f32 to vector<6x6x6xf32>
    %402 = arith.mulf %401, %400 : vector<6x6x6xf32>
    %403 = arith.addf %399, %402 : vector<6x6x6xf32>
    %404 = vector.extract_strided_slice %396 {offsets = [0, 0, 2], sizes = [6, 6, 6], strides = [1, 1, 1]} : vector<6x6x16xf32> to vector<6x6x6xf32>
    %cst_105 = arith.constant 0.0360007733 : f32
    %405 = vector.broadcast %cst_105 : f32 to vector<6x6x6xf32>
    %406 = arith.mulf %405, %404 : vector<6x6x6xf32>
    %407 = arith.addf %403, %406 : vector<6x6x6xf32>
    %408 = vector.extract_strided_slice %396 {offsets = [0, 0, 3], sizes = [6, 6, 6], strides = [1, 1, 1]} : vector<6x6x16xf32> to vector<6x6x6xf32>
    %cst_106 = arith.constant 0.109360687 : f32
    %409 = vector.broadcast %cst_106 : f32 to vector<6x6x6xf32>
    %410 = arith.mulf %409, %408 : vector<6x6x6xf32>
    %411 = arith.addf %407, %410 : vector<6x6x6xf32>
    %412 = vector.extract_strided_slice %396 {offsets = [0, 0, 4], sizes = [6, 6, 6], strides = [1, 1, 1]} : vector<6x6x16xf32> to vector<6x6x6xf32>
    %cst_107 = arith.constant 0.213005543 : f32
    %413 = vector.broadcast %cst_107 : f32 to vector<6x6x6xf32>
    %414 = arith.mulf %413, %412 : vector<6x6x6xf32>
    %415 = arith.addf %411, %414 : vector<6x6x6xf32>
    %416 = vector.extract_strided_slice %396 {offsets = [0, 0, 5], sizes = [6, 6, 6], strides = [1, 1, 1]} : vector<6x6x16xf32> to vector<6x6x6xf32>
    %cst_108 = arith.constant 0.266011715 : f32
    %417 = vector.broadcast %cst_108 : f32 to vector<6x6x6xf32>
    %418 = arith.mulf %417, %416 : vector<6x6x6xf32>
    %419 = arith.addf %415, %418 : vector<6x6x6xf32>
    %420 = vector.extract_strided_slice %396 {offsets = [0, 0, 6], sizes = [6, 6, 6], strides = [1, 1, 1]} : vector<6x6x16xf32> to vector<6x6x6xf32>
    %cst_109 = arith.constant 0.213005543 : f32
    %421 = vector.broadcast %cst_109 : f32 to vector<6x6x6xf32>
    %422 = arith.mulf %421, %420 : vector<6x6x6xf32>
    %423 = arith.addf %419, %422 : vector<6x6x6xf32>
    %424 = vector.extract_strided_slice %396 {offsets = [0, 0, 7], sizes = [6, 6, 6], strides = [1, 1, 1]} : vector<6x6x16xf32> to vector<6x6x6xf32>
    %cst_110 = arith.constant 0.109360687 : f32
    %425 = vector.broadcast %cst_110 : f32 to vector<6x6x6xf32>
    %426 = arith.mulf %425, %424 : vector<6x6x6xf32>
    %427 = arith.addf %423, %426 : vector<6x6x6xf32>
    %428 = vector.extract_strided_slice %396 {offsets = [0, 0, 8], sizes = [6, 6, 6], strides = [1, 1, 1]} : vector<6x6x16xf32> to vector<6x6x6xf32>
    %cst_111 = arith.constant 0.0360007733 : f32
    %429 = vector.broadcast %cst_111 : f32 to vector<6x6x6xf32>
    %430 = arith.mulf %429, %428 : vector<6x6x6xf32>
    %431 = arith.addf %427, %430 : vector<6x6x6xf32>
    %432 = vector.extract_strided_slice %396 {offsets = [0, 0, 9], sizes = [6, 6, 6], strides = [1, 1, 1]} : vector<6x6x16xf32> to vector<6x6x6xf32>
    %cst_112 = arith.constant 0.00759875821 : f32
    %433 = vector.broadcast %cst_112 : f32 to vector<6x6x6xf32>
    %434 = arith.mulf %433, %432 : vector<6x6x6xf32>
    %435 = arith.addf %431, %434 : vector<6x6x6xf32>
    %436 = vector.extract_strided_slice %396 {offsets = [0, 0, 10], sizes = [6, 6, 6], strides = [1, 1, 1]} : vector<6x6x16xf32> to vector<6x6x6xf32>
    %cst_113 = arith.constant 0.00102838012 : f32
    %437 = vector.broadcast %cst_113 : f32 to vector<6x6x6xf32>
    %438 = arith.mulf %437, %436 : vector<6x6x6xf32>
    %439 = arith.addf %435, %438 : vector<6x6x6xf32>
    %440 = arith.subf %439, %176 : vector<6x6x6xf32>
    %cst_114 = arith.constant 2.000000e+00 : f32
    %441 = vector.broadcast %cst_114 : f32 to vector<6x6x6xf32>
    %442 = arith.mulf %441, %176 : vector<6x6x6xf32>
    %cst_115 = arith.constant 6.502500e+00 : f32
    %443 = vector.broadcast %cst_115 : f32 to vector<6x6x6xf32>
    %444 = arith.addf %442, %443 : vector<6x6x6xf32>
    %cst_116 = arith.constant 2.000000e+00 : f32
    %445 = vector.broadcast %cst_116 : f32 to vector<6x6x6xf32>
    %446 = arith.mulf %445, %440 : vector<6x6x6xf32>
    %cst_117 = arith.constant 5.852250e+01 : f32
    %447 = vector.broadcast %cst_117 : f32 to vector<6x6x6xf32>
    %448 = arith.addf %446, %447 : vector<6x6x6xf32>
    %449 = arith.mulf %444, %448 : vector<6x6x6xf32>
    %450 = arith.addf %174, %175 : vector<6x6x6xf32>
    %cst_118 = arith.constant 6.502500e+00 : f32
    %451 = vector.broadcast %cst_118 : f32 to vector<6x6x6xf32>
    %452 = arith.addf %450, %451 : vector<6x6x6xf32>
    %453 = arith.addf %264, %352 : vector<6x6x6xf32>
    %cst_119 = arith.constant 5.852250e+01 : f32
    %454 = vector.broadcast %cst_119 : f32 to vector<6x6x6xf32>
    %455 = arith.addf %453, %454 : vector<6x6x6xf32>
    %456 = arith.mulf %452, %455 : vector<6x6x6xf32>
    %457 = tpu.reciprocal %456 : vector<6x6x6xf32> -> vector<6x6x6xf32>
    %458 = arith.mulf %449, %457 : vector<6x6x6xf32>
    %cst_120 = arith.constant dense<0.000000e+00> : vector<6x6xf32>
    %459 = vector.multi_reduction <add>, %458, %cst_120 [2] : vector<6x6x6xf32> to vector<6x6xf32>
    %cst_121 = arith.constant dense<0.000000e+00> : vector<6xf32>
    %460 = vector.multi_reduction <add>, %459, %cst_121 [1] : vector<6x6xf32> to vector<6xf32>
    %461 = vector.shape_cast %460 : vector<6xf32> to vector<6x1xf32>
    %cst_122 = arith.constant 0.027777778 : f32
    %462 = vector.broadcast %cst_122 : f32 to vector<6x1xf32>
    %463 = arith.mulf %461, %462 : vector<6x1xf32>
    %c6_i32 = arith.constant 6 : i32
    %464 = arith.muli %arg0, %c6_i32 : i32
    %465 = tpu.iota {dimensions = array<i32: 0>} : vector<6x1xi32>
    %466 = vector.broadcast %464 : i32 to vector<6x1xi32>
    %467 = arith.addi %466, %465 : vector<6x1xi32>
    %c6_i32_123 = arith.constant 6 : i32
    %468 = vector.broadcast %c6_i32_123 : i32 to vector<6x1xi32>
    %469 = arith.cmpi slt, %467, %468 : vector<6x1xi32>
    %cst_124 = arith.constant 0.000000e+00 : f32
    %470 = vector.broadcast %cst_124 : f32 to vector<6x1xf32>
    %471 = arith.select %469, %463, %470 : vector<6x1xi1>, vector<6x1xf32>
    %472 = vector.shape_cast %471 : vector<6x1xf32> to vector<1x6x1xf32>
    %cst_125 = arith.constant dense<0.000000e+00> : vector<1xf32>
    %473 = vector.multi_reduction <add>, %472, %cst_125 [1, 2] : vector<1x6x1xf32> to vector<1xf32>
    %474 = vector.shape_cast %473 : vector<1xf32> to vector<1x1x1xf32>
    %475 = vector.extract %474[0, 0, 0] : f32 from vector<1x1x1xf32>
    %476 = vector.broadcast %475 : f32 to vector<1x8x128xf32>
    %c0_126 = arith.constant 0 : index
    %c0_127 = arith.constant 0 : index
    %c0_128 = arith.constant 0 : index
    %477 = vector.load %arg3[%c0_126, %c0_127, %c0_128] : memref<1x8x128xf32, #tpu.memory_space<vmem>>, vector<1x8x128xf32>
    tpu.vector_store %arg3[%c0_126, %c0_127, %c0_128], %476 {strides = array<i32>} : memref<1x8x128xf32, #tpu.memory_space<vmem>>, vector<1x8x128xf32>,
    return
  }
  func.func @transform_0(%arg0: i32) -> (i32, i32, i32) {
    %c0_i32 = arith.constant 0 : i32
    %c0_i32_0 = arith.constant 0 : i32
    %c0_i32_1 = arith.constant 0 : i32
    return %arg0, %c0_i32, %c0_i32_0 : i32, i32, i32
  }
  func.func @transform_1(%arg0: i32) -> (i32, i32, i32) {
    %c0_i32 = arith.constant 0 : i32
    %c0_i32_0 = arith.constant 0 : i32
    %c0_i32_1 = arith.constant 0 : i32
    return %arg0, %c0_i32, %c0_i32_0 : i32, i32, i32
  }
  func.func @transform_2(%arg0: i32) -> (i32, i32, i32) {
    %c0_i32 = arith.constant 0 : i32
    %c0_i32_0 = arith.constant 0 : i32
    %c0_i32_1 = arith.constant 0 : i32
    return %arg0, %c0_i32, %c0_i32_0 : i32, i32, i32
  }
}

</mosaic_0001>

<bundles_post_ra>
// kernel: a_call__.1
= control target key start
LH: loop header
LB: loop body
LE: loop exit
PB: predicated region body
PF: predicated region fallthrough
CT: control target
= control target key end

     0   :  { %7 = vsyncpa [#allocation3], 0  ;;  %s6866_s0 = inlined_call_operand.hbm [shape: f32[6,16,16], index: 0, kind: input, shape index: {}]   ;;  %s6867_s1 = inlined_call_operand.hbm [shape: f32[6,16,16], index: 1, kind: input, shape index: {}]   ;;  %s6868_s2 = inlined_call_operand.vmem [shape: f32[1,8,128], index: 2, kind: output, shape index: {}]  }
   0x1   :  { %8 = vsyncpa [#allocation5], 0  ;;  %s3780_s9 = smov [#allocation2]   ;;  %s3732_s13 = scalar_lea.hbm %s6866_s0, 1536 }
   0x2   :  { %s14_s10 = sshll.u32 %s3780_s9, 4  ;;  %p3733_p0 = scmp.ne.s32.totalorder %s6866_s0, %s3732_s13  ;;  %s15_s10 = int_to_ptr.vmem [resolvable:$true] %s14_s10 }
   0x3   :  { %p3736_p1 = scmp.lt.u32.totalorder %s3732_s13, %s6866_s0 }
   0x5   :  { %p3738_p2 = pnand %p3736_p1, %p3733_p0 }
   0x7   :  { %3741 = shalt.err (!%p3738_p2)
}
   0x8   :  { %s3742_s18 = scalar_lea.vmem %s15_s10, 1536  ;;  %p3747_p4 = scmp.lt.s32.totalorder %s15_s10, %s15_s10 }
   0x9   :  { %p3743_p3 = scmp.ne.s32.totalorder %s15_s10, %s3742_s18  ;;  %p3748_p5 = scmp.lt.s32.totalorder %s3742_s18, %s3742_s18 }
   0xb   :  { %p3749_p6 = por %p3748_p5, %p3747_p4 }
   0xd   :  { %p3750_p7 = pnand %p3749_p6, %p3743_p3 }
   0xf   :  { %3753 = shalt.err (!%p3750_p7)
}
  0x10   :  { %s3781_s19 = smov 128   ;;  %s3782_s20 = smov 8  }
  0x11   :  { %20 = dma.hbm_to_vmem [thread:$0]  %s6866_s0, 1536, %s15_s10, [#allocation3], %s3781_s19, %s3781_s19, %s3782_s20  }
  0x12   :  { %s3783_s23 = smov [#allocation4]   ;;  %s3754_s27 = scalar_lea.hbm %s6867_s1, 1536 }
  0x13   :  { %s26_s24 = sshll.u32 %s3783_s23, 4  ;;  %p3755_p8 = scmp.ne.s32.totalorder %s6867_s1, %s3754_s27  ;;  %s27_s24 = int_to_ptr.vmem [resolvable:$true] %s26_s24 }
  0x14   :  { %p3758_p9 = scmp.lt.u32.totalorder %s3754_s27, %s6867_s1 }
  0x16   :  { %p3760_p10 = pnand %p3758_p9, %p3755_p8 }
  0x18   :  { %3763 = shalt.err (!%p3760_p10)
}
  0x19   :  { %s3764_s4 = scalar_lea.vmem %s27_s24, 1536  ;;  %p3769_p12 = scmp.lt.s32.totalorder %s27_s24, %s27_s24 }
  0x1a   :  { %p3765_p11 = scmp.ne.s32.totalorder %s27_s24, %s3764_s4  ;;  %p3770_p13 = scmp.lt.s32.totalorder %s3764_s4, %s3764_s4 }
  0x1c   :  { %p3771_p0 = por %p3770_p13, %p3769_p12 }
  0x1e   :  { %p3772_p1 = pnand %p3771_p0, %p3765_p11 }
  0x20   :  { %3775 = shalt.err (!%p3772_p1)
}
  0x21   :  { %32 = dma.hbm_to_vmem [thread:$0]  %s6867_s1, 1536, %s27_s24, [#allocation5], %s3781_s19, %s3781_s19, %s3782_s20  }
  0x22   :  { %3776 = dma.done.wait [#allocation3], 1536  }
  0x23   :  { %3777 = vsyncadd [#allocation3], 4294965760 }
  0x24   :  { %3778 = dma.done.wait [#allocation5], 1536  }
  0x25   :  { %3779 = vsyncadd [#allocation5], 4294965760  ;;  %vm153_vm0 = vcmask 1044480   ;;  %v43_v0 = vld [vmem:[#allocation2 + $0x20] sm:$0xff]  ;;  %v44_v1 = vld [vmem:[#allocation2 + $0x28] sm:$0xff]  ;;  %vm208_vm1 = vcmask 1043456  }
  0x26   :  { %vm263_vm2 = vcmask 1042432   ;;  %vm294_vm3 = vcmask 1041408   ;;  %vm325_vm4 = vcmask 1040384   ;;  %v65_v2 = vmul.f32 0.0010283801, %v43_v0  ;;  %v39_v24 = vld [vmem:[#allocation2] sm:$0xff] }
  0x27   :  { %v71_v3 = vmul.f32 0.007598758, %v43_v0  ;;  %v101_v4 = vmul.f32 0.036000773, %v43_v0  ;;  %v133_v5 = vmul.f32 0.10936069, %v43_v0 }
  0x28   :  { %v134_v6 = vmul.f32 0.10936069, %v44_v1  ;;  %v188_v7 = vmul.f32 0.21300554, %v43_v0  ;;  %v189_v10 = vmul.f32 0.21300554, %v44_v1 }
  0x29   :  { %v83_v8 = vrot.slane %v71_v3, 1  ;;  %v113_v9 = vrot.slane %v101_v4, 2  ;;  %v243_v11 = vmul.f32 0.26601171, %v43_v0  ;;  %v160_v12 = vrot.slane %v133_v5, 3  ;;  %v40_v33 = vld [vmem:[#allocation2 + $0x8] sm:$0xff] }
  0x2a   :  { %v161_v13 = vrot.slane %v134_v6, 3  ;;  %v215_v14 = vrot.slane %v188_v7, 4  ;;  %v244_v15 = vmul.f32 0.26601171, %v44_v1  ;;  %v216_v17 = vrot.slane %v189_v10, 4  ;;  %s3784_s1 = smov 127  }
  0x2b   :  { %v95_v16 = vadd.f32 %v83_v8, %v65_v2  ;;  %v270_v18 = vrot.slane %v243_v11, 5  ;;  %v301_v19 = vrot.slane %v188_v7, 6  ;;  %v302_v22 = vrot.slane %v189_v10, 6  ;;  %v45_v2 = vld [vmem:[#allocation2 + $0x30] sm:$0xff]  ;;  %v46_v11 = vld [vmem:[#allocation2 + $0x38] sm:$0xff]  ;;  %s3785_s6 = smov 126  }
  0x2c   :  { %v162_v20 = vsel %vm153_vm0, %v160_v12, %v161_v13  ;;  %v271_v21 = vrot.slane %v244_v15, 5  ;;  %v332_v23 = vrot.slane %v133_v5, 7  ;;  %v217_v26 = vsel %vm208_vm1, %v215_v14, %v216_v17  ;;  %s3786_s7 = smov 125   ;;  %s3787_s8 = smov 124  }
  0x2d   :  { %v125_v25 = vadd.f32 %v113_v9, %v95_v16  ;;  %v333_v27 = vrot.slane %v134_v6, 7  ;;  %v358_v28 = vmul.f32 0.036000773, %v44_v1  ;;  %v303_v30 = vsel %vm294_vm3, %v301_v19, %v302_v22  ;;  %s3788_s9 = smov 123   ;;  %s3789_s10 = smov 122  }
  0x2e   :  { %v272_v29 = vsel %vm263_vm2, %v270_v18, %v271_v21  ;;  %v370_v31 = vmul.f32 0.007598758, %v44_v1  ;;  %v400_v32 = vmul.f32 0.0010283801, %v44_v1  ;;  %v63_v36 = vmul.f32 0.0010283801, %v39_v24 }
  0x2f   :  { %v180_v34 = vadd.f32 %v162_v20, %v125_v25  ;;  %v334_v35 = vsel %vm325_vm4, %v332_v23, %v333_v27  ;;  %v69_v37 = vmul.f32 0.007598758, %v39_v24  ;;  %v99_v40 = vmul.f32 0.036000773, %v39_v24  ;;  %s3790_s11 = smov 121   ;;  %s3791_s12 = smov 120  }
  0x30   :  { %v382_v38 = vrot.slane %v370_v31, 1  ;;  %v412_v39 = vrot.slane %v400_v32, 2  ;;  %v129_v41 = vmul.f32 0.10936069, %v39_v24  ;;  %v130_v44 = vmul.f32 0.10936069, %v40_v33 }
  0x31   :  { %v235_v42 = vadd.f32 %v217_v26, %v180_v34  ;;  %v81_v43 = vrot.slane %v69_v37, 1  ;;  %v184_v45 = vmul.f32 0.21300554, %v39_v24  ;;  %v111_v46 = vrot.slane %v99_v40, 2  ;;  %s3792_s13 = smov 119   ;;  %s3793_s14 = smov 118  }
  0x32   :  { %v154_v47 = vrot.slane %v129_v41, 3  ;;  %v185_v48 = vmul.f32 0.21300554, %v40_v33  ;;  %v239_v49 = vmul.f32 0.26601171, %v39_v24  ;;  %v155_v52 = vrot.slane %v130_v44, 3 }
  0x33   :  { %v290_v50 = vadd.f32 %v272_v29, %v235_v42  ;;  %v93_v51 = vadd.f32 %v81_v43, %v63_v36  ;;  %v209_v53 = vrot.slane %v184_v45, 4  ;;  %v240_v55 = vmul.f32 0.26601171, %v40_v33 }
  0x34   :  { %v210_v54 = vrot.slane %v185_v48, 4  ;;  %v264_v56 = vrot.slane %v239_v49, 5  ;;  %v295_v57 = vrot.slane %v184_v45, 6  ;;  %v156_v60 = vsel %vm153_vm0, %v154_v47, %v155_v52 }
  0x35   :  { %v321_v58 = vadd.f32 %v303_v30, %v290_v50  ;;  %v123_v59 = vadd.f32 %v111_v46, %v93_v51  ;;  %v296_v61 = vrot.slane %v185_v48, 6  ;;  %v265_v63 = vrot.slane %v240_v55, 5  ;;  %v3852_v48 = vld [vmem:[#allocation2 + $0x10] sm:$0xff] }
  0x36   :  { %v211_v62 = vsel %vm208_vm1, %v209_v53, %v210_v54  ;;  %v326_v0 = vrot.slane %v129_v41, 7  ;;  %v327_v1 = vrot.slane %v130_v44, 7  ;;  %v356_v6 = vmul.f32 0.036000773, %v40_v33  ;;  %6994 = vst [vmem:[#allocation9_spill] sm:$0xff] %v3852_v48 }
  0x37   :  { %v352_v3 = vadd.f32 %v334_v35, %v321_v58  ;;  %v178_v4 = vadd.f32 %v156_v60, %v123_v59  ;;  %v297_v5 = vsel %vm294_vm3, %v295_v57, %v296_v61  ;;  %v266_v7 = vsel %vm263_vm2, %v264_v56, %v265_v63  ;;  %v3855_v56 = vld [vmem:[#allocation2 + $0x18] sm:$0xff] }
  0x38   :  { %v328_v8 = vsel %vm325_vm4, %v326_v0, %v327_v1  ;;  %v368_v9 = vmul.f32 0.007598758, %v40_v33  ;;  %v398_v10 = vmul.f32 0.0010283801, %v40_v33  ;;  %v66_v14 = vmul.f32 0.0010283801, %v45_v2 }
  0x39   :  { %v364_v12 = vadd.f32 %v358_v28, %v352_v3  ;;  %v233_v13 = vadd.f32 %v211_v62, %v178_v4  ;;  %v72_v15 = vmul.f32 0.007598758, %v45_v2  ;;  %v102_v18 = vmul.f32 0.036000773, %v45_v2  ;;  %6995 = vst [vmem:[#allocation10_spill] sm:$0xff] %v3855_v56 }
  0x3a   :  { %v380_v16 = vrot.slane %v368_v9, 1  ;;  %v410_v17 = vrot.slane %v398_v10, 2  ;;  %v135_v19 = vmul.f32 0.10936069, %v45_v2  ;;  %v136_v23 = vmul.f32 0.10936069, %v46_v11 }
  0x3b   :  { %v394_v20 = vadd.f32 %v382_v38, %v364_v12  ;;  %v288_v21 = vadd.f32 %v266_v7, %v233_v13  ;;  %v84_v22 = vrot.slane %v72_v15, 1  ;;  %v114_v24 = vrot.slane %v102_v18, 2 }
  0x3c   :  { %v163_v25 = vrot.slane %v135_v19, 3  ;;  %v190_v26 = vmul.f32 0.21300554, %v45_v2  ;;  %v191_v27 = vmul.f32 0.21300554, %v46_v11  ;;  %v164_v28 = vrot.slane %v136_v23, 3 }
  0x3d   :  { %v3843_v29 = vadd.f32 %v412_v39, %v394_v20  ;;  %v319_v30 = vadd.f32 %v297_v5, %v288_v21  ;;  %v96_v31 = vadd.f32 %v84_v22, %v66_v14  ;;  %v245_v34 = vmul.f32 0.26601171, %v45_v2 }
  0x3e   :  { %v218_v32 = vrot.slane %v190_v26, 4  ;;  %v219_v33 = vrot.slane %v191_v27, 4  ;;  %v246_v35 = vmul.f32 0.26601171, %v46_v11  ;;  %v165_v40 = vsel %vm153_vm0, %v163_v25, %v164_v28 }
  0x3f   :  { %6993 = vst [vmem:[#allocation8_spill] sm:$0xff] %v3843_v29  ;;  %v3846_v36 = vmul.f32 0.007598758, %v3843_v29  ;;  %v350_v37 = vadd.f32 %v328_v8, %v319_v30  ;;  %v126_v38 = vadd.f32 %v114_v24, %v96_v31  ;;  %v273_v42 = vrot.slane %v245_v34, 5  ;;  %v49_v31 = vld [vmem:[#allocation2 + $0x50] sm:$0xff] }
  0x40   :  { %v220_v41 = vsel %vm208_vm1, %v218_v32, %v219_v33  ;;  %v274_v43 = vrot.slane %v246_v35, 5  ;;  %v304_v39 = vrot.slane %v190_v26, 6  ;;  %v305_v46 = vrot.slane %v191_v27, 6 }
  0x41   :  { %450 = vrot.lane.b32.xlu1 %v3846_v36, %s3784_s1  ;;  %v362_v44 = vadd.f32 %v356_v6, %v350_v37  ;;  %v181_v45 = vadd.f32 %v165_v40, %v126_v38  ;;  %v335_v47 = vrot.slane %v135_v19, 7  ;;  %v336_v50 = vrot.slane %v136_v23, 7  ;;  %v50_v40 = vld [vmem:[#allocation2 + $0x58] sm:$0xff] }
  0x42   :  { %v275_v49 = vsel %vm263_vm2, %v273_v42, %v274_v43  ;;  %v371_v51 = vmul.f32 0.007598758, %v46_v11  ;;  %v359_v54 = vmul.f32 0.036000773, %v46_v11  ;;  %v401_v55 = vmul.f32 0.0010283801, %v46_v11 }
  0x43   :  { %v392_v52 = vadd.f32 %v380_v16, %v362_v44  ;;  %v236_v53 = vadd.f32 %v220_v41, %v181_v45  ;;  %v306_v57 = vsel %vm294_vm3, %v304_v39, %v305_v46  ;;  %v337_v58 = vsel %vm325_vm4, %v335_v47, %v336_v50 }
  0x44   :  { %v64_v59 = vmul.f32 0.0010283801, %v3852_v48  ;;  %v70_v60 = vmul.f32 0.007598758, %v3852_v48  ;;  %v383_v63 = vrot.slane %v371_v51, 1  ;;  %v413_v1 = vrot.slane %v401_v55, 2 }
  0x45   :  { %v3861_v61 = vadd.f32 %v410_v17, %v392_v52  ;;  %v291_v62 = vadd.f32 %v275_v49, %v236_v53  ;;  %v100_v0 = vmul.f32 0.036000773, %v3852_v48  ;;  %v131_v3 = vmul.f32 0.10936069, %v3852_v48 }
  0x46   :  { %v82_v2 = vrot.slane %v70_v60, 1  ;;  %v132_v4 = vmul.f32 0.10936069, %v3855_v56  ;;  %v186_v8 = vmul.f32 0.21300554, %v3852_v48  ;;  %vm3572_vm5 = vcmask 46080  }
  0x47   :  { %6996 = vst [vmem:[#allocation11_spill] sm:$0xff] %v3861_v61  ;;  %v3867_v5 = vmul.f32 0.007598758, %v3861_v61  ;;  %v322_v6 = vadd.f32 %v306_v57, %v291_v62  ;;  %v112_v7 = vrot.slane %v100_v0, 2  ;;  %v157_v10 = vrot.slane %v131_v3, 3 }
  0x48   :  { %v94_v9 = vadd.f32 %v82_v2, %v64_v59  ;;  %v158_v11 = vrot.slane %v132_v4, 3  ;;  %v187_v12 = vmul.f32 0.21300554, %v3855_v56  ;;  %v212_v14 = vrot.slane %v186_v8, 4 }
  0x49   :  { %446 = vrot.lane.b32.xlu0 %v3867_v5, %s3784_s1  ;;  %v353_v13 = vadd.f32 %v337_v58, %v322_v6  ;;  %v241_v15 = vmul.f32 0.26601171, %v3852_v48  ;;  %v242_v16 = vmul.f32 0.26601171, %v3855_v56  ;;  %v298_v20 = vrot.slane %v186_v8, 6 }
  0x4a   :  { %v124_v17 = vadd.f32 %v112_v7, %v94_v9  ;;  %v159_v18 = vsel %vm153_vm0, %v157_v10, %v158_v11  ;;  %v213_v19 = vrot.slane %v187_v12, 4  ;;  %v299_v24 = vrot.slane %v187_v12, 6  ;;  %v47_v12 = vld [vmem:[#allocation2 + $0x40] sm:$0xff] }
  0x4b   :  { %v365_v21 = vadd.f32 %v359_v54, %v353_v13  ;;  %v267_v22 = vrot.slane %v241_v15, 5  ;;  %v268_v23 = vrot.slane %v242_v16, 5  ;;  %v329_v27 = vrot.slane %v131_v3, 7 }
  0x4c   :  { %v179_v25 = vadd.f32 %v159_v18, %v124_v17  ;;  %v214_v26 = vsel %vm208_vm1, %v212_v14, %v213_v19  ;;  %v330_v30 = vrot.slane %v132_v4, 7  ;;  %v300_v33 = vsel %vm294_vm3, %v298_v20, %v299_v24  ;;  %v48_v19 = vld [vmem:[#allocation2 + $0x48] sm:$0xff] }
  0x4d   :  { %v395_v28 = vadd.f32 %v383_v63, %v365_v21  ;;  %v269_v32 = vsel %vm263_vm2, %v267_v22, %v268_v23  ;;  %v357_v37 = vmul.f32 0.036000773, %v3855_v56  ;;  %v369_v38 = vmul.f32 0.007598758, %v3855_v56 }
  0x4e   :  { %v234_v34 = vadd.f32 %v214_v26, %v179_v25  ;;  %v331_v35 = vsel %vm325_vm4, %v329_v27, %v330_v30  ;;  %v68_v42 = vmul.f32 0.0010283801, %v49_v31  ;;  %v74_v43 = vmul.f32 0.007598758, %v49_v31 }
  0x4f   :  { %v3882_v41 = vadd.f32 %v413_v1, %v395_v28  ;;  %v104_v39 = vmul.f32 0.036000773, %v49_v31  ;;  %v381_v45 = vrot.slane %v369_v38, 1  ;;  %v399_v46 = vmul.f32 0.0010283801, %v3855_v56 }
  0x50   :  { %v289_v44 = vadd.f32 %v269_v32, %v234_v34  ;;  %v139_v47 = vmul.f32 0.10936069, %v49_v31  ;;  %v86_v50 = vrot.slane %v74_v43, 1  ;;  %v140_v52 = vmul.f32 0.10936069, %v50_v40 }
  0x51   :  { %v3886_v49 = vmul.f32 0.007598758, %v3882_v41  ;;  %v116_v51 = vrot.slane %v104_v39, 2  ;;  %v194_v55 = vmul.f32 0.21300554, %v49_v31  ;;  %v411_v9 = vrot.slane %v399_v46, 2 }
  0x52   :  { %v320_v53 = vadd.f32 %v300_v33, %v289_v44  ;;  %v169_v54 = vrot.slane %v139_v47, 3  ;;  %v195_v57 = vmul.f32 0.21300554, %v50_v40  ;;  %v98_v58 = vadd.f32 %v86_v50, %v68_v42 }
  0x53   :  { %452 = vrot.lane.b32.xlu1 %v3886_v49, %s3784_s1  ;;  %v170_v59 = vrot.slane %v140_v52, 3  ;;  %v249_v60 = vmul.f32 0.26601171, %v49_v31  ;;  %v250_v62 = vmul.f32 0.26601171, %v50_v40  ;;  %v224_v0 = vrot.slane %v194_v55, 4 }
  0x54   :  { %v351_v63 = vadd.f32 %v331_v35, %v320_v53  ;;  %v225_v1 = vrot.slane %v195_v57, 4  ;;  %v310_v2 = vrot.slane %v194_v55, 6  ;;  %v128_v3 = vadd.f32 %v116_v51, %v98_v58 }
  0x55   :  { %v171_v4 = vsel %vm153_vm0, %v169_v54, %v170_v59  ;;  %v279_v6 = vrot.slane %v249_v60, 5  ;;  %v280_v7 = vrot.slane %v250_v62, 5  ;;  %v311_v11 = vrot.slane %v195_v57, 6 }
  0x56   :  { %v363_v8 = vadd.f32 %v357_v37, %v351_v63  ;;  %v226_v10 = vsel %vm208_vm1, %v224_v0, %v225_v1  ;;  %v183_v13 = vadd.f32 %v171_v4, %v128_v3  ;;  %v341_v14 = vrot.slane %v139_v47, 7 }
  0x57   :  { %v281_v16 = vsel %vm263_vm2, %v279_v6, %v280_v7  ;;  %v342_v17 = vrot.slane %v140_v52, 7  ;;  %v361_v18 = vmul.f32 0.036000773, %v50_v40  ;;  %v312_v21 = vsel %vm294_vm3, %v310_v2, %v311_v11 }
  0x58   :  { %v393_v15 = vadd.f32 %v381_v45, %v363_v8  ;;  %v238_v20 = vadd.f32 %v226_v10, %v183_v13  ;;  %v67_v22 = vmul.f32 0.0010283801, %v47_v12  ;;  %v73_v23 = vmul.f32 0.007598758, %v47_v12 }
  0x59   :  { %v373_v25 = vmul.f32 0.007598758, %v50_v40  ;;  %v403_v26 = vmul.f32 0.0010283801, %v50_v40  ;;  %v103_v27 = vmul.f32 0.036000773, %v47_v12  ;;  %v343_v34 = vsel %vm325_vm4, %v341_v14, %v342_v17 }
  0x5a   :  { %v3894_v24 = vadd.f32 %v411_v9, %v393_v15  ;;  %v293_v30 = vadd.f32 %v281_v16, %v238_v20  ;;  %v85_v31 = vrot.slane %v73_v23, 1  ;;  %v137_v28 = vmul.f32 0.10936069, %v47_v12 }
  0x5b   :  { %v138_v32 = vmul.f32 0.10936069, %v48_v19  ;;  %v115_v35 = vrot.slane %v103_v27, 2  ;;  %v192_v37 = vmul.f32 0.21300554, %v47_v12  ;;  %v385_v40 = vrot.slane %v373_v25, 1 }
  0x5c   :  { %v3897_v33 = vmul.f32 0.007598758, %v3894_v24  ;;  %v324_v38 = vadd.f32 %v312_v21, %v293_v30  ;;  %v97_v42 = vadd.f32 %v85_v31, %v67_v22  ;;  %v166_v43 = vrot.slane %v137_v28, 3 }
  0x5d   :  { %v167_v39 = vrot.slane %v138_v32, 3  ;;  %v193_v44 = vmul.f32 0.21300554, %v48_v19  ;;  %v221_v45 = vrot.slane %v192_v37, 4  ;;  %v247_v46 = vmul.f32 0.26601171, %v47_v12 }
  0x5e   :  { %448 = vrot.lane.b32.xlu0 %v3897_v33, %s3784_s1  ;;  %v355_v47 = vadd.f32 %v343_v34, %v324_v38  ;;  %v127_v50 = vadd.f32 %v115_v35, %v97_v42  ;;  %v248_v52 = vmul.f32 0.26601171, %v48_v19  ;;  %v307_v55 = vrot.slane %v192_v37, 6  ;;  %v3977_v42 = vld [vmem:[#allocation4 + $0x10] sm:$0xff] }
  0x5f   :  { %v168_v51 = vsel %vm153_vm0, %v166_v43, %v167_v39  ;;  %v222_v53 = vrot.slane %v193_v44, 4  ;;  %v276_v54 = vrot.slane %v247_v46, 5  ;;  %v308_v57 = vrot.slane %v193_v44, 6  ;;  %6999 = vst [vmem:[#allocation14_spill] sm:$0xff] %v3977_v42 }
  0x60   :  { %v367_v58 = vadd.f32 %v361_v18, %v355_v47  ;;  %v415_v59 = vrot.slane %v403_v26, 2  ;;  %v182_v60 = vadd.f32 %v168_v51, %v127_v50  ;;  %v277_v62 = vrot.slane %v248_v52, 5 }
  0x61   :  { %v223_v63 = vsel %vm208_vm1, %v221_v45, %v222_v53  ;;  %v338_v0 = vrot.slane %v137_v28, 7  ;;  %v339_v1 = vrot.slane %v138_v32, 7  ;;  %v309_v6 = vsel %vm294_vm3, %v307_v55, %v308_v57  ;;  %v3994_v45 = vld [vmem:[#allocation4 + $0x18] sm:$0xff] }
  0x62   :  { %v397_v2 = vadd.f32 %v385_v40, %v367_v58  ;;  %v237_v3 = vadd.f32 %v223_v63, %v182_v60  ;;  %v278_v4 = vsel %vm263_vm2, %v276_v54, %v277_v62  ;;  %v372_v9 = vmul.f32 0.007598758, %v48_v19  ;;  %7000 = vst [vmem:[#allocation15_spill] sm:$0xff] %v3994_v45 }
  0x63   :  { %v340_v10 = vsel %vm325_vm4, %v338_v0, %v339_v1  ;;  %v360_v13 = vmul.f32 0.036000773, %v48_v19  ;;  %v402_v14 = vmul.f32 0.0010283801, %v48_v19  ;;  %v3915_v17 = vmul.f32 0.036000773, %v3894_v24 }
  0x64   :  { %v3906_v7 = vadd.f32 %v415_v59, %v397_v2  ;;  %v292_v8 = vadd.f32 %v278_v4, %v237_v3  ;;  %v384_v16 = vrot.slane %v372_v9, 1  ;;  %v3920_v22 = vmul.f32 0.036000773, %v3882_v41 }
  0x65   :  { %v414_v20 = vrot.slane %v402_v14, 2  ;;  %v3935_v26 = vmul.f32 0.036000773, %v3861_v61  ;;  %v3940_v27 = vmul.f32 0.10936069, %v3894_v24  ;;  %vm3623_vm6 = vcmask 1041409  }
  0x66   :  { %v3910_v11 = vmul.f32 0.007598758, %v3906_v7  ;;  %v323_v12 = vadd.f32 %v309_v6, %v292_v8  ;;  %v3930_v25 = vmul.f32 0.036000773, %v3906_v7  ;;  %v3945_v30 = vmul.f32 0.036000773, %v3843_v29 }
  0x67   :  { %v3950_v31 = vmul.f32 0.10936069, %v3882_v41  ;;  %v3960_v32 = vmul.f32 0.10936069, %v3906_v7  ;;  %v3965_v34 = vmul.f32 0.10936069, %v3861_v61 }
  0x68   :  { %456 = vrot.lane.b32.xlu1 %v3910_v11, %s3784_s1  ;;  %v354_v15 = vadd.f32 %v340_v10, %v323_v12  ;;  %v543_v35 = vmul.f32 0.21300554, %v3894_v24  ;;  %v3973_v37 = vmul.f32 0.10936069, %v3843_v29  ;;  %v545_v38 = vmul.f32 0.21300554, %v3882_v41 }
  0x69   :  { %v3986_v39 = vmul.f32 0.21300554, %v3906_v7  ;;  %v747_v40 = vmul.f32 0.007598758, %v3977_v42  ;;  %v3992_v44 = vmul.f32 0.21300554, %v3861_v61 }
  0x6a   :  { %v366_v18 = vadd.f32 %v360_v13, %v354_v15  ;;  %v579_v46 = vmul.f32 0.26601171, %v3894_v24  ;;  %v741_v47 = vmul.f32 0.0010283801, %v3977_v42  ;;  %v777_v51 = vmul.f32 0.036000773, %v3977_v42 }
  0x6b   :  { %v759_v50 = vrot.slane %v747_v40, 1  ;;  %v4002_v52 = vmul.f32 0.10936069, %v3977_v42  ;;  %v4005_v53 = vmul.f32 0.10936069, %v3994_v45  ;;  %vm3625_vm7 = vcmask 1042434  }
  0x6c   :  { %v396_v21 = vadd.f32 %v384_v16, %v366_v18  ;;  %484 = vrot.lane.b32.xlu1 %v3915_v17, %s3785_s6  ;;  %v4010_v54 = vmul.f32 0.21300554, %v3843_v29  ;;  %v581_v55 = vmul.f32 0.26601171, %v3882_v41  ;;  %v789_v58 = vrot.slane %v777_v51, 2  ;;  %v4033_v16 = vld [vmem:[#allocation4] sm:$0xff] }
  0x6d   :  { %v771_v57 = vadd.f32 %v759_v50, %v741_v47  ;;  %v833_v59 = vrot.slane %v4002_v52, 3  ;;  %v834_v60 = vrot.slane %v4005_v53, 3  ;;  %v862_v62 = vmul.f32 0.21300554, %v3977_v42  ;;  %7001 = vst [vmem:[#allocation16_spill] sm:$0xff] %v4033_v16  ;;  %v4040_v50 = vld [vmem:[#allocation4 + $0x8] sm:$0xff] }
  0x6e   :  { %v3922_v23 = vadd.f32 %v414_v20, %v396_v21  ;;  %v863_v63 = vmul.f32 0.21300554, %v3994_v45  ;;  %v583_v1 = vmul.f32 0.26601171, %v3906_v7  ;;  %v916_v3 = vmul.f32 0.26601171, %v3977_v42 }
  0x6f   :  { %v801_v2 = vadd.f32 %v789_v58, %v771_v57  ;;  %v835_v4 = vsel %vm153_vm0, %v833_v59, %v834_v60  ;;  %v887_v6 = vrot.slane %v862_v62, 4  ;;  %v917_v9 = vmul.f32 0.26601171, %v3994_v45 }
  0x70   :  { %6997 = vst [vmem:[#allocation12_spill] sm:$0xff] %v3922_v23  ;;  %v3925_v19 = vmul.f32 0.007598758, %v3922_v23  ;;  %488 = vrot.lane.b32.xlu1 %v3920_v22, %s3785_s6  ;;  %v3955_v28 = vmul.f32 0.036000773, %v3922_v23  ;;  %v888_v8 = vrot.slane %v863_v63, 4 }
  0x71   :  { %v3982_v43 = vmul.f32 0.10936069, %v3922_v23  ;;  %v4021_v0 = vmul.f32 0.21300554, %v3922_v23  ;;  %v578_v10 = vmul.f32 0.26601171, %v3861_v61  ;;  %v855_v12 = vadd.f32 %v835_v4, %v801_v2 }
  0x72   :  { %6998 = vst [vmem:[#allocation13_spill] sm:$0xff] %v3925_v19  ;;  %454 = vrot.lane.b32.xlu0 %v3925_v19, %s3784_s1  ;;  %v889_v13 = vsel %vm208_vm1, %v887_v6, %v888_v8  ;;  %v941_v14 = vrot.slane %v916_v3, 5  ;;  %v942_v15 = vrot.slane %v917_v9, 5  ;;  %v580_v18 = vmul.f32 0.26601171, %v3843_v29  ;;  %v4056_v2 = vld [vmem:[#allocation4 + $0x30] sm:$0xff] }
  0x73   :  { %v909_v20 = vadd.f32 %v889_v13, %v855_v12  ;;  %v746_v21 = vmul.f32 0.007598758, %v4033_v16  ;;  %v972_v47 = vrot.slane %v863_v63, 6  ;;  %v582_v51 = vmul.f32 0.26601171, %v3922_v23 }
  0x74   :  { %492 = vrot.lane.b32.xlu1 %v3930_v25, %s3785_s6  ;;  %v943_v40 = vsel %vm263_vm2, %v941_v14, %v942_v15  ;;  %v776_v57 = vmul.f32 0.036000773, %v4033_v16  ;;  %v4048_v59 = vmul.f32 0.10936069, %v4033_v16  ;;  %v4051_v60 = vmul.f32 0.10936069, %v4040_v50 }
  0x75   :  { %v758_v58 = vrot.slane %v746_v21, 1  ;;  %v1001_v63 = vrot.slane %v4002_v52, 7  ;;  %v4063_v3 = vmul.f32 0.007598758, %v3994_v45  ;;  %v4066_v4 = vmul.f32 0.0010283801, %v3994_v45 }
  0x76   :  { %482 = vrot.lane.b32.xlu0 %v3935_v26, %s3785_s6  ;;  %v788_v6 = vrot.slane %v776_v57, 2  ;;  %v860_v8 = vmul.f32 0.21300554, %v4033_v16  ;;  %v861_v52 = vmul.f32 0.21300554, %v4040_v50  ;;  %vm3627_vm8 = vcmask 1043459  }
  0x77   :  { %7003 = vst [vmem:[#allocation18_spill] sm:$0xff] %v4066_v4  ;;  %v4075_v12 = vmul.f32 0.0010283801, %v3882_v41  ;;  %v4078_v13 = vmul.f32 0.0010283801, %v3906_v7  ;;  %vm3629_vm9 = vcmask 1044484  }
  0x78   :  { %520 = vrot.lane.b32.xlu1 %v3940_v27, %s3786_s7  ;;  %v749_v15 = vmul.f32 0.007598758, %v4056_v2  ;;  %v914_v21 = vmul.f32 0.26601171, %v4033_v16  ;;  %v884_v41 = vrot.slane %v860_v8, 4  ;;  %vm3631_vm10 = vcmask 1045509  }
  0x79   :  { %7004 = vst [vmem:[#allocation19_spill] sm:$0xff] %v4075_v12  ;;  %7005 = vst [vmem:[#allocation20_spill] sm:$0xff] %v4078_v13  ;;  %v915_v7 = vmul.f32 0.26601171, %v4040_v50  ;;  %v743_v57 = vmul.f32 0.0010283801, %v4056_v2 }
  0x7a   :  { %486 = vrot.lane.b32.xlu0 %v3945_v30, %s3785_s6  ;;  %vm3645_vm12 = vcmask 5120  }
  0x7c   :  { %524 = vrot.lane.b32.xlu1 %v3950_v31, %s3786_s7 }
  0x7e   :  { %490 = vrot.lane.b32.xlu0 %v3955_v28, %s3785_s6 }
  0x80   :  { %528 = vrot.lane.b32.xlu1 %v3960_v32, %s3786_s7 }
  0x82   :  { %518 = vrot.lane.b32.xlu0 %v3965_v34, %s3786_s7 }
  0x84   :  { %556 = vrot.lane.b32.xlu1 %v543_v35, %s3787_s8 }
  0x86   :  { %522 = vrot.lane.b32.xlu0 %v3973_v37, %s3786_s7 }
  0x88   :  { %560 = vrot.lane.b32.xlu1 %v545_v38, %s3787_s8 }
  0x8a   :  { %526 = vrot.lane.b32.xlu0 %v3982_v43, %s3786_s7 }
  0x8c   :  { %564 = vrot.lane.b32.xlu1 %v3986_v39, %s3787_s8 }
  0x8e   :  { %554 = vrot.lane.b32.xlu0 %v3992_v44, %s3787_s8 }
  0x90   :  { %592 = vrot.lane.b32.xlu1 %v579_v46, %s3788_s9  ;;  %v971_v46 = vrot.slane %v862_v62, 6 }
  0x92   :  { %558 = vrot.lane.b32.xlu0 %v4010_v54, %s3787_s8  ;;  %v973_v62 = vsel %vm294_vm3, %v971_v46, %v972_v47  ;;  %v968_v46 = vrot.slane %v860_v8, 6  ;;  %v4089_v47 = vld [vmem:[#allocation4 + $0x38] sm:$0xff] }
  0x93   :  { %v4110_v8 = vmul.f32 0.21300554, %v4089_v47 }
  0x94   :  { %596 = vrot.lane.b32.xlu1 %v581_v55, %s3788_s9  ;;  %v740_v55 = vmul.f32 0.0010283801, %v4033_v16 }
  0x96   :  { %562 = vrot.lane.b32.xlu0 %v4021_v0, %s3787_s8  ;;  %v770_v9 = vadd.f32 %v758_v58, %v740_v55  ;;  %v969_v58 = vrot.slane %v861_v52, 6 }
  0x98   :  { %600 = vrot.lane.b32.xlu1 %v583_v1, %s3788_s9  ;;  %v1002_v1 = vrot.slane %v4005_v53, 7 }
  0x9a   :  { %590 = vrot.lane.b32.xlu0 %v578_v10, %s3788_s9  ;;  %v830_v10 = vrot.slane %v4048_v59, 3  ;;  %v1003_v14 = vsel %vm325_vm4, %v1001_v63, %v1002_v1  ;;  %v779_v63 = vmul.f32 0.036000773, %v4056_v2  ;;  %v4099_v1 = vmul.f32 0.10936069, %v4056_v2 }
  0x9c   :  { %616 = vrot.lane.b32.xlu1 %v543_v35, %s3789_s10  ;;  %v963_v35 = vadd.f32 %v943_v40, %v909_v20  ;;  %v885_v40 = vrot.slane %v861_v52, 4 }
  0x9e   :  { %594 = vrot.lane.b32.xlu0 %v580_v18, %s3788_s9  ;;  %v993_v53 = vadd.f32 %v973_v62, %v963_v35  ;;  %v4095_v35 = vld [vmem:[#allocation4 + $0x50] sm:$0xff]  ;;  %v761_v62 = vrot.slane %v749_v15, 1  ;;  %v886_v52 = vsel %vm208_vm1, %v884_v41, %v885_v40  ;;  %v4119_v15 = vld [vmem:[#allocation4 + $0x20] sm:$0xff]  ;;  %v4123_v18 = vsel %vm294_vm3, %v968_v46, %v969_v58 }
  0x9f   :  { %v751_v20 = vmul.f32 0.007598758, %v4095_v35  ;;  %v894_v40 = vrot.slane %v4110_v8, 4  ;;  %v4191_v23 = vmul.f32 0.21300554, %v4119_v15 }
  0xa0   :  { %620 = vrot.lane.b32.xlu1 %v545_v38, %s3789_s10  ;;  %v4060_v38 = vmul.f32 0.0010283801, %v3894_v24  ;;  %v831_v24 = vrot.slane %v4051_v60, 3  ;;  %v773_v41 = vadd.f32 %v761_v62, %v743_v57  ;;  %v745_v57 = vmul.f32 0.0010283801, %v4095_v35 }
  0xa1   :  { %v763_v58 = vrot.slane %v751_v20, 1  ;;  %v781_v62 = vmul.f32 0.036000773, %v4095_v35  ;;  %v890_v29 = vrot.slane %v4191_v23, 4 }
  0xa2   :  { %598 = vrot.lane.b32.xlu0 %v582_v51, %s3788_s9  ;;  %7002 = vst [vmem:[#allocation17_spill] sm:$0xff] %v4060_v38  ;;  %v800_v51 = vadd.f32 %v788_v6, %v770_v9  ;;  %v832_v55 = vsel %vm153_vm0, %v830_v10, %v831_v24  ;;  %v4107_v6 = vmul.f32 0.21300554, %v4056_v2  ;;  %v939_v9 = vrot.slane %v915_v7, 5  ;;  %v4134_v7 = vld [vmem:[#allocation4 + $0x58] sm:$0xff] }
  0xa3   :  { %v998_v10 = vrot.slane %v4048_v59, 7  ;;  %v791_v59 = vrot.slane %v779_v63, 2  ;;  %v4157_v16 = vmul.f32 0.10936069, %v4134_v7  ;;  %v925_v42 = vmul.f32 0.26601171, %v4134_v7 }
  0xa4   :  { %624 = vrot.lane.b32.xlu1 %v3986_v39, %s3789_s10  ;;  %v1029_v39 = vmul.f32 0.036000773, %v3994_v45  ;;  %v4169_v45 = vmul.f32 0.10936069, %v4119_v15 }
  0xa5   :  { %v954_v19 = vrot.slane %v925_v42, 5  ;;  %v7007_v42 = vrot.slane %v4107_v6, 6 }
  0xa6   :  { %614 = vrot.lane.b32.xlu0 %v3992_v44, %s3789_s10  ;;  %v1023_v44 = vadd.f32 %v1003_v14, %v993_v53  ;;  %v938_v53 = vrot.slane %v914_v21, 5  ;;  %v999_v14 = vrot.slane %v4051_v60, 7  ;;  %v4126_v21 = vmul.f32 0.007598758, %v4040_v50 }
  0xa7   :  { %v893_v60 = vrot.slane %v4107_v6, 4  ;;  %v836_v56 = vrot.slane %v4169_v45, 3 }
  0xa8   :  { %640 = vrot.lane.b32.xlu1 %v3940_v27, %s3790_s11  ;;  %v4104_v27 = vmul.f32 0.10936069, %v4089_v47  ;;  %v4116_v24 = vadd.f32 %v1029_v39, %v1023_v44  ;;  %7006 = vst [vmem:[#allocation21_spill] sm:$0xff] %v4126_v21  ;;  %v4137_v46 = vsel %vm263_vm2, %v938_v53, %v939_v9  ;;  %v920_v44 = vmul.f32 0.26601171, %v4056_v2  ;;  %v4151_v9 = vld [vmem:[#allocation4 + $0x28] sm:$0xff] }
  0xa9   :  { %v803_v53 = vadd.f32 %v791_v59, %v773_v41  ;;  %v4154_v2 = vmul.f32 0.10936069, %v4095_v35  ;;  %v895_v20 = vsel %vm208_vm1, %v893_v60, %v894_v40  ;;  %v778_v59 = vmul.f32 0.036000773, %v4119_v15 }
  0xaa   :  { %618 = vrot.lane.b32.xlu0 %v4010_v54, %s3789_s10  ;;  %v854_v54 = vadd.f32 %v832_v55, %v800_v51  ;;  %v840_v39 = vrot.slane %v4104_v27, 3  ;;  %v921_v51 = vmul.f32 0.26601171, %v4089_v47  ;;  %v748_v55 = vmul.f32 0.007598758, %v4119_v15 }
  0xab   :  { %v793_v60 = vrot.slane %v781_v62, 2  ;;  %v845_v40 = vrot.slane %v4154_v2, 3  ;;  %v790_v62 = vrot.slane %v778_v59, 2 }
  0xac   :  { %644 = vrot.lane.b32.xlu1 %v3950_v31, %s3790_s11  ;;  %v839_v31 = vrot.slane %v4099_v1, 3  ;;  %v4149_v63 = vadd.f32 %v886_v52, %v854_v54  ;;  %v742_v52 = vmul.f32 0.0010283801, %v4119_v15  ;;  %v4165_v54 = vld [vmem:[#allocation4 + $0x40] sm:$0xff]  ;;  %v760_v41 = vrot.slane %v748_v55, 1 }
  0xad   :  { %v4179_v55 = vmul.f32 0.21300554, %v4095_v35  ;;  %v744_v13 = vmul.f32 0.0010283801, %v4165_v54 }
  0xae   :  { %622 = vrot.lane.b32.xlu0 %v4021_v0, %s3789_s10  ;;  %v4145_v0 = vsel %vm325_vm4, %v998_v10, %v999_v14  ;;  %v947_v14 = vrot.slane %v920_v44, 5  ;;  %v846_v44 = vrot.slane %v4157_v16, 3  ;;  %v4182_v10 = vmul.f32 0.21300554, %v4134_v7 }
  0xb0   :  { %648 = vrot.lane.b32.xlu1 %v3960_v32, %s3790_s11  ;;  %v841_v32 = vsel %vm153_vm0, %v839_v31, %v840_v39  ;;  %v4174_v31 = vmul.f32 0.10936069, %v4151_v9  ;;  %v775_v39 = vadd.f32 %v763_v58, %v745_v57  ;;  %v750_v57 = vmul.f32 0.007598758, %v4165_v54 }
  0xb1   :  { %v772_v58 = vadd.f32 %v760_v41, %v742_v52  ;;  %v847_v52 = vsel %vm153_vm0, %v845_v40, %v846_v44  ;;  %v899_v41 = vrot.slane %v4179_v55, 4  ;;  %v900_v59 = vrot.slane %v4182_v10, 4 }
  0xb2   :  { %638 = vrot.lane.b32.xlu0 %v3965_v34, %s3790_s11  ;;  %v948_v34 = vrot.slane %v921_v51, 5  ;;  %v978_v51 = vrot.slane %v4110_v8, 6  ;;  %v837_v48 = vrot.slane %v4174_v31, 3  ;;  %v805_v8 = vadd.f32 %v793_v60, %v775_v39 }
  0xb3   :  { %v762_v39 = vrot.slane %v750_v57, 1  ;;  %v4213_v40 = vmul.f32 0.10936069, %v4165_v54 }
  0xb4   :  { %664 = vrot.lane.b32.xlu1 %v3915_v17, %s3791_s12  ;;  %v857_v17 = vadd.f32 %v841_v32, %v803_v53  ;;  %v924_v53 = vmul.f32 0.26601171, %v4095_v35  ;;  %v4200_v32 = vld [vmem:[#allocation4 + $0x48] sm:$0xff]  ;;  %v780_v35 = vmul.f32 0.036000773, %v4165_v54  ;;  %v859_v57 = vadd.f32 %v847_v52, %v805_v8 }
  0xb5   :  { %v4216_v44 = vmul.f32 0.10936069, %v4200_v32  ;;  %v838_v61 = vsel %vm153_vm0, %v836_v56, %v837_v48  ;;  %v774_v21 = vadd.f32 %v762_v39, %v744_v13  ;;  %v4234_v56 = vmul.f32 0.21300554, %v4200_v32 }
  0xb6   :  { %642 = vrot.lane.b32.xlu0 %v3973_v37, %s3790_s11  ;;  %v4197_v37 = vmul.f32 0.21300554, %v4151_v9  ;;  %v911_v60 = vadd.f32 %v895_v20, %v857_v17  ;;  %v901_v20 = vsel %vm208_vm1, %v899_v41, %v900_v59  ;;  %v953_v17 = vrot.slane %v924_v53, 5 }
  0xb7   :  { %v792_v4 = vrot.slane %v780_v35, 2  ;;  %v843_v48 = vrot.slane %v4216_v44, 3  ;;  %v979_v13 = vsel %vm294_vm3, %v7007_v42, %v978_v51  ;;  %v913_v53 = vadd.f32 %v901_v20, %v859_v57 }
  0xb8   :  { %668 = vrot.lane.b32.xlu1 %v3920_v22, %s3791_s12  ;;  %v949_v22 = vsel %vm263_vm2, %v947_v14, %v948_v34  ;;  %v918_v14 = vmul.f32 0.26601171, %v4119_v15  ;;  %v919_v34 = vmul.f32 0.26601171, %v4151_v9  ;;  %v891_v12 = vrot.slane %v4197_v37, 4 }
  0xb9   :  { %v983_v41 = vrot.slane %v4179_v55, 6  ;;  %v984_v59 = vrot.slane %v4182_v10, 6  ;;  %v897_v35 = vrot.slane %v4234_v56, 4  ;;  %v1031_v20 = vmul.f32 0.036000773, %v4089_v47 }
  0xba   :  { %646 = vrot.lane.b32.xlu0 %v3982_v43, %s3790_s11  ;;  %v802_v43 = vadd.f32 %v790_v62, %v772_v58  ;;  %v1008_v58 = vrot.slane %v4104_v27, 7  ;;  %v842_v62 = vrot.slane %v4213_v40, 3  ;;  %v944_v8 = vrot.slane %v918_v14, 5 }
  0xbb   :  { %v955_v27 = vsel %vm263_vm2, %v953_v17, %v954_v19  ;;  %v892_v39 = vsel %vm208_vm1, %v890_v29, %v891_v12  ;;  %v923_v19 = vmul.f32 0.26601171, %v4200_v32  ;;  %v7008_v29 = vrot.slane %v4099_v1, 7 }
  0xbc   :  { %672 = vrot.lane.b32.xlu1 %v3930_v25, %s3791_s12  ;;  %v4228_v25 = vmul.f32 0.21300554, %v4165_v54  ;;  %v856_v52 = vadd.f32 %v838_v61, %v802_v43  ;;  %v844_v51 = vsel %vm153_vm0, %v842_v62, %v843_v48  ;;  %v922_v61 = vmul.f32 0.26601171, %v4165_v54 }
  0xbd   :  { %v967_v12 = vadd.f32 %v955_v27, %v913_v53  ;;  %v985_v55 = vsel %vm294_vm3, %v983_v41, %v984_v59  ;;  %v1014_v54 = vrot.slane %v4157_v16, 7  ;;  %v1043_v43 = vmul.f32 0.007598758, %v4089_v47 }
  0xbe   :  { %662 = vrot.lane.b32.xlu0 %v3935_v26, %s3791_s12  ;;  %v965_v26 = vadd.f32 %v949_v22, %v911_v60  ;;  %v804_v22 = vadd.f32 %v792_v4, %v774_v21  ;;  %v896_v6 = vrot.slane %v4228_v25, 4  ;;  %v1009_v4 = vsel %vm325_vm4, %v7008_v29, %v1008_v58 }
  0xbf   :  { %v910_v21 = vadd.f32 %v892_v39, %v856_v52  ;;  %v1013_v60 = vrot.slane %v4154_v2, 7  ;;  %v951_v57 = vrot.slane %v923_v19, 5  ;;  %v7009_v16 = vrot.slane %v4063_v3, 1  ;;  %v7013_v39 = vld [vmem:[#allocation21_spill] sm:$0xff] }
  0xc0   :  { %688 = vrot.lane.b32.xlu1 %v3897_v33, %s3792_s13  ;;  %v945_v33 = vrot.slane %v919_v34, 5  ;;  %v995_v10 = vadd.f32 %v979_v13, %v965_v26  ;;  %v858_v1 = vadd.f32 %v844_v51, %v804_v22  ;;  %v898_v14 = vsel %vm208_vm1, %v896_v6, %v897_v35 }
  0xc1   :  { %v950_v34 = vrot.slane %v922_v61, 5  ;;  %v1073_v17 = vmul.f32 0.0010283801, %v4089_v47  ;;  %v1015_v62 = vsel %vm325_vm4, %v1013_v60, %v1014_v54  ;;  %v1004_v48 = vrot.slane %v4169_v45, 7  ;;  %v7015_v60 = vld [vmem:[#allocation13_spill] sm:$0xff] }
  0xc2   :  { %666 = vrot.lane.b32.xlu0 %v3945_v30, %s3791_s12  ;;  %v962_v30 = vadd.f32 %v4137_v46, %v4149_v63  ;;  %v974_v46 = vrot.slane %v4191_v23, 6  ;;  %v975_v63 = vrot.slane %v4197_v37, 6  ;;  %v1025_v2 = vadd.f32 %v1009_v4, %v995_v10 }
  0xc3   :  { %v997_v23 = vadd.f32 %v985_v55, %v967_v12  ;;  %v1005_v3 = vrot.slane %v4174_v31, 7  ;;  %v1055_v26 = vrot.slane %v1043_v43, 1  ;;  %v952_v42 = vsel %vm263_vm2, %v950_v34, %v951_v57 }
  0xc4   :  { %692 = vrot.lane.b32.xlu1 %v3886_v49, %s3792_s13  ;;  %v946_v49 = vsel %vm263_vm2, %v944_v8, %v945_v33  ;;  %v992_v37 = vadd.f32 %v4123_v18, %v962_v30  ;;  %v980_v18 = vrot.slane %v4228_v25, 6  ;;  %v981_v47 = vrot.slane %v4234_v56, 6  ;;  %v4295_v25 = vpop.permute.xlu1 %450  ;;  %v7011_v56 = vld [vmem:[#allocation18_spill] sm:$0xff] }
  0xc5   :  { %v964_v58 = vadd.f32 %v946_v49, %v910_v21  ;;  %v1037_v13 = vadd.f32 %v1031_v20, %v1025_v2  ;;  %v1033_v8 = vmul.f32 0.036000773, %v4134_v7  ;;  %v1045_v45 = vmul.f32 0.007598758, %v4134_v7  ;;  %7010 = vst [vmem:[#allocation22_spill] sm:$0xff] %v4295_v25  ;;  %v7018_v49 = vld [vmem:[#allocation8_spill] sm:$0xff] }
  0xc6   :  { %670 = vrot.lane.b32.xlu0 %v3955_v28, %s3791_s12  ;;  %v1065_v28 = vadd.f32 %v7009_v16, %v4116_v24  ;;  %v912_v24 = vadd.f32 %v898_v14, %v858_v1  ;;  %v1022_v31 = vadd.f32 %v4145_v0, %v992_v37  ;;  %v1028_v53 = vmul.f32 0.036000773, %v4040_v50 }
  0xc7   :  { %v1070_v52 = vmul.f32 0.0010283801, %v4040_v50  ;;  %v7012_v41 = vrot.slane %v7011_v56, 2  ;;  %v1052_v33 = vrot.slane %v7013_v39, 1  ;;  %v1006_v22 = vsel %vm325_vm4, %v1004_v48, %v1005_v3  ;;  %v4338_v48 = vpop.permute.xlu0 %446 }
  0xc8   :  { %696 = vrot.lane.b32.xlu1 %v3910_v11, %s3792_s13  ;;  %v976_v11 = vsel %vm294_vm3, %v974_v46, %v975_v63  ;;  %v966_v6 = vadd.f32 %v952_v42, %v912_v24  ;;  %v1085_v0 = vrot.slane %v1073_v17, 2  ;;  %v982_v51 = vsel %vm294_vm3, %v980_v18, %v981_v47  ;;  %v4322_v43 = vpop.permute.xlu1 %452  ;;  %7024 = vst [vmem:[#allocation8_spill] sm:$0xff] %v4338_v48 }
  0xc9   :  { %v994_v27 = vadd.f32 %v976_v11, %v964_v58  ;;  %v4299_v59 = vadd.f32 %v7012_v41, %v1065_v28  ;;  %v1010_v35 = vrot.slane %v4213_v40, 7  ;;  %v1011_v61 = vrot.slane %v4216_v44, 7  ;;  %v7016_v40 = vld [vmem:[#allocation11_spill] sm:$0xff]  ;;  %7021 = vst [vmem:[#allocation13_spill] sm:$0xff] %v4322_v43 }
  0xca   :  { %686 = vrot.lane.b32.xlu0 %v3867_v5, %s3792_s13  ;;  %v1027_v5 = vadd.f32 %v1015_v62, %v997_v23  ;;  %v1067_v19 = vadd.f32 %v1055_v26, %v1037_v13  ;;  %v1057_v10 = vrot.slane %v1045_v45, 1  ;;  %v1075_v29 = vmul.f32 0.0010283801, %v4134_v7  ;;  %v7020_v7 = vld [vmem:[#allocation20_spill] sm:$0xff]  ;;  %v7023_v62 = vld [vmem:[#allocation9_spill] sm:$0xff] }
  0xcb   :  { %v1034_v4 = vadd.f32 %v1028_v53, %v1022_v31  ;;  %v1024_v12 = vadd.f32 %v1006_v22, %v994_v27  ;;  %v1030_v21 = vmul.f32 0.036000773, %v4151_v9  ;;  %v1042_v55 = vmul.f32 0.007598758, %v4151_v9  ;;  %v7026_v13 = vld [vmem:[#allocation12_spill] sm:$0xff] }
  0xcc   :  { %718 = vrot.lane.b32.xlu1 %v4060_v38, %s3793_s14  ;;  %v1039_v30 = vadd.f32 %v1033_v8, %v1027_v5  ;;  %v4314_v54 = vmul.f32 0.0010283801, %v7016_v40  ;;  %v996_v44 = vadd.f32 %v982_v51, %v966_v6  ;;  %v4317_v46 = vmul.f32 0.0010283801, %v7018_v49 }
  0xcd   :  { %v1082_v63 = vrot.slane %v1070_v52, 2  ;;  %v1012_v1 = vsel %vm325_vm4, %v1010_v35, %v1011_v61  ;;  %v4325_v14 = vmul.f32 0.007598758, %v4299_v59  ;;  %v4327_v34 = vadd.f32 %v1085_v0, %v1067_v19  ;;  %v7029_v52 = vld [vmem:[#allocation10_spill] sm:$0xff]  ;;  %v3692_v35 = vld [vmem:[#allocation2] sm:$0xff] }
  0xce   :  { %690 = vrot.lane.b32.xlu0 %v3846_v36, %s3792_s13  ;;  %v7014_v36 = vld [vmem:[#allocation19_spill] sm:$0xff]  ;;  %7017 = vst [vmem:[#allocation18_spill] sm:$0xff] %v4314_v54  ;;  %7019 = vst [vmem:[#allocation21_spill] sm:$0xff] %v4317_v46  ;;  %v1069_v57 = vadd.f32 %v1057_v10, %v1039_v30  ;;  %v1087_v16 = vrot.slane %v1075_v29, 2  ;;  %v1064_v28 = vadd.f32 %v1052_v33, %v1034_v4  ;;  %v1054_v20 = vrot.slane %v1042_v55, 1 }
  0xcf   :  { %7022 = vst [vmem:[#allocation11_spill] sm:$0xff] %v4325_v14  ;;  %v1036_v2 = vadd.f32 %v1030_v21, %v1024_v12  ;;  %v1072_v23 = vmul.f32 0.0010283801, %v4151_v9  ;;  %v1026_v37 = vadd.f32 %v1012_v1, %v996_v44  ;;  %v1032_v17 = vmul.f32 0.036000773, %v4200_v32 }
  0xd0   :  { %722 = vrot.lane.b32.xlu1 %v7014_v36, %s3793_s14  ;;  %v1044_v58 = vmul.f32 0.007598758, %v4200_v32  ;;  %v4336_v11 = vmul.f32 %v7023_v62, %v7023_v62  ;;  %v4343_v3 = vmul.f32 0.007598758, %v4327_v34  ;;  %v4345_v24 = vadd.f32 %v1087_v16, %v1069_v57  ;;  %v4374_v33 = vpop.permute.xlu0 %448 }
  0xd1   :  { %v4347_v26 = vadd.f32 %v1082_v63, %v1064_v28  ;;  %v1066_v42 = vadd.f32 %v1054_v20, %v1036_v2  ;;  %v1084_v18 = vrot.slane %v1072_v23, 2  ;;  %v1074_v47 = vmul.f32 0.0010283801, %v4200_v32  ;;  %7032 = vst [vmem:[#allocation25_spill] sm:$0xff] %v4374_v33 }
  0xd2   :  { %694 = vrot.lane.b32.xlu0 %v7015_v60, %s3792_s13  ;;  %7025 = vst [vmem:[#allocation9_spill] sm:$0xff] %v4343_v3  ;;  %v4353_v5 = vmul.f32 0.0010283801, %v7026_v13  ;;  %v1038_v45 = vadd.f32 %v1032_v17, %v1026_v37  ;;  %v1056_v31 = vrot.slane %v1044_v58, 1  ;;  %v1449_v53 = vmul.f32 0.007598758, %v4336_v11 }
  0xd3   :  { %v4360_v27 = vmul.f32 %v7029_v52, %v7029_v52  ;;  %v4365_v32 = vmul.f32 0.007598758, %v4345_v24  ;;  %v4368_v56 = vmul.f32 0.007598758, %v4347_v26  ;;  %v4370_v41 = vadd.f32 %v1084_v18, %v1066_v42  ;;  %v3693_v58 = vld [vmem:[#allocation2 + $0x8] sm:$0xff] }
  0xd4   :  { %726 = vrot.lane.b32.xlu1 %v7020_v7, %s3793_s14  ;;  %7027 = vst [vmem:[#allocation12_spill] sm:$0xff] %v4353_v5  ;;  %v1086_v39 = vrot.slane %v1074_v47, 2  ;;  %v1068_v6 = vadd.f32 %v1056_v31, %v1038_v45  ;;  %v1443_v0 = vmul.f32 0.0010283801, %v4336_v11  ;;  %v1461_v51 = vrot.slane %v1449_v53, 1 }
  0xd5   :  { %7030 = vst [vmem:[#allocation10_spill] sm:$0xff] %v4365_v32  ;;  %7031 = vst [vmem:[#allocation24_spill] sm:$0xff] %v4368_v56  ;;  %v4379_v61 = vmul.f32 %v3692_v35, %v3692_v35  ;;  %v1479_v19 = vmul.f32 0.036000773, %v4336_v11  ;;  %v4383_v30 = vmul.f32 0.10936069, %v4336_v11  ;;  %v4436_v62 = vmul.f32 %v3693_v58, %v3693_v58 }
  0xd6   :  { %716 = vrot.lane.b32.xlu0 %v4314_v54, %s3793_s14  ;;  %v4386_v10 = vmul.f32 0.10936069, %v4360_v27  ;;  %v4391_v29 = vmul.f32 0.036000773, %v4299_v59  ;;  %v4394_v4 = vmul.f32 0.007598758, %v4370_v41  ;;  %v4401_v21 = vadd.f32 %v1086_v39, %v1068_v6 }
  0xd7   :  { %v4397_v12 = vmul.f32 0.036000773, %v4347_v26  ;;  %v4406_v60 = vmul.f32 0.036000773, %v4327_v34  ;;  %v4409_v40 = vmul.f32 0.036000773, %v4370_v41  ;;  %v1473_v49 = vadd.f32 %v1461_v51, %v1443_v0 }
  0xd8   :  { %1120 = vrot.lane.b32.xlu1 %v4325_v14, %s3784_s1  ;;  %7034 = vst [vmem:[#allocation27_spill] sm:$0xff] %v4394_v4  ;;  %7036 = vst [vmem:[#allocation29_spill] sm:$0xff] %v4401_v21  ;;  %v1448_v44 = vmul.f32 0.007598758, %v4379_v61  ;;  %v1491_v63 = vrot.slane %v1479_v19, 2  ;;  %v1535_v1 = vrot.slane %v4383_v30, 3 }
  0xd9   :  { %7035 = vst [vmem:[#allocation28_spill] sm:$0xff] %v4397_v12  ;;  %7038 = vst [vmem:[#allocation31_spill] sm:$0xff] %v4409_v40  ;;  %v1536_v57 = vrot.slane %v4386_v10, 3  ;;  %v4419_v28 = vmul.f32 0.10936069, %v4299_v59 }
  0xda   :  { %720 = vrot.lane.b32.xlu0 %v4317_v46, %s3793_s14  ;;  %v4355_v8 = vpop.permute.xlu1 %456  ;;  %v4422_v2 = vmul.f32 0.21300554, %v4336_v11  ;;  %v4425_v20 = vmul.f32 0.21300554, %v4360_v27  ;;  %v4428_v23 = vmul.f32 0.036000773, %v4345_v24  ;;  %v1503_v45 = vadd.f32 %v1491_v63, %v1473_v49 }
  0xdb   :  { %7028 = vst [vmem:[#allocation23_spill] sm:$0xff] %v4355_v8  ;;  %v4431_v37 = vmul.f32 0.10936069, %v4347_v26  ;;  %v4434_v17 = vmul.f32 0.10936069, %v4327_v34  ;;  %v1460_v13 = vrot.slane %v1448_v44, 1  ;;  %v1537_v31 = vsel %vm153_vm0, %v1535_v1, %v1536_v57 }
  0xdc   :  { %1124 = vrot.lane.b32.xlu1 %v4343_v3, %s3784_s1  ;;  %7040 = vst [vmem:[#allocation33_spill] sm:$0xff] %v4428_v23  ;;  %v4441_v42 = vmul.f32 0.007598758, %v4401_v21  ;;  %v4446_v47 = vmul.f32 0.10936069, %v4370_v41  ;;  %v1589_v6 = vrot.slane %v4422_v2, 4 }
  0xdd   :  { %v1442_v53 = vmul.f32 0.0010283801, %v4379_v61  ;;  %v1478_v52 = vmul.f32 0.036000773, %v4379_v61  ;;  %v1590_v0 = vrot.slane %v4425_v20, 4  ;;  %v1674_v33 = vrot.slane %v4425_v20, 6 }
  0xde   :  { %724 = vrot.lane.b32.xlu0 %v4353_v5, %s3793_s14  ;;  %v4376_v22 = vpop.permute.xlu1 %484  ;;  %7041 = vst [vmem:[#allocation34_spill] sm:$0xff] %v4441_v42  ;;  %v1618_v51 = vmul.f32 0.26601171, %v4336_v11  ;;  %v1619_v35 = vmul.f32 0.26601171, %v4360_v27 }
  0xdf   :  { %7033 = vst [vmem:[#allocation26_spill] sm:$0xff] %v4376_v22  ;;  %v4460_v19 = vmul.f32 0.10936069, %v4345_v24  ;;  %v4463_v44 = vmul.f32 0.10936069, %v4379_v61  ;;  %v1490_v25 = vrot.slane %v1478_v52, 2 }
  0xe0   :  { %1128 = vrot.lane.b32.xlu1 %v4365_v32, %s3784_s1  ;;  %v4466_v49 = vmul.f32 0.10936069, %v4436_v62  ;;  %v4473_v1 = vmul.f32 0.21300554, %v4299_v59  ;;  %v4476_v11 = vmul.f32 0.21300554, %v4347_v26 }
  0xe1   :  { %v4479_v57 = vmul.f32 0.21300554, %v4327_v34  ;;  %v4482_v58 = vmul.f32 0.21300554, %v4370_v41  ;;  %v1644_v22 = vrot.slane %v1619_v35, 5  ;;  %v1532_v7 = vrot.slane %v4463_v44, 3 }
  0xe2   :  { %1118 = vrot.lane.b32.xlu0 %v4368_v56, %s3784_s1  ;;  %v4403_v55 = vpop.permute.xlu1 %488  ;;  %v4493_v46 = vmul.f32 0.26601171, %v4299_v59  ;;  %v4496_v8 = vmul.f32 0.26601171, %v4347_v26  ;;  %v4511_v52 = vmul.f32 0.21300554, %v4436_v62 }
  0xe3   :  { %7037 = vst [vmem:[#allocation30_spill] sm:$0xff] %v4403_v55  ;;  %v1643_v55 = vrot.slane %v1618_v51, 5  ;;  %v4518_v51 = vmul.f32 0.036000773, %v4401_v21  ;;  %v4521_v35 = vmul.f32 0.26601171, %v4370_v41 }
  0xe4   :  { %v4414_v16 = vpop.permute.xlu0 %454  ;;  %1156 = vrot.lane.b32.xlu1 %v4391_v29, %s3785_s6  ;;  %v4534_v43 = vmul.f32 0.10936069, %v4401_v21 }
  0xe5   :  { %7039 = vst [vmem:[#allocation32_spill] sm:$0xff] %v4414_v16  ;;  %v1472_v16 = vadd.f32 %v1460_v13, %v1442_v53  ;;  %v1533_v13 = vrot.slane %v4466_v49, 3  ;;  %v4508_v53 = vmul.f32 0.21300554, %v4379_v61  ;;  %v1645_v54 = vsel %vm263_vm2, %v1643_v55, %v1644_v22 }
  0xe6   :  { %1122 = vrot.lane.b32.xlu0 %v4394_v4, %s3784_s1  ;;  %v4443_v18 = vpop.permute.xlu1 %492  ;;  %v1587_v55 = vrot.slane %v4511_v52, 4  ;;  %v4568_v4 = vmul.f32 0.0010283801, %v4347_v26 }
  0xe7   :  { %7042 = vst [vmem:[#allocation35_spill] sm:$0xff] %v4443_v18  ;;  %v4485_v18 = vmul.f32 0.21300554, %v4345_v24  ;;  %v1502_v38 = vadd.f32 %v1490_v25, %v1472_v16  ;;  %v1534_v36 = vsel %vm153_vm0, %v1532_v7, %v1533_v13  ;;  %v1586_v22 = vrot.slane %v4508_v53, 4  ;;  %v7052_v13 = vld [vmem:[#allocation16_spill] sm:$0xff] }
  0xe8   :  { %v4451_v39 = vpop.permute.xlu0 %482  ;;  %1160 = vrot.lane.b32.xlu1 %v4406_v60, %s3785_s6  ;;  %v4551_v7 = vmul.f32 0.21300554, %v4401_v21  ;;  %7055 = vst [vmem:[#allocation42_spill] sm:$0xff] %v4568_v4  ;;  %v1701_v4 = vrot.slane %v4466_v49, 7 }
  0xe9   :  { %7043 = vst [vmem:[#allocation36_spill] sm:$0xff] %v4451_v39  ;;  %v1557_v39 = vadd.f32 %v1537_v31, %v1503_v45  ;;  %v4505_v31 = vmul.f32 0.26601171, %v4327_v34  ;;  %v1556_v32 = vadd.f32 %v1534_v36, %v1502_v38  ;;  %v1703_v36 = vrot.slane %v4383_v30, 7 }
  0xea   :  { %1126 = vrot.lane.b32.xlu0 %v4441_v42, %s3784_s1  ;;  %v4470_v63 = vpop.permute.xlu1 %520  ;;  %v1616_v42 = vmul.f32 0.26601171, %v4379_v61  ;;  %v4554_v61 = vmul.f32 0.26601171, %v4401_v21 }
  0xeb   :  { %7044 = vst [vmem:[#allocation37_spill] sm:$0xff] %v4470_v63  ;;  %v1591_v63 = vsel %vm208_vm1, %v1589_v6, %v1590_v0  ;;  %v7047_v6 = vld [vmem:[#allocation14_spill] sm:$0xff] }
  0xec   :  { %v4487_v5 = vpop.permute.xlu0 %486  ;;  %1164 = vrot.lane.b32.xlu1 %v4428_v23, %s3785_s6  ;;  %v4515_v0 = vmul.f32 %v7047_v6, %v7047_v6  ;;  %7048 = vst [vmem:[#allocation14_spill] sm:$0xff] %v4518_v51  ;;  %v1673_v6 = vrot.slane %v4422_v2, 6  ;;  %v7051_v2 = vld [vmem:[#allocation15_spill] sm:$0xff]  ;;  %v1640_v3 = vrot.slane %v1616_v42, 5  ;;  %v1704_v42 = vrot.slane %v4386_v10, 7 }
  0xed   :  { %7045 = vst [vmem:[#allocation38_spill] sm:$0xff] %v4487_v5  ;;  %v1611_v5 = vadd.f32 %v1591_v63, %v1557_v39  ;;  %v1617_v39 = vmul.f32 0.26601171, %v4436_v62  ;;  %v4547_v25 = vmul.f32 %v7051_v2, %v7051_v2  ;;  %v4565_v2 = vmul.f32 0.0010283801, %v4299_v59 }
  0xee   :  { %1154 = vrot.lane.b32.xlu0 %v4397_v12, %s3785_s6  ;;  %v4502_v45 = vpop.permute.xlu1 %524  ;;  %v2139_v16 = vmul.f32 0.007598758, %v4515_v0  ;;  %v1675_v56 = vsel %vm294_vm3, %v1673_v6, %v1674_v33  ;;  %v1588_v59 = vsel %vm208_vm1, %v1586_v22, %v1587_v55  ;;  %v4579_v26 = vmul.f32 0.10936069, %v4515_v0 }
  0xef   :  { %7046 = vst [vmem:[#allocation39_spill] sm:$0xff] %v4502_v45  ;;  %v4524_v45 = vmul.f32 0.26601171, %v4345_v24  ;;  %v1665_v20 = vadd.f32 %v1645_v54, %v1611_v5  ;;  %7054 = vst [vmem:[#allocation16_spill] sm:$0xff] %v4565_v2  ;;  %v1641_v54 = vrot.slane %v1617_v39, 5  ;;  %v1670_v55 = vrot.slane %v4508_v53, 6 }
  0xf0   :  { %v4526_v48 = vpop.permute.xlu0 %490  ;;  %1192 = vrot.lane.b32.xlu1 %v4419_v28, %s3786_s7  ;;  %v2133_v5 = vmul.f32 0.0010283801, %v4515_v0  ;;  %v2151_v2 = vrot.slane %v2139_v16, 1  ;;  %v4582_v33 = vmul.f32 0.10936069, %v4547_v25  ;;  %v1671_v16 = vrot.slane %v4511_v52, 6 }
  0xf1   :  { %7049 = vst [vmem:[#allocation40_spill] sm:$0xff] %v4526_v48  ;;  %v1695_v38 = vadd.f32 %v1675_v56, %v1665_v20  ;;  %v4592_v22 = vmul.f32 0.0010283801, %v4327_v34  ;;  %v4598_v56 = vmul.f32 %v4040_v50, %v4040_v50  ;;  %v1610_v30 = vadd.f32 %v1588_v59, %v1556_v32 }
  0xf2   :  { %1158 = vrot.lane.b32.xlu0 %v4409_v40, %s3785_s6  ;;  %v4541_v63 = vpop.permute.xlu1 %528  ;;  %v1642_v10 = vsel %vm263_vm2, %v1640_v3, %v1641_v54  ;;  %v2225_v53 = vrot.slane %v4579_v26, 3  ;;  %v2226_v52 = vrot.slane %v4582_v33, 3  ;;  %v4611_v50 = vmul.f32 0.21300554, %v4547_v25 }
  0xf3   :  { %7050 = vst [vmem:[#allocation41_spill] sm:$0xff] %v4541_v63  ;;  %v4558_v63 = vmul.f32 %v7052_v13, %v7052_v13  ;;  %v2169_v13 = vmul.f32 0.036000773, %v4515_v0  ;;  %7058 = vst [vmem:[#allocation45_spill] sm:$0xff] %v4592_v22  ;;  %v1705_v32 = vsel %vm325_vm4, %v1703_v36, %v1704_v42  ;;  %v4628_v36 = vmul.f32 0.10936069, %v4598_v56 }
  0xf4   :  { %v4560_v48 = vpop.permute.xlu0 %518  ;;  %1196 = vrot.lane.b32.xlu1 %v4434_v17, %s3786_s7  ;;  %v1664_v42 = vadd.f32 %v1642_v10, %v1610_v30  ;;  %v2308_v22 = vmul.f32 0.26601171, %v4515_v0  ;;  %v2309_v30 = vmul.f32 0.26601171, %v4547_v25 }
  0xf5   :  { %7053 = vst [vmem:[#allocation15_spill] sm:$0xff] %v4560_v48  ;;  %v2138_v6 = vmul.f32 0.007598758, %v4558_v63  ;;  %v2181_v20 = vrot.slane %v2169_v13, 2  ;;  %v2132_v3 = vmul.f32 0.0010283801, %v4558_v63 }
  0xf6   :  { %1162 = vrot.lane.b32.xlu0 %v4518_v51, %s3785_s6  ;;  %v4575_v48 = vpop.permute.xlu1 %556  ;;  %v2168_v13 = vmul.f32 0.036000773, %v4558_v63  ;;  %v4642_v49 = vmul.f32 0.21300554, %v4558_v63  ;;  %v2333_v21 = vrot.slane %v2308_v22, 5  ;;  %v2334_v12 = vrot.slane %v2309_v30, 5 }
  0xf7   :  { %7056 = vst [vmem:[#allocation43_spill] sm:$0xff] %v4575_v48  ;;  %v4602_v48 = vmul.f32 0.21300554, %v4515_v0  ;;  %v2150_v54 = vrot.slane %v2138_v6, 1  ;;  %v1700_v6 = vrot.slane %v4463_v44, 7 }
  0xf8   :  { %v4587_v39 = vpop.permute.xlu0 %522  ;;  %1200 = vrot.lane.b32.xlu1 %v4460_v19, %s3786_s7  ;;  %v2180_v44 = vrot.slane %v2168_v13, 2  ;;  %v4652_v0 = vmul.f32 0.21300554, %v4598_v56  ;;  %v2307_v22 = vmul.f32 0.26601171, %v4598_v56 }
  0xf9   :  { %7057 = vst [vmem:[#allocation44_spill] sm:$0xff] %v4587_v39  ;;  %v2163_v39 = vadd.f32 %v2151_v2, %v2133_v5  ;;  %v4621_v2 = vmul.f32 0.0010283801, %v4370_v41  ;;  %v1672_v5 = vsel %vm294_vm3, %v1670_v55, %v1671_v16  ;;  %v2227_v55 = vsel %vm153_vm0, %v2225_v53, %v2226_v52 }
  0xfa   :  { %1190 = vrot.lane.b32.xlu0 %v4431_v37, %s3786_s7  ;;  %v4606_v34 = vpop.permute.xlu1 %560  ;;  %v2280_v16 = vrot.slane %v4611_v50, 4  ;;  %v2162_v10 = vadd.f32 %v2150_v54, %v2132_v3  ;;  %v2223_v53 = vrot.slane %v4628_v36, 3  ;;  %v1725_v52 = vadd.f32 %v1705_v32, %v1695_v38 }
  0xfb   :  { %7059 = vst [vmem:[#allocation46_spill] sm:$0xff] %v4606_v34  ;;  %7061 = vst [vmem:[#allocation48_spill] sm:$0xff] %v4621_v2  ;;  %v4625_v34 = vmul.f32 0.10936069, %v4558_v63  ;;  %v2193_v2 = vadd.f32 %v2181_v20, %v2163_v39  ;;  %v1731_v39 = vmul.f32 0.036000773, %v4360_v27  ;;  %v1702_v13 = vsel %vm325_vm4, %v1700_v6, %v1701_v4 }
  0xfc   :  { %v4616_v59 = vpop.permute.xlu0 %526  ;;  %1228 = vrot.lane.b32.xlu1 %v4473_v1, %s3787_s8  ;;  %v1743_v3 = vmul.f32 0.007598758, %v4360_v27  ;;  %v1773_v54 = vmul.f32 0.0010283801, %v4360_v27  ;;  %v2192_v23 = vadd.f32 %v2180_v44, %v2162_v10  ;;  %v2276_v38 = vrot.slane %v4642_v49, 4 }
  0xfd   :  { %7060 = vst [vmem:[#allocation47_spill] sm:$0xff] %v4616_v59  ;;  %v2279_v59 = vrot.slane %v4602_v48, 4  ;;  %v2222_v20 = vrot.slane %v4625_v34, 3  ;;  %v2247_v40 = vadd.f32 %v2227_v55, %v2193_v2  ;;  %v4665_v32 = vmul.f32 %v4119_v15, %v4119_v15 }
  0xfe   :  { %1194 = vrot.lane.b32.xlu0 %v4446_v47, %s3786_s7  ;;  %v4635_v41 = vpop.permute.xlu1 %564  ;;  %v2277_v2 = vrot.slane %v4652_v0, 4  ;;  %v1755_v6 = vrot.slane %v1743_v3, 1  ;;  %v1742_v15 = vmul.f32 0.007598758, %v4436_v62  ;;  %v1730_v10 = vmul.f32 0.036000773, %v4436_v62 }
  0xff   :  { %7062 = vst [vmem:[#allocation49_spill] sm:$0xff] %v4635_v41  ;;  %v2281_v14 = vsel %vm208_vm1, %v2279_v59, %v2280_v16  ;;  %v2224_v4 = vsel %vm153_vm0, %v2222_v20, %v2223_v53  ;;  %v2306_v59 = vmul.f32 0.26601171, %v4558_v63  ;;  %v1785_v16 = vrot.slane %v1773_v54, 2 }
 0x100   :  { %v4644_v51 = vpop.permute.xlu0 %554  ;;  %1232 = vrot.lane.b32.xlu1 %v4479_v57, %s3787_s8  ;;  %v2301_v44 = vadd.f32 %v2281_v14, %v2247_v40  ;;  %v2335_v63 = vsel %vm263_vm2, %v2333_v21, %v2334_v12  ;;  %v2363_v20 = vrot.slane %v4602_v48, 6  ;;  %v2331_v54 = vrot.slane %v2307_v22, 5 }
 0x101   :  { %7063 = vst [vmem:[#allocation50_spill] sm:$0xff] %v4644_v51  ;;  %v1694_v51 = vadd.f32 %v1672_v5, %v1664_v42  ;;  %v4676_v5 = vmul.f32 0.0010283801, %v4345_v24  ;;  %v1737_v42 = vadd.f32 %v1731_v39, %v1725_v52  ;;  %v2364_v24 = vrot.slane %v4611_v50, 6 }
 0x102   :  { %1198 = vrot.lane.b32.xlu0 %v4534_v43, %s3786_s7  ;;  %v4659_v41 = vpop.permute.xlu1 %592  ;;  %v2246_v39 = vadd.f32 %v2224_v4, %v2192_v23  ;;  %v2278_v52 = vsel %vm208_vm1, %v2276_v38, %v2277_v2  ;;  %v2330_v3 = vrot.slane %v2306_v59, 5  ;;  %v1754_v14 = vrot.slane %v1742_v15, 1 }
 0x103   :  { %7064 = vst [vmem:[#allocation51_spill] sm:$0xff] %v4676_v5  ;;  %v1724_v30 = vadd.f32 %v1702_v13, %v1694_v51  ;;  %v2140_v51 = vmul.f32 0.007598758, %v4665_v32  ;;  %v1767_v13 = vadd.f32 %v1755_v6, %v1737_v42  ;;  %v4694_v12 = vmul.f32 0.0010283801, %v4436_v62 }
 0x104   :  { %v4667_v27 = vpop.permute.xlu0 %558  ;;  %1236 = vrot.lane.b32.xlu1 %v4485_v18, %s3787_s8  ;;  %v4698_v48 = vmul.f32 %v4151_v9, %v4151_v9  ;;  %v2355_v40 = vadd.f32 %v2335_v63, %v2301_v44  ;;  %v2393_v23 = vrot.slane %v4579_v26, 7  ;;  %v2394_v50 = vrot.slane %v4582_v33, 7 }
 0x105   :  { %v2365_v38 = vsel %vm294_vm3, %v2363_v20, %v2364_v24  ;;  %v2300_v4 = vadd.f32 %v2278_v52, %v2246_v39  ;;  %v2360_v62 = vrot.slane %v4642_v49, 6  ;;  %v2361_v2 = vrot.slane %v4652_v0, 6  ;;  %v3694_v0 = vld [vmem:[#allocation2 + $0x20] sm:$0xff] }
 0x106   :  { %1226 = vrot.lane.b32.xlu0 %v4476_v11, %s3787_s8  ;;  %v4681_v55 = vpop.permute.xlu1 %596  ;;  %v2332_v59 = vsel %vm263_vm2, %v2330_v3, %v2331_v54  ;;  %v2134_v22 = vmul.f32 0.0010283801, %v4665_v32  ;;  %v2152_v42 = vrot.slane %v2140_v51, 1  ;;  %v2170_v26 = vmul.f32 0.036000773, %v4665_v32 }
 0x107   :  { %v4716_v33 = vadd.f32 %v1785_v16, %v1767_v13  ;;  %v4719_v6 = vmul.f32 0.10936069, %v4665_v32  ;;  %v4722_v49 = vmul.f32 0.10936069, %v4698_v48  ;;  %v4724_v15 = vmul.f32 %v3694_v0, %v3694_v0 }
 0x108   :  { %v4687_v53 = vpop.permute.xlu0 %562  ;;  %1264 = vrot.lane.b32.xlu1 %v4493_v46, %s3788_s9  ;;  %v1736_v46 = vadd.f32 %v1730_v10, %v1724_v30  ;;  %v2385_v16 = vadd.f32 %v2365_v38, %v2355_v40  ;;  %v2395_v44 = vsel %vm325_vm4, %v2393_v23, %v2394_v50  ;;  %v2354_v63 = vadd.f32 %v2332_v59, %v2300_v4  ;;  %v3695_v38 = vld [vmem:[#allocation2 + $0x28] sm:$0xff] }
 0x109   :  { %7067 = vst [vmem:[#allocation54_spill] sm:$0xff] %v4716_v33  ;;  %v2390_v20 = vrot.slane %v4625_v34, 7  ;;  %v2391_v24 = vrot.slane %v4628_v36, 7  ;;  %v4737_v39 = vmul.f32 0.21300554, %v4665_v32  ;;  %v2362_v3 = vsel %vm294_vm3, %v2360_v62, %v2361_v2 }
 0x10a   :  { %1230 = vrot.lane.b32.xlu0 %v4482_v58, %s3787_s8  ;;  %v4702_v21 = vpop.permute.xlu1 %600  ;;  %v4730_v30 = vadd.f32 %v1754_v14, %v1736_v46  ;;  %v2164_v54 = vadd.f32 %v2152_v42, %v2134_v22  ;;  %v2182_v51 = vrot.slane %v2170_v26, 2  ;;  %v4745_v13 = vmul.f32 0.21300554, %v4698_v48 }
 0x10b   :  { %7065 = vst [vmem:[#allocation52_spill] sm:$0xff] %v4702_v21  ;;  %v2421_v14 = vmul.f32 0.036000773, %v4547_v25  ;;  %v2228_v34 = vrot.slane %v4719_v6, 3  ;;  %v2229_v36 = vrot.slane %v4722_v49, 3  ;;  %v4761_v4 = vmul.f32 %v3695_v38, %v3695_v38  ;;  %v3698_v38 = vld [vmem:[#allocation2 + $0x38] sm:$0xff] }
 0x10c   :  { %v4709_v9 = vpop.permute.xlu0 %590  ;;  %1268 = vrot.lane.b32.xlu1 %v4505_v31, %s3788_s9  ;;  %v1450_v46 = vmul.f32 0.007598758, %v4724_v15  ;;  %v4756_v23 = vmul.f32 0.007598758, %v4547_v25  ;;  %v4759_v50 = vmul.f32 0.0010283801, %v4547_v25  ;;  %v2384_v62 = vadd.f32 %v2362_v3, %v2354_v63 }
 0x10d   :  { %7066 = vst [vmem:[#allocation53_spill] sm:$0xff] %v4709_v9  ;;  %v2392_v2 = vsel %vm325_vm4, %v2390_v20, %v2391_v24  ;;  %v4765_v59 = vmul.f32 0.007598758, %v4598_v56  ;;  %v2194_v42 = vadd.f32 %v2182_v51, %v2164_v54  ;;  %v2283_v25 = vrot.slane %v4745_v13, 4 }
 0x10e   :  { %1234 = vrot.lane.b32.xlu0 %v4551_v7, %s3787_s8  ;;  %v4728_v31 = vpop.permute.xlu1 %616  ;;  %v2310_v26 = vmul.f32 0.26601171, %v4665_v32  ;;  %v2311_v0 = vmul.f32 0.26601171, %v4698_v48  ;;  %v1462_v63 = vrot.slane %v1450_v46, 1 }
 0x10f   :  { %7068 = vst [vmem:[#allocation55_spill] sm:$0xff] %v4728_v31  ;;  %v1480_v20 = vmul.f32 0.036000773, %v4724_v15  ;;  %v4785_v32 = vmul.f32 0.10936069, %v4724_v15 }
 0x110   :  { %v4739_v52 = vpop.permute.xlu0 %594  ;;  %1272 = vrot.lane.b32.xlu1 %v4524_v45, %s3788_s9  ;;  %v2415_v45 = vadd.f32 %v2395_v44, %v2385_v16  ;;  %v2230_v16 = vsel %vm153_vm0, %v2228_v34, %v2229_v36  ;;  %v1444_v44 = vmul.f32 0.0010283801, %v4724_v15  ;;  %v4788_v54 = vmul.f32 0.10936069, %v4761_v4 }
 0x111   :  { %7069 = vst [vmem:[#allocation56_spill] sm:$0xff] %v4739_v52  ;;  %v2414_v34 = vadd.f32 %v2392_v2, %v2384_v62  ;;  %v2420_v36 = vmul.f32 0.036000773, %v4598_v56  ;;  %v4794_v46 = vmul.f32 0.0010283801, %v4598_v56  ;;  %v2248_v3 = vadd.f32 %v2230_v16, %v2194_v42  ;;  %v3696_v62 = vld [vmem:[#allocation2 + $0x30] sm:$0xff] }
 0x112   :  { %1262 = vrot.lane.b32.xlu0 %v4496_v8, %s3788_s9  ;;  %v4753_v40 = vpop.permute.xlu1 %620  ;;  %v2282_v8 = vrot.slane %v4737_v39, 4  ;;  %v4790_v51 = vadd.f32 %v2421_v14, %v2415_v45  ;;  %v2336_v10 = vrot.slane %v2310_v26, 5  ;;  %v1474_v14 = vadd.f32 %v1462_v63, %v1444_v44  ;;  %v3697_v16 = vld [vmem:[#allocation4 + $0x30] sm:$0xff] }
 0x113   :  { %7070 = vst [vmem:[#allocation57_spill] sm:$0xff] %v4753_v40  ;;  %v1492_v45 = vrot.slane %v1480_v20, 2  ;;  %v4802_v2 = vmul.f32 %v3696_v62, %v3696_v62  ;;  %v4811_v42 = vmul.f32 0.21300554, %v4724_v15  ;;  %v4814_v26 = vmul.f32 0.21300554, %v4761_v4 }
 0x114   :  { %v4768_v22 = vpop.permute.xlu0 %598  ;;  %1288 = vrot.lane.b32.xlu1 %v4473_v1, %s3789_s10  ;;  %v2337_v1 = vrot.slane %v2311_v0, 5  ;;  %v2367_v0 = vrot.slane %v4745_v13, 6  ;;  %v2396_v62 = vrot.slane %v4719_v6, 7  ;;  %v4830_v13 = vmul.f32 %v3698_v38, %v3698_v38 }
 0x115   :  { %7071 = vst [vmem:[#allocation58_spill] sm:$0xff] %v4768_v22  ;;  %v1593_v6 = vrot.slane %v4814_v26, 4  ;;  %v4854_v38 = vmul.f32 0.0010283801, %v4698_v48 }
 0x116   :  { %1266 = vrot.lane.b32.xlu0 %v4521_v35, %s3788_s9  ;;  %v4780_v24 = vpop.permute.xlu1 %624  ;;  %v2338_v20 = vsel %vm263_vm2, %v2336_v10, %v2337_v1  ;;  %v1592_v10 = vrot.slane %v4811_v42, 4  ;;  %v4846_v1 = vmul.f32 0.007598758, %v4698_v48 }
 0x117   :  { %7072 = vst [vmem:[#allocation59_spill] sm:$0xff] %v4780_v24  ;;  %v2284_v24 = vsel %vm208_vm1, %v2282_v8, %v2283_v25  ;;  %v4816_v8 = vadd.f32 %v2420_v36, %v2414_v34  ;;  %v2366_v25 = vrot.slane %v4737_v39, 6  ;;  %v1620_v34 = vmul.f32 0.26601171, %v4724_v15 }
 0x118   :  { %v4796_v35 = vpop.permute.xlu0 %614  ;;  %1292 = vrot.lane.b32.xlu1 %v4479_v57, %s3789_s10  ;;  %v1539_v57 = vrot.slane %v4788_v54, 3  ;;  %v2302_v63 = vadd.f32 %v2284_v24, %v2248_v3  ;;  %v2397_v36 = vrot.slane %v4722_v49, 7  ;;  %v1504_v39 = vadd.f32 %v1492_v45, %v1474_v14  ;;  %v3699_v45 = vld [vmem:[#allocation4 + $0x38] sm:$0xff] }
 0x119   :  { %7073 = vst [vmem:[#allocation60_spill] sm:$0xff] %v4796_v35  ;;  %v1538_v35 = vrot.slane %v4785_v32, 3  ;;  %v1621_v15 = vmul.f32 0.26601171, %v4761_v4  ;;  %v2368_v49 = vsel %vm294_vm3, %v2366_v25, %v2367_v0  ;;  %v4843_v24 = vmul.f32 0.036000773, %v4698_v48 }
 0x11a   :  { %1270 = vrot.lane.b32.xlu0 %v4554_v61, %s3788_s9  ;;  %v4806_v56 = vpop.permute.xlu1 %640  ;;  %v4820_v61 = vmul.f32 %v3697_v16, %v3697_v16  ;;  %v1451_v16 = vmul.f32 0.007598758, %v4802_v2  ;;  %v1646_v14 = vrot.slane %v1620_v34, 5  ;;  %v1445_v0 = vmul.f32 0.0010283801, %v4802_v2 }
 0x11b   :  { %7074 = vst [vmem:[#allocation61_spill] sm:$0xff] %v4806_v56  ;;  %v4866_v48 = vmul.f32 0.10936069, %v4802_v2  ;;  %v2398_v34 = vsel %vm325_vm4, %v2396_v62, %v2397_v36 }
 0x11c   :  { %v4822_v44 = vpop.permute.xlu0 %618  ;;  %1296 = vrot.lane.b32.xlu1 %v4485_v18, %s3789_s10  ;;  %v1540_v18 = vsel %vm153_vm0, %v1538_v35, %v1539_v57  ;;  %v2356_v35 = vadd.f32 %v2338_v20, %v2302_v63  ;;  %v4856_v57 = vmul.f32 %v3699_v45, %v3699_v45  ;;  %v1647_v63 = vrot.slane %v1621_v15, 5 }
 0x11d   :  { %7075 = vst [vmem:[#allocation62_spill] sm:$0xff] %v4822_v44  ;;  %v1558_v25 = vadd.f32 %v1540_v18, %v1504_v39  ;;  %v1481_v44 = vmul.f32 0.036000773, %v4802_v2  ;;  %v4869_v20 = vmul.f32 0.10936069, %v4830_v13 }
 0x11e   :  { %1286 = vrot.lane.b32.xlu0 %v4476_v11, %s3789_s10  ;;  %v4835_v56 = vpop.permute.xlu1 %644  ;;  %v2141_v11 = vmul.f32 0.007598758, %v4820_v61  ;;  %v2135_v39 = vmul.f32 0.0010283801, %v4820_v61  ;;  %v2171_v18 = vmul.f32 0.036000773, %v4820_v61 }
 0x11f   :  { %7076 = vst [vmem:[#allocation63_spill] sm:$0xff] %v4835_v56  ;;  %v1463_v56 = vrot.slane %v1451_v16, 1  ;;  %v4883_v15 = vmul.f32 0.10936069, %v4856_v57 }
 0x120   :  { %v4849_v3 = vpop.permute.xlu0 %622  ;;  %1312 = vrot.lane.b32.xlu1 %v4419_v28, %s3790_s11  ;;  %v1594_v28 = vsel %vm208_vm1, %v1592_v10, %v1593_v6  ;;  %v2153_v16 = vrot.slane %v2141_v11, 1  ;;  %v1676_v10 = vrot.slane %v4811_v42, 6  ;;  %v4880_v6 = vmul.f32 0.10936069, %v4820_v61 }
 0x121   :  { %7077 = vst [vmem:[#allocation64_spill] sm:$0xff] %v4849_v3  ;;  %v1612_v62 = vadd.f32 %v1594_v28, %v1558_v25  ;;  %v1475_v36 = vadd.f32 %v1463_v56, %v1445_v0  ;;  %v4886_v11 = vmul.f32 0.21300554, %v4802_v2  ;;  %v1541_v42 = vrot.slane %v4866_v48, 3 }
 0x122   :  { %1290 = vrot.lane.b32.xlu0 %v4482_v58, %s3789_s10  ;;  %v4862_v3 = vpop.permute.xlu1 %648  ;;  %v2386_v58 = vadd.f32 %v2368_v49, %v2356_v35  ;;  %v1542_v49 = vrot.slane %v4869_v20, 3  ;;  %v4896_v35 = vmul.f32 0.21300554, %v4830_v13  ;;  %v1677_v56 = vrot.slane %v4814_v26, 6 }
 0x123   :  { %7078 = vst [vmem:[#allocation65_spill] sm:$0xff] %v4862_v3  ;;  %v1493_v3 = vrot.slane %v1481_v44, 2  ;;  %v2165_v44 = vadd.f32 %v2153_v16, %v2135_v39  ;;  %v2183_v25 = vrot.slane %v2171_v18, 2  ;;  %v4900_v0 = vmul.f32 0.21300554, %v4820_v61 }
 0x124   :  { %v4874_v45 = vpop.permute.xlu0 %638  ;;  %1316 = vrot.lane.b32.xlu1 %v4434_v17, %s3790_s11  ;;  %v1648_v17 = vsel %vm263_vm2, %v1646_v14, %v1647_v63  ;;  %v2231_v14 = vrot.slane %v4880_v6, 3  ;;  %v2232_v63 = vrot.slane %v4883_v15, 3  ;;  %v1706_v26 = vrot.slane %v4785_v32, 7 }
 0x125   :  { %7079 = vst [vmem:[#allocation66_spill] sm:$0xff] %v4874_v45  ;;  %v1666_v22 = vadd.f32 %v1648_v17, %v1612_v62  ;;  %v1505_v39 = vadd.f32 %v1493_v3, %v1475_v36  ;;  %v1595_v16 = vrot.slane %v4886_v11, 4  ;;  %v1678_v62 = vsel %vm294_vm3, %v1676_v10, %v1677_v56 }
 0x126   :  { %1294 = vrot.lane.b32.xlu0 %v4551_v7, %s3789_s10  ;;  %v4890_v45 = vpop.permute.xlu1 %664  ;;  %v2416_v7 = vadd.f32 %v2398_v34, %v2386_v58  ;;  %v1596_v34 = vrot.slane %v4896_v35, 4  ;;  %v1622_v58 = vmul.f32 0.26601171, %v4802_v2  ;;  %v1707_v32 = vrot.slane %v4788_v54, 7 }
 0x127   :  { %7080 = vst [vmem:[#allocation67_spill] sm:$0xff] %v4890_v45  ;;  %v4909_v45 = vmul.f32 0.21300554, %v4856_v57  ;;  %v2195_v3 = vadd.f32 %v2183_v25, %v2165_v44  ;;  %v2285_v36 = vrot.slane %v4900_v0, 4  ;;  %v2312_v2 = vmul.f32 0.26601171, %v4820_v61 }
 0x128   :  { %v4902_v28 = vpop.permute.xlu0 %642  ;;  %1320 = vrot.lane.b32.xlu1 %v4460_v19, %s3790_s11  ;;  %v1543_v19 = vsel %vm153_vm0, %v1541_v42, %v1542_v49  ;;  %v2313_v49 = vmul.f32 0.26601171, %v4856_v57  ;;  %v7084_v10 = vrot.slane %v4756_v23, 1  ;;  %v2428_v56 = vadd.f32 %v4843_v24, %v2416_v7 }
 0x129   :  { %7081 = vst [vmem:[#allocation68_spill] sm:$0xff] %v4902_v28  ;;  %v1623_v28 = vmul.f32 0.26601171, %v4830_v13  ;;  %v2286_v42 = vrot.slane %v4909_v45, 4  ;;  %v2446_v44 = vrot.slane %v4846_v1, 1  ;;  %v1559_v25 = vadd.f32 %v1543_v19, %v1505_v39 }
 0x12a   :  { %1310 = vrot.lane.b32.xlu0 %v4431_v37, %s3790_s11  ;;  %v4915_v18 = vpop.permute.xlu1 %668  ;;  %v2233_v37 = vsel %vm153_vm0, %v2231_v14, %v2232_v63  ;;  %v2457_v54 = vadd.f32 %v7084_v10, %v4790_v51  ;;  %v1696_v14 = vadd.f32 %v1678_v62, %v1666_v22  ;;  %v1597_v63 = vsel %vm208_vm1, %v1595_v16, %v1596_v34  ;;  %v7097_v10 = vld [vmem:[#allocation28_spill] sm:$0xff] }
 0x12b   :  { %7082 = vst [vmem:[#allocation69_spill] sm:$0xff] %v4915_v18  ;;  %v1649_v61 = vrot.slane %v1622_v58, 5  ;;  %v7086_v18 = vrot.slane %v4765_v59, 1  ;;  %v2474_v51 = vrot.slane %v4794_v46, 2  ;;  %v1708_v24 = vsel %vm325_vm4, %v1706_v26, %v1707_v32 }
 0x12c   :  { %v4924_v17 = vpop.permute.xlu0 %646  ;;  %1336 = vrot.lane.b32.xlu1 %v4391_v29, %s3791_s12  ;;  %v2249_v1 = vadd.f32 %v2233_v37, %v2195_v3  ;;  %v2287_v22 = vsel %vm208_vm1, %v2285_v36, %v2286_v42  ;;  %v2339_v39 = vrot.slane %v2312_v2, 5  ;;  %v2458_v16 = vadd.f32 %v2446_v44, %v2428_v56 }
 0x12d   :  { %7083 = vst [vmem:[#allocation70_spill] sm:$0xff] %v4924_v17  ;;  %v1650_v17 = vrot.slane %v1623_v28, 5  ;;  %v2456_v23 = vadd.f32 %v7086_v18, %v4816_v8  ;;  %v2340_v28 = vrot.slane %v2313_v49, 5  ;;  %v1732_v59 = vmul.f32 0.036000773, %v4761_v4 }
 0x12e   :  { %1314 = vrot.lane.b32.xlu0 %v4446_v47, %s3790_s11  ;;  %v4939_v29 = vpop.permute.xlu1 %672  ;;  %v2476_v47 = vrot.slane %v4854_v38, 2  ;;  %v1744_v8 = vmul.f32 0.007598758, %v4761_v4  ;;  %v1613_v46 = vadd.f32 %v1597_v63, %v1559_v25  ;;  %v1726_v18 = vadd.f32 %v1708_v24, %v1696_v14  ;;  %v7099_v25 = vld [vmem:[#allocation29_spill] sm:$0xff] }
 0x12f   :  { %7085 = vst [vmem:[#allocation71_spill] sm:$0xff] %v4939_v29  ;;  %v1679_v38 = vrot.slane %v4886_v11, 6  ;;  %v1680_v19 = vrot.slane %v4896_v35, 6  ;;  %v7089_v34 = vrot.slane %v4694_v12, 2  ;;  %v7091_v62 = vrot.slane %v4759_v50, 2  ;;  %v3707_v29 = vld [vmem:[#allocation4 + $0x58] sm:$0xff] }
 0x130   :  { %v4947_v7 = vpop.permute.xlu0 %662  ;;  %1340 = vrot.lane.b32.xlu1 %v4406_v60, %s3791_s12  ;;  %v1651_v60 = vsel %vm263_vm2, %v1649_v61, %v1650_v17  ;;  %v4971_v3 = vadd.f32 %v2474_v51, %v2456_v23  ;;  %v7095_v17 = vld [vmem:[#allocation33_spill] sm:$0xff]  ;;  %v2341_v11 = vsel %vm263_vm2, %v2339_v39, %v2340_v28  ;;  %v2369_v35 = vrot.slane %v4900_v0, 6  ;;  %v7101_v51 = vld [vmem:[#allocation11_spill] sm:$0xff] }
 0x131   :  { %7087 = vst [vmem:[#allocation72_spill] sm:$0xff] %v4947_v7  ;;  %v4965_v58 = vadd.f32 %v7089_v34, %v4730_v30  ;;  %v4969_v32 = vadd.f32 %v7091_v62, %v2457_v54  ;;  %v2370_v12 = vrot.slane %v4909_v45, 6  ;;  %v3700_v30 = vld [vmem:[#allocation2 + $0x40] sm:$0xff]  ;;  %v4982_v50 = vadd.f32 %v2476_v47, %v2458_v16  ;;  %v7106_v28 = vld [vmem:[#allocation31_spill] sm:$0xff] }
 0x132   :  { %1318 = vrot.lane.b32.xlu0 %v4534_v43, %s3790_s11  ;;  %v4957_v26 = vpop.permute.xlu1 %688  ;;  %7093 = vst [vmem:[#allocation76_spill] sm:$0xff] %v4971_v3  ;;  %v2303_v43 = vadd.f32 %v2287_v22, %v2249_v1  ;;  %v4980_v37 = vmul.f32 %v3700_v30, %v3700_v30  ;;  %v1756_v42 = vrot.slane %v1744_v8, 1  ;;  %v1774_v2 = vmul.f32 0.0010283801, %v4761_v4  ;;  %v3701_v22 = vld [vmem:[#allocation2 + $0x48] sm:$0xff] }
 0x133   :  { %7088 = vst [vmem:[#allocation73_spill] sm:$0xff] %v4957_v26  ;;  %7090 = vst [vmem:[#allocation74_spill] sm:$0xff] %v4965_v58  ;;  %v1667_v49 = vadd.f32 %v1651_v60, %v1613_v46  ;;  %v1738_v56 = vadd.f32 %v1732_v59, %v1726_v18  ;;  %v1681_v44 = vsel %vm294_vm3, %v1679_v38, %v1680_v19  ;;  %v1709_v0 = vrot.slane %v4866_v48, 7 }
 0x134   :  { %7092 = vst [vmem:[#allocation75_spill] sm:$0xff] %v4969_v32  ;;  %v4973_v36 = vpop.permute.xlu0 %666  ;;  %1344 = vrot.lane.b32.xlu1 %v7095_v17, %s3791_s12  ;;  %7096 = vst [vmem:[#allocation33_spill] sm:$0xff] %v4982_v50  ;;  %v1710_v45 = vrot.slane %v4869_v20, 7  ;;  %v4993_v14 = vmul.f32 0.0010283801, %v7099_v25  ;;  %v2357_v63 = vadd.f32 %v2341_v11, %v2303_v43  ;;  %v2399_v61 = vrot.slane %v4880_v6, 7 }
 0x135   :  { %7094 = vst [vmem:[#allocation77_spill] sm:$0xff] %v4973_v36  ;;  %v2400_v4 = vrot.slane %v4883_v15, 7  ;;  %v5002_v24 = vmul.f32 0.007598758, %v4716_v33  ;;  %v5005_v48 = vmul.f32 0.007598758, %v4965_v58  ;;  %v2371_v20 = vsel %vm294_vm3, %v2369_v35, %v2370_v12 }
 0x136   :  { %1334 = vrot.lane.b32.xlu0 %v7097_v10, %s3791_s12  ;;  %v4987_v54 = vpop.permute.xlu1 %692  ;;  %v1452_v1 = vmul.f32 0.007598758, %v4980_v37  ;;  %v5010_v47 = vmul.f32 0.007598758, %v4969_v32  ;;  %v5013_v6 = vmul.f32 0.007598758, %v4971_v3  ;;  %v1697_v15 = vadd.f32 %v1681_v44, %v1667_v49 }
 0x137   :  { %7098 = vst [vmem:[#allocation28_spill] sm:$0xff] %v4987_v54  ;;  %7102 = vst [vmem:[#allocation11_spill] sm:$0xff] %v5002_v24  ;;  %v5015_v39 = vmul.f32 %v3701_v22, %v3701_v22  ;;  %v5022_v59 = vmul.f32 0.007598758, %v4982_v50  ;;  %v1768_v8 = vadd.f32 %v1756_v42, %v1738_v56  ;;  %v1786_v46 = vrot.slane %v1774_v2, 2  ;;  %v7110_v43 = vld [vmem:[#allocation9_spill] sm:$0xff] }
 0x138   :  { %v4997_v23 = vpop.permute.xlu0 %670  ;;  %1360 = vrot.lane.b32.xlu1 %v7101_v51, %s3792_s13  ;;  %7103 = vst [vmem:[#allocation78_spill] sm:$0xff] %v5005_v48  ;;  %7104 = vst [vmem:[#allocation79_spill] sm:$0xff] %v5010_v47  ;;  %v1711_v18 = vsel %vm325_vm4, %v1709_v0, %v1710_v45  ;;  %v1745_v60 = vmul.f32 0.007598758, %v4830_v13  ;;  %v5027_v38 = vmul.f32 0.0010283801, %v4830_v13  ;;  %v2387_v19 = vadd.f32 %v2371_v20, %v2357_v63 }
 0x139   :  { %7100 = vst [vmem:[#allocation29_spill] sm:$0xff] %v4997_v23  ;;  %7105 = vst [vmem:[#allocation80_spill] sm:$0xff] %v5013_v6  ;;  %v2401_v34 = vsel %vm325_vm4, %v2399_v61, %v2400_v4  ;;  %v1446_v17 = vmul.f32 0.0010283801, %v4980_v37  ;;  %v1464_v11 = vrot.slane %v1452_v1, 1  ;;  %v3702_v12 = vld [vmem:[#allocation4 + $0x40] sm:$0xff]  ;;  %v1727_v42 = vadd.f32 %v1711_v18, %v1697_v15 }
 0x13a   :  { %1338 = vrot.lane.b32.xlu0 %v7106_v28, %s3791_s12  ;;  %v5019_v16 = vpop.permute.xlu1 %696  ;;  %7108 = vst [vmem:[#allocation81_spill] sm:$0xff] %v5022_v59  ;;  %v1482_v35 = vmul.f32 0.036000773, %v4980_v37  ;;  %v5036_v30 = vmul.f32 %v3702_v12, %v3702_v12  ;;  %v1733_v2 = vmul.f32 0.036000773, %v4830_v13  ;;  %v7111_v56 = vld [vmem:[#allocation14_spill] sm:$0xff]  ;;  %v5049_v0 = vadd.f32 %v1786_v46, %v1768_v8 }
 0x13b   :  { %7107 = vst [vmem:[#allocation31_spill] sm:$0xff] %v5019_v16  ;;  %v5040_v49 = vmul.f32 0.10936069, %v4980_v37  ;;  %v5043_v10 = vmul.f32 0.10936069, %v5015_v39  ;;  %v1757_v63 = vrot.slane %v1745_v60, 1  ;;  %v2417_v61 = vadd.f32 %v2401_v34, %v2387_v19 }
 0x13c   :  { %v5030_v62 = vpop.permute.xlu0 %686  ;;  %1364 = vrot.lane.b32.xlu1 %v7110_v43, %s3792_s13  ;;  %7113 = vst [vmem:[#allocation14_spill] sm:$0xff] %v5049_v0  ;;  %v5052_v45 = vmul.f32 0.036000773, %v4965_v58  ;;  %v5055_v25 = vmul.f32 0.21300554, %v4980_v37  ;;  %v7116_v1 = vld [vmem:[#allocation10_spill] sm:$0xff]  ;;  %v1476_v22 = vadd.f32 %v1464_v11, %v1446_v17  ;;  %v1739_v46 = vadd.f32 %v1733_v2, %v1727_v42 }
 0x13d   :  { %7109 = vst [vmem:[#allocation82_spill] sm:$0xff] %v5030_v62  ;;  %v5058_v13 = vmul.f32 0.21300554, %v5015_v39  ;;  %v2423_v4 = vmul.f32 0.036000773, %v4856_v57  ;;  %v1494_v28 = vrot.slane %v1482_v35, 2  ;;  %v5161_v40 = vmul.f32 %v3707_v29, %v3707_v29 }
 0x13e   :  { %1342 = vrot.lane.b32.xlu0 %v7111_v56, %s3791_s12  ;;  %v5047_v44 = vpop.permute.xlu1 %718  ;;  %7114 = vst [vmem:[#allocation83_spill] sm:$0xff] %v5052_v45  ;;  %v2435_v51 = vmul.f32 0.007598758, %v4856_v57  ;;  %v2142_v8 = vmul.f32 0.007598758, %v5036_v30  ;;  %v1544_v18 = vrot.slane %v5040_v49, 3  ;;  %v5089_v62 = vadd.f32 %v1757_v63, %v1739_v46 }
 0x13f   :  { %7112 = vst [vmem:[#allocation9_spill] sm:$0xff] %v5047_v44  ;;  %v1545_v60 = vrot.slane %v5043_v10, 3  ;;  %v3703_v19 = vld [vmem:[#allocation4 + $0x48] sm:$0xff]  ;;  %v7117_v43 = vld [vmem:[#allocation24_spill] sm:$0xff]  ;;  %v2465_v56 = vmul.f32 0.0010283801, %v4856_v57  ;;  %v2429_v2 = vadd.f32 %v2423_v4, %v2417_v61 }
 0x140   :  { %v5062_v20 = vpop.permute.xlu0 %690  ;;  %1368 = vrot.lane.b32.xlu1 %v7116_v1, %s3792_s13  ;;  %v5070_v34 = vmul.f32 %v3703_v19, %v3703_v19  ;;  %v1598_v17 = vrot.slane %v5055_v25, 4  ;;  %v1599_v11 = vrot.slane %v5058_v13, 4  ;;  %v3704_v35 = vld [vmem:[#allocation2 + $0x50] sm:$0xff]  ;;  %v2447_v1 = vrot.slane %v2435_v51, 1  ;;  %v7121_v51 = vld [vmem:[#allocation27_spill] sm:$0xff]  ;;  %v7124_v54 = vld [vmem:[#allocation45_spill] sm:$0xff] }
 0x141   :  { %7115 = vst [vmem:[#allocation84_spill] sm:$0xff] %v5062_v20  ;;  %v5079_v42 = vmul.f32 %v3704_v35, %v3704_v35  ;;  %v1624_v15 = vmul.f32 0.26601171, %v4980_v37  ;;  %v1625_v19 = vmul.f32 0.26601171, %v5015_v39  ;;  %v2154_v20 = vrot.slane %v2142_v8, 1 }
 0x142   :  { %1358 = vrot.lane.b32.xlu0 %v7117_v43, %s3792_s13  ;;  %v5074_v12 = vpop.permute.xlu1 %722  ;;  %v7120_v43 = vld [vmem:[#allocation16_spill] sm:$0xff]  ;;  %v2136_v57 = vmul.f32 0.0010283801, %v5036_v30  ;;  %v2172_v23 = vmul.f32 0.036000773, %v5036_v30  ;;  %v1546_v61 = vsel %vm153_vm0, %v1544_v18, %v1545_v60  ;;  %v2459_v46 = vadd.f32 %v2447_v1, %v2429_v2  ;;  %v7125_v1 = vld [vmem:[#allocation34_spill] sm:$0xff] }
 0x143   :  { %7118 = vst [vmem:[#allocation10_spill] sm:$0xff] %v5074_v12  ;;  %v1506_v12 = vadd.f32 %v1494_v28, %v1476_v22  ;;  %v5093_v4 = vmul.f32 0.10936069, %v5036_v30  ;;  %v5096_v37 = vmul.f32 0.10936069, %v5070_v34  ;;  %v2477_v22 = vrot.slane %v2465_v56, 2 }
 0x144   :  { %v5083_v44 = vpop.permute.xlu0 %694  ;;  %1390 = vrot.lane.b32.xlu1 %v7120_v43, %s3793_s14  ;;  %v1600_v28 = vsel %vm208_vm1, %v1598_v17, %v1599_v11  ;;  %v1453_v63 = vmul.f32 0.007598758, %v5079_v42  ;;  %v1652_v18 = vrot.slane %v1624_v15, 5  ;;  %v1653_v60 = vrot.slane %v1625_v19, 5  ;;  %v3705_v43 = vld [vmem:[#allocation2 + $0x58] sm:$0xff]  ;;  %v7132_v29 = vld [vmem:[#allocation48_spill] sm:$0xff] }
 0x145   :  { %7119 = vst [vmem:[#allocation24_spill] sm:$0xff] %v5083_v44  ;;  %v5105_v44 = vmul.f32 %v3705_v43, %v3705_v43  ;;  %v2184_v17 = vrot.slane %v2172_v23, 2  ;;  %v2234_v11 = vrot.slane %v5093_v4, 3  ;;  %v2235_v8 = vrot.slane %v5096_v37, 3 }
 0x146   :  { %1362 = vrot.lane.b32.xlu0 %v7121_v51, %s3792_s13  ;;  %v5100_v35 = vpop.permute.xlu1 %726  ;;  %v1560_v51 = vadd.f32 %v1546_v61, %v1506_v12  ;;  %v5115_v15 = vmul.f32 0.21300554, %v5036_v30  ;;  %v5118_v2 = vmul.f32 0.21300554, %v5070_v34  ;;  %v1447_v12 = vmul.f32 0.0010283801, %v5079_v42 }
 0x147   :  { %7122 = vst [vmem:[#allocation27_spill] sm:$0xff] %v5100_v35  ;;  %v2166_v35 = vadd.f32 %v2154_v20, %v2136_v57  ;;  %v1465_v43 = vrot.slane %v1453_v63, 1  ;;  %v1483_v23 = vmul.f32 0.036000773, %v5079_v42  ;;  %v3706_v20 = vld [vmem:[#allocation4 + $0x50] sm:$0xff]  ;;  %v5140_v63 = vadd.f32 %v2477_v22, %v2459_v46 }
 0x148   :  { %v5107_v16 = vpop.permute.xlu0 %716  ;;  %1394 = vrot.lane.b32.xlu1 %v7124_v54, %s3793_s14  ;;  %v5126_v57 = vmul.f32 %v3706_v20, %v3706_v20  ;;  %v5131_v54 = vmul.f32 0.10936069, %v5079_v42  ;;  %v2314_v20 = vmul.f32 0.26601171, %v5036_v30  ;;  %v2315_v61 = vmul.f32 0.26601171, %v5070_v34 }
 0x149   :  { %7123 = vst [vmem:[#allocation85_spill] sm:$0xff] %v5107_v16  ;;  %v5134_v16 = vmul.f32 0.10936069, %v5105_v44  ;;  %7128 = vst [vmem:[#allocation87_spill] sm:$0xff] %v5140_v63  ;;  %v2236_v56 = vsel %vm153_vm0, %v2234_v11, %v2235_v8  ;;  %v2288_v36 = vrot.slane %v5115_v15, 4  ;;  %v2289_v26 = vrot.slane %v5118_v2, 4 }
 0x14a   :  { %1366 = vrot.lane.b32.xlu0 %v7125_v1, %s3792_s13  ;;  %v5122_v19 = vpop.permute.xlu1 %1120  ;;  %v5148_v7 = vmul.f32 0.21300554, %v5079_v42  ;;  %v1477_v22 = vadd.f32 %v1465_v43, %v1447_v12  ;;  %v1495_v30 = vrot.slane %v1483_v23, 2  ;;  %v2143_v46 = vmul.f32 0.007598758, %v5126_v57 }
 0x14b   :  { %7126 = vst [vmem:[#allocation34_spill] sm:$0xff] %v5122_v19  ;;  %v2196_v19 = vadd.f32 %v2184_v17, %v2166_v35  ;;  %v1654_v35 = vsel %vm263_vm2, %v1652_v18, %v1653_v60  ;;  %v1547_v8 = vrot.slane %v5131_v54, 3  ;;  %v1548_v17 = vrot.slane %v5134_v16, 3 }
 0x14c   :  { %v5136_v1 = vpop.permute.xlu0 %720  ;;  %1398 = vrot.lane.b32.xlu1 %v4676_v5, %s3793_s14  ;;  %v5159_v11 = vmul.f32 0.21300554, %v5105_v44  ;;  %v1614_v18 = vadd.f32 %v1600_v28, %v1560_v51  ;;  %v2342_v12 = vrot.slane %v2314_v20, 5  ;;  %v2343_v43 = vrot.slane %v2315_v61, 5 }
 0x14d   :  { %7127 = vst [vmem:[#allocation86_spill] sm:$0xff] %v5136_v1  ;;  %v7129_v1 = vld [vmem:[#allocation42_spill] sm:$0xff]  ;;  %v2250_v60 = vadd.f32 %v2236_v56, %v2196_v19  ;;  %v2290_v23 = vsel %vm208_vm1, %v2288_v36, %v2289_v26  ;;  %v1627_v52 = vmul.f32 0.26601171, %v5105_v44  ;;  %v2155_v28 = vrot.slane %v2143_v46, 1 }
 0x14e   :  { %1388 = vrot.lane.b32.xlu0 %v7129_v1, %s3793_s14  ;;  %v5152_v5 = vpop.permute.xlu1 %1124  ;;  %v1601_v1 = vrot.slane %v5148_v7, 4  ;;  %v2173_v51 = vmul.f32 0.036000773, %v5126_v57  ;;  %v1549_v56 = vsel %vm153_vm0, %v1547_v8, %v1548_v17  ;;  %v1602_v26 = vrot.slane %v5159_v11, 4 }
 0x14f   :  { %7130 = vst [vmem:[#allocation88_spill] sm:$0xff] %v5152_v5  ;;  %v1626_v5 = vmul.f32 0.26601171, %v5079_v42  ;;  %v5180_v36 = vmul.f32 0.10936069, %v5126_v57  ;;  %v1668_v61 = vadd.f32 %v1654_v35, %v1614_v18  ;;  %v7134_v20 = vrot.slane %v5058_v13, 6 }
 0x150   :  { %v5163_v31 = vpop.permute.xlu0 %724  ;;  %1822 = vrot.lane.b32.xlu1 %v5002_v24, %s3784_s1  ;;  %v2137_v24 = vmul.f32 0.0010283801, %v5126_v57  ;;  %v5183_v42 = vmul.f32 0.10936069, %v5161_v40  ;;  %v2372_v46 = vrot.slane %v5115_v15, 6  ;;  %v2373_v8 = vrot.slane %v5118_v2, 6 }
 0x151   :  { %7131 = vst [vmem:[#allocation89_spill] sm:$0xff] %v5163_v31  ;;  %v1507_v31 = vadd.f32 %v1495_v30, %v1477_v22  ;;  %v7135_v22 = vrot.slane %v5055_v25, 6  ;;  %v2304_v17 = vadd.f32 %v2290_v23, %v2250_v60  ;;  %v1656_v9 = vrot.slane %v1627_v52, 5 }
 0x152   :  { %1392 = vrot.lane.b32.xlu0 %v7132_v29, %s3793_s14  ;;  %v5173_v21 = vpop.permute.xlu1 %1128  ;;  %v2344_v29 = vsel %vm263_vm2, %v2342_v12, %v2343_v43  ;;  %v2167_v13 = vadd.f32 %v2155_v28, %v2137_v24  ;;  %v2185_v18 = vrot.slane %v2173_v51, 2  ;;  %v5202_v25 = vmul.f32 0.21300554, %v5126_v57 }
 0x153   :  { %7133 = vst [vmem:[#allocation90_spill] sm:$0xff] %v5173_v21  ;;  %v1684_v30 = vsel %vm294_vm3, %v7135_v22, %v7134_v20  ;;  %v1655_v21 = vrot.slane %v1626_v5, 5  ;;  %v1561_v35 = vadd.f32 %v1549_v56, %v1507_v31  ;;  %v1603_v15 = vsel %vm208_vm1, %v1601_v1, %v1602_v26 }
 0x154   :  { %v5185_v19 = vpop.permute.xlu0 %1118  ;;  %2512 = vrot.lane.b32.xlu1 %v5010_v47, %s3784_s1  ;;  %v2237_v2 = vrot.slane %v5180_v36, 3  ;;  %v2238_v60 = vrot.slane %v5183_v42, 3  ;;  %v5208_v5 = vmul.f32 0.21300554, %v5161_v40  ;;  %v1698_v31 = vadd.f32 %v1684_v30, %v1668_v61 }
 0x155   :  { %v7136_v24 = vrot.slane %v5043_v10, 7  ;;  %v7137_v12 = vrot.slane %v5040_v49, 7  ;;  %v2402_v1 = vrot.slane %v5093_v4, 7  ;;  %v2403_v23 = vrot.slane %v5096_v37, 7 }
 0x156   :  { %1396 = vrot.lane.b32.xlu0 %v4993_v14, %s3793_s14  ;;  %v5199_v47 = vpop.permute.xlu1 %1156  ;;  %v2358_v28 = vadd.f32 %v2344_v29, %v2304_v17  ;;  %v2374_v51 = vsel %vm294_vm3, %v2372_v46, %v2373_v8  ;;  %v1685_v56 = vrot.slane %v5148_v7, 6  ;;  %v1686_v26 = vrot.slane %v5159_v11, 6 }
 0x157   :  { %v1714_v43 = vsel %vm325_vm4, %v7137_v12, %v7136_v24  ;;  %v1615_v10 = vadd.f32 %v1603_v15, %v1561_v35  ;;  %v1657_v49 = vsel %vm263_vm2, %v1655_v21, %v1656_v9  ;;  %v2197_v20 = vadd.f32 %v2185_v18, %v2167_v13 }
 0x158   :  { %v5210_v52 = vpop.permute.xlu0 %1122  ;;  %2514 = vrot.lane.b32.xlu1 %v5022_v59, %s3784_s1  ;;  %v2291_v4 = vrot.slane %v5202_v25, 4  ;;  %v2239_v37 = vsel %vm153_vm0, %v2237_v2, %v2238_v60  ;;  %v2292_v29 = vrot.slane %v5208_v5, 4  ;;  %v2316_v22 = vmul.f32 0.26601171, %v5126_v57  ;;  %v7167_v59 = vld [vmem:[#allocation23_spill] sm:$0xff] }
 0x159   :  { %v2317_v7 = vmul.f32 0.26601171, %v5161_v40  ;;  %v5237_v30 = vmul.f32 0.007598758, %v5049_v0  ;;  %v7139_v21 = vrot.slane %v5027_v38, 2  ;;  %v1728_v8 = vadd.f32 %v1714_v43, %v1698_v31 }
 0x15a   :  { %1820 = vrot.lane.b32.xlu0 %v5005_v48, %s3784_s1  ;;  %v5226_v61 = vpop.permute.xlu1 %1160  ;;  %v5247_v46 = vmul.f32 0.007598758, %v5140_v63  ;;  %v1746_v57 = vmul.f32 0.007598758, %v5015_v39  ;;  %v1734_v17 = vmul.f32 0.036000773, %v5015_v39  ;;  %v2388_v35 = vadd.f32 %v2374_v51, %v2358_v28 }
 0x15b   :  { %7138 = vst [vmem:[#allocation91_spill] sm:$0xff] %v5237_v30  ;;  %v5244_v9 = vadd.f32 %v7139_v21, %v5089_v62  ;;  %v2404_v13 = vsel %vm325_vm4, %v2402_v1, %v2403_v23  ;;  %v1669_v15 = vadd.f32 %v1657_v49, %v1615_v10  ;;  %v1687_v38 = vsel %vm294_vm3, %v1685_v56, %v1686_v26  ;;  %v7169_v48 = vld [vmem:[#allocation22_spill] sm:$0xff] }
 0x15c   :  { %v5234_v11 = vpop.permute.xlu0 %1126  ;;  %1856 = vrot.lane.b32.xlu1 %v5052_v45, %s3785_s6  ;;  %7141 = vst [vmem:[#allocation93_spill] sm:$0xff] %v5247_v46  ;;  %v1715_v62 = vrot.slane %v5131_v54, 7  ;;  %v2251_v2 = vadd.f32 %v2239_v37, %v2197_v20  ;;  %v1716_v60 = vrot.slane %v5134_v16, 7  ;;  %v2293_v31 = vsel %vm208_vm1, %v2291_v4, %v2292_v29 }
 0x15d   :  { %7140 = vst [vmem:[#allocation92_spill] sm:$0xff] %v5244_v9  ;;  %v2345_v24 = vrot.slane %v2316_v22, 5  ;;  %v2346_v12 = vrot.slane %v2317_v7, 5  ;;  %v5265_v1 = vmul.f32 0.036000773, %v4969_v32  ;;  %v1758_v23 = vrot.slane %v1746_v57, 1 }
 0x15e   :  { %2510 = vrot.lane.b32.xlu0 %v5013_v6, %s3784_s1  ;;  %v5254_v18 = vpop.permute.xlu1 %1164  ;;  %v1776_v28 = vmul.f32 0.0010283801, %v5015_v39  ;;  %v1740_v51 = vadd.f32 %v1734_v17, %v1728_v8  ;;  %v2418_v54 = vadd.f32 %v2404_v13, %v2388_v35  ;;  %v2424_v56 = vmul.f32 0.036000773, %v5070_v34 }
 0x15f   :  { %7142 = vst [vmem:[#allocation94_spill] sm:$0xff] %v5265_v1  ;;  %v2436_v16 = vmul.f32 0.007598758, %v5070_v34  ;;  %v5273_v26 = vmul.f32 0.007598758, %v5244_v9  ;;  %v1699_v49 = vadd.f32 %v1687_v38, %v1669_v15  ;;  %v2305_v20 = vadd.f32 %v2293_v31, %v2251_v2 }
 0x160   :  { %v5260_v43 = vpop.permute.xlu0 %1154  ;;  %2516 = vrot.lane.b32.xlu1 %v5247_v46, %s3784_s1  ;;  %v1717_v4 = vsel %vm325_vm4, %v1715_v62, %v1716_v60  ;;  %v2347_v39 = vsel %vm263_vm2, %v2345_v24, %v2346_v12  ;;  %v2375_v37 = vrot.slane %v5202_v25, 6  ;;  %v2376_v29 = vrot.slane %v5208_v5, 6  ;;  %v7164_v46 = vld [vmem:[#allocation18_spill] sm:$0xff] }
 0x161   :  { %7143 = vst [vmem:[#allocation95_spill] sm:$0xff] %v5273_v26  ;;  %v5284_v7 = vmul.f32 0.036000773, %v4716_v33  ;;  %v5289_v21 = vmul.f32 0.036000773, %v5049_v0  ;;  %v1788_v57 = vrot.slane %v1776_v28, 2  ;;  %v1770_v8 = vadd.f32 %v1758_v23, %v1740_v51 }
 0x162   :  { %1824 = vrot.lane.b32.xlu0 %v5237_v30, %s3784_s1  ;;  %v5275_v10 = vpop.permute.xlu1 %1192  ;;  %v2430_v17 = vadd.f32 %v2424_v56, %v2418_v54  ;;  %v2448_v35 = vrot.slane %v2436_v16, 1  ;;  %v2466_v13 = vmul.f32 0.0010283801, %v5070_v34  ;;  %v1729_v5 = vadd.f32 %v1717_v4, %v1699_v49  ;;  %v7168_v30 = vld [vmem:[#allocation21_spill] sm:$0xff] }
 0x163   :  { %7144 = vst [vmem:[#allocation96_spill] sm:$0xff] %v5284_v7  ;;  %7145 = vst [vmem:[#allocation97_spill] sm:$0xff] %v5289_v21  ;;  %v1735_v15 = vmul.f32 0.036000773, %v5105_v44  ;;  %v1747_v38 = vmul.f32 0.007598758, %v5105_v44  ;;  %v2359_v62 = vadd.f32 %v2347_v39, %v2305_v20  ;;  %v2377_v2 = vsel %vm294_vm3, %v2375_v37, %v2376_v29 }
 0x164   :  { %v5281_v22 = vpop.permute.xlu0 %1158  ;;  %2548 = vrot.lane.b32.xlu1 %v5265_v1, %s3785_s6  ;;  %v2405_v60 = vrot.slane %v5180_v36, 7  ;;  %v2406_v31 = vrot.slane %v5183_v42, 7  ;;  %v5306_v34 = vmul.f32 0.036000773, %v4982_v50  ;;  %v5308_v12 = vadd.f32 %v1788_v57, %v1770_v8 }
 0x165   :  { %v2460_v23 = vadd.f32 %v2448_v35, %v2430_v17  ;;  %v2478_v28 = vrot.slane %v2466_v13, 2  ;;  %v1777_v51 = vmul.f32 0.0010283801, %v5105_v44  ;;  %v5314_v36 = vmul.f32 0.036000773, %v4971_v3 }
 0x166   :  { %1826 = vrot.lane.b32.xlu0 %v5273_v26, %s3784_s1  ;;  %v5294_v25 = vpop.permute.xlu1 %1196  ;;  %7146 = vst [vmem:[#allocation98_spill] sm:$0xff] %v5306_v34  ;;  %v1741_v54 = vadd.f32 %v1735_v15, %v1729_v5  ;;  %v1759_v56 = vrot.slane %v1747_v38, 1  ;;  %v2389_v16 = vadd.f32 %v2377_v2, %v2359_v62  ;;  %v2407_v49 = vsel %vm325_vm4, %v2405_v60, %v2406_v31  ;;  %v7165_v26 = vld [vmem:[#allocation8_spill] sm:$0xff] }
 0x167   :  { %7147 = vst [vmem:[#allocation99_spill] sm:$0xff] %v5314_v36  ;;  %v5324_v44 = vmul.f32 0.036000773, %v5244_v9  ;;  %v5327_v4 = vmul.f32 0.007598758, %v5308_v12  ;;  %v5329_v39 = vadd.f32 %v2478_v28, %v2460_v23  ;;  %v1789_v37 = vrot.slane %v1777_v51, 2 }
 0x168   :  { %v5301_v24 = vpop.permute.xlu0 %1162  ;;  %1860 = vrot.lane.b32.xlu1 %v5289_v21, %s3785_s6  ;;  %v1771_v57 = vadd.f32 %v1759_v56, %v1741_v54  ;;  %v2419_v8 = vadd.f32 %v2407_v49, %v2389_v16  ;;  %v2425_v17 = vmul.f32 0.036000773, %v5161_v40  ;;  %v2437_v35 = vmul.f32 0.007598758, %v5161_v40  ;;  %v7176_v21 = vld [vmem:[#allocation36_spill] sm:$0xff] }
 0x169   :  { %7148 = vst [vmem:[#allocation100_spill] sm:$0xff] %v5324_v44  ;;  %7149 = vst [vmem:[#allocation101_spill] sm:$0xff] %v5327_v4  ;;  %v5342_v5 = vmul.f32 0.10936069, %v4716_v33  ;;  %v5345_v15 = vmul.f32 0.007598758, %v5329_v39 }
 0x16a   :  { %1858 = vrot.lane.b32.xlu0 %v5284_v7, %s3785_s6  ;;  %v5316_v42 = vpop.permute.xlu1 %1200  ;;  %7150 = vst [vmem:[#allocation102_spill] sm:$0xff] %v5329_v39  ;;  %v5349_v38 = vadd.f32 %v1789_v37, %v1771_v57  ;;  %v2431_v2 = vadd.f32 %v2425_v17, %v2419_v8  ;;  %v2449_v60 = vrot.slane %v2437_v35, 1  ;;  %v2467_v31 = vmul.f32 0.0010283801, %v5161_v40  ;;  %v7158_v17 = vld [vmem:[#allocation19_spill] sm:$0xff]  ;;  %v7159_v35 = vld [vmem:[#allocation13_spill] sm:$0xff] }
 0x16b   :  { %7151 = vst [vmem:[#allocation103_spill] sm:$0xff] %v5342_v5  ;;  %7152 = vst [vmem:[#allocation104_spill] sm:$0xff] %v5345_v15  ;;  %v5359_v28 = vmul.f32 0.036000773, %v5140_v63  ;;  %v5373_v40 = vmul.f32 0.10936069, %v4969_v32 }
 0x16c   :  { %v5319_v20 = vpop.permute.xlu0 %1190  ;;  %2550 = vrot.lane.b32.xlu1 %v5306_v34, %s3785_s6  ;;  %7153 = vst [vmem:[#allocation105_spill] sm:$0xff] %v5349_v38  ;;  %v5364_v51 = vmul.f32 0.007598758, %v5349_v38  ;;  %v2461_v56 = vadd.f32 %v2449_v60, %v2431_v2  ;;  %v2479_v16 = vrot.slane %v2467_v31, 2  ;;  %v5378_v37 = vmul.f32 0.10936069, %v4965_v58 }
 0x16d   :  { %7154 = vst [vmem:[#allocation106_spill] sm:$0xff] %v5359_v28  ;;  %7156 = vst [vmem:[#allocation108_spill] sm:$0xff] %v5373_v40  ;;  %v467_v2 = vadd.f32 %v7159_v35, %v7158_v17  ;;  %v7160_v60 = vld [vmem:[#allocation17_spill] sm:$0xff]  ;;  %v466_v17 = vadd.f32 %v7169_v48, %v7168_v30  ;;  %v7170_v35 = vld [vmem:[#allocation26_spill] sm:$0xff]  ;;  %v5422_v7 = vmul.f32 0.10936069, %v4982_v50 }
 0x16e   :  { %2546 = vrot.lane.b32.xlu0 %v5314_v36, %s3785_s6  ;;  %v5333_v29 = vpop.permute.xlu1 %1228  ;;  %7155 = vst [vmem:[#allocation107_spill] sm:$0xff] %v5364_v51  ;;  %7157 = vst [vmem:[#allocation109_spill] sm:$0xff] %v5378_v37  ;;  %v5380_v57 = vadd.f32 %v2479_v16, %v2461_v56  ;;  %v7161_v31 = vld [vmem:[#allocation25_spill] sm:$0xff]  ;;  %v464_v56 = vadd.f32 %v7165_v26, %v7164_v46  ;;  %v7166_v16 = vld [vmem:[#allocation20_spill] sm:$0xff] }
 0x16f   :  { %v469_v6 = vadd.f32 %v7167_v59, %v7166_v16  ;;  %v7174_v36 = vld [vmem:[#allocation12_spill] sm:$0xff]  ;;  %v7177_v16 = vld [vmem:[#allocation35_spill] sm:$0xff]  ;;  %v7178_v48 = vld [vmem:[#allocation38_spill] sm:$0xff]  ;;  %7182 = vst [vmem:[#allocation8_spill] sm:$0xff] %v5422_v7 }
 0x170   :  { %v5337_v13 = vpop.permute.xlu0 %1194  ;;  %1862 = vrot.lane.b32.xlu1 %v5324_v44, %s3785_s6  ;;  %v5406_v44 = vmul.f32 0.007598758, %v5380_v57  ;;  %v7175_v46 = vld [vmem:[#allocation32_spill] sm:$0xff]  ;;  %v500_v59 = vadd.f32 %v7176_v21, %v464_v56  ;;  %v502_v30 = vadd.f32 %v7178_v48, %v466_v17  ;;  %v7185_v56 = vld [vmem:[#allocation41_spill] sm:$0xff]  ;;  %v7187_v48 = vld [vmem:[#allocation43_spill] sm:$0xff] }
 0x171   :  { %v468_v26 = vadd.f32 %v7175_v46, %v7174_v36  ;;  %v505_v45 = vadd.f32 %v7177_v16, %v469_v6  ;;  %v7184_v46 = vld [vmem:[#allocation15_spill] sm:$0xff]  ;;  %v7186_v16 = vld [vmem:[#allocation44_spill] sm:$0xff] }
 0x172   :  { %1828 = vrot.lane.b32.xlu0 %v5327_v4, %s3784_s1  ;;  %v5351_v62 = vpop.permute.xlu1 %1232  ;;  %7172 = vst [vmem:[#allocation17_spill] sm:$0xff] %v5406_v44  ;;  %v536_v21 = vadd.f32 %v7184_v46, %v500_v59  ;;  %v538_v17 = vadd.f32 %v7186_v16, %v502_v30  ;;  %v7193_v46 = vld [vmem:[#allocation49_spill] sm:$0xff]  ;;  %v3709_v30 = vld [vmem:[#allocation4 + $0x10] sm:$0xff] }
 0x173   :  { %v541_v6 = vadd.f32 %v7185_v56, %v505_v45  ;;  %v3708_v56 = vld [vmem:[#allocation2 + $0x10] sm:$0xff] }
 0x174   :  { %v5354_v23 = vpop.permute.xlu0 %1198  ;;  %1894 = vrot.lane.b32.xlu1 %v5342_v5, %s3786_s7  ;;  %v5440_v16 = vmul.f32 %v3709_v30, %v3708_v56  ;;  %v7198_v56 = vld [vmem:[#allocation56_spill] sm:$0xff] }
 0x175   :  { %v577_v45 = vadd.f32 %v7193_v46, %v541_v6 }
 0x176   :  { %2518 = vrot.lane.b32.xlu0 %v5345_v15, %s3784_s1  ;;  %v5366_v54 = vpop.permute.xlu1 %1236  ;;  %v465_v15 = vadd.f32 %v7161_v31, %v7160_v60  ;;  %v7171_v60 = vld [vmem:[#allocation30_spill] sm:$0xff] }
 0x177   :  { %v503_v31 = vadd.f32 %v7171_v60, %v467_v2  ;;  %v7180_v2 = vld [vmem:[#allocation39_spill] sm:$0xff] }
 0x178   :  { %v5368_v49 = vpop.permute.xlu0 %1226  ;;  %2552 = vrot.lane.b32.xlu1 %v5359_v28, %s3785_s6  ;;  %v501_v28 = vadd.f32 %v7170_v35, %v465_v15  ;;  %v7179_v15 = vld [vmem:[#allocation37_spill] sm:$0xff] }
 0x179   :  { %v539_v60 = vadd.f32 %v7180_v2, %v503_v31  ;;  %v5433_v2 = vmul.f32 0.10936069, %v4971_v3 }
 0x17a   :  { %1830 = vrot.lane.b32.xlu0 %v5364_v51, %s3784_s1  ;;  %v5382_v8 = vpop.permute.xlu1 %1264  ;;  %v5393_v51 = vmul.f32 0.10936069, %v5049_v0  ;;  %v537_v35 = vadd.f32 %v7179_v15, %v501_v28  ;;  %v7188_v15 = vld [vmem:[#allocation46_spill] sm:$0xff] }
 0x17b   :  { %v575_v31 = vadd.f32 %v7188_v15, %v539_v60  ;;  %7189 = vst [vmem:[#allocation20_spill] sm:$0xff] %v5433_v2 }
 0x17c   :  { %v5388_v4 = vpop.permute.xlu0 %1230  ;;  %2584 = vrot.lane.b32.xlu1 %v5373_v40, %s3786_s7  ;;  %7163 = vst [vmem:[#allocation13_spill] sm:$0xff] %v5393_v51  ;;  %v573_v28 = vadd.f32 %v7187_v48, %v537_v35  ;;  %v7191_v40 = vld [vmem:[#allocation47_spill] sm:$0xff]  ;;  %v574_v35 = vadd.f32 %v4667_v27, %v538_v17 }
 0x17d   :  { %7162 = vst [vmem:[#allocation19_spill] sm:$0xff] %v5388_v4  ;;  %v611_v48 = vadd.f32 %v4681_v55, %v575_v31  ;;  %v7199_v17 = vld [vmem:[#allocation55_spill] sm:$0xff]  ;;  %v5461_v31 = vmul.f32 0.036000773, %v5308_v12 }
 0x17e   :  { %1892 = vrot.lane.b32.xlu0 %v5378_v37, %s3786_s7  ;;  %v5408_v34 = vpop.permute.xlu1 %1268  ;;  %v7183_v37 = vld [vmem:[#allocation40_spill] sm:$0xff]  ;;  %v609_v60 = vadd.f32 %v4659_v41, %v573_v28  ;;  %v610_v27 = vadd.f32 %v7198_v56, %v574_v35  ;;  %v7200_v28 = vld [vmem:[#allocation57_spill] sm:$0xff]  ;;  %v2829_v35 = vmul.f32 0.007598758, %v5440_v16 }
 0x17f   :  { %7173 = vst [vmem:[#allocation25_spill] sm:$0xff] %v5408_v34  ;;  %v504_v36 = vadd.f32 %v7183_v37, %v468_v26  ;;  %v7192_v26 = vld [vmem:[#allocation50_spill] sm:$0xff]  ;;  %v635_v55 = vadd.f32 %v7200_v28, %v611_v48  ;;  %7201 = vst [vmem:[#allocation26_spill] sm:$0xff] %v5461_v31  ;;  %v7207_v56 = vld [vmem:[#allocation61_spill] sm:$0xff]  ;;  %v5476_v28 = vmul.f32 0.21300554, %v4716_v33 }
 0x180   :  { %v5417_v1 = vpop.permute.xlu0 %1234  ;;  %1896 = vrot.lane.b32.xlu1 %v5393_v51, %s3786_s7  ;;  %v572_v59 = vadd.f32 %v7192_v26, %v536_v21  ;;  %v7196_v21 = vld [vmem:[#allocation53_spill] sm:$0xff]  ;;  %v7197_v26 = vld [vmem:[#allocation52_spill] sm:$0xff]  ;;  %v633_v41 = vadd.f32 %v7199_v17, %v609_v60  ;;  %v7230_v34 = vld [vmem:[#allocation82_spill] sm:$0xff] }
 0x181   :  { %7181 = vst [vmem:[#allocation18_spill] sm:$0xff] %v5417_v1  ;;  %v540_v37 = vadd.f32 %v7191_v40, %v504_v36  ;;  %v5450_v40 = vmul.f32 0.10936069, %v5244_v9  ;;  %v613_v46 = vadd.f32 %v7197_v26, %v577_v45  ;;  %v7206_v26 = vld [vmem:[#allocation62_spill] sm:$0xff]  ;;  %7209 = vst [vmem:[#allocation32_spill] sm:$0xff] %v5476_v28 }
 0x182   :  { %2520 = vrot.lane.b32.xlu0 %v5406_v44, %s3784_s1  ;;  %v5435_v51 = vpop.permute.xlu1 %1272  ;;  %v608_v6 = vadd.f32 %v7196_v21, %v572_v59  ;;  %v7203_v44 = vld [vmem:[#allocation58_spill] sm:$0xff]  ;;  %v7205_v21 = vld [vmem:[#allocation59_spill] sm:$0xff]  ;;  %v634_v60 = vadd.f32 %v7206_v26, %v610_v27  ;;  %v657_v48 = vadd.f32 %v7207_v56, %v633_v41  ;;  %v7214_v56 = vld [vmem:[#allocation68_spill] sm:$0xff] }
 0x183   :  { %7190 = vst [vmem:[#allocation23_spill] sm:$0xff] %v5435_v51  ;;  %7195 = vst [vmem:[#allocation22_spill] sm:$0xff] %v5450_v40  ;;  %v576_v36 = vadd.f32 %v4687_v53, %v540_v37  ;;  %v7204_v37 = vld [vmem:[#allocation60_spill] sm:$0xff]  ;;  %v637_v45 = vadd.f32 %v7205_v21, %v613_v46  ;;  %v7213_v26 = vld [vmem:[#allocation66_spill] sm:$0xff] }
 0x184   :  { %v5445_v15 = vpop.permute.xlu0 %1262  ;;  %2586 = vrot.lane.b32.xlu1 %v5422_v7, %s3786_s7  ;;  %v632_v59 = vadd.f32 %v7204_v37, %v608_v6  ;;  %v3710_v7 = vld [vmem:[#allocation2 + $0x18] sm:$0xff]  ;;  %v7210_v6 = vld [vmem:[#allocation64_spill] sm:$0xff]  ;;  %v658_v5 = vadd.f32 %v7214_v56, %v634_v60 }
 0x185   :  { %7194 = vst [vmem:[#allocation21_spill] sm:$0xff] %v5445_v15  ;;  %v612_v53 = vadd.f32 %v7203_v44, %v576_v36  ;;  %v3711_v44 = vld [vmem:[#allocation4 + $0x18] sm:$0xff] }
 0x186   :  { %2582 = vrot.lane.b32.xlu0 %v5433_v2, %s3786_s7  ;;  %v5463_v30 = vpop.permute.xlu1 %1288  ;;  %v5478_v36 = vmul.f32 %v3711_v44, %v3710_v7  ;;  %v7211_v37 = vld [vmem:[#allocation63_spill] sm:$0xff]  ;;  %v7212_v2 = vld [vmem:[#allocation65_spill] sm:$0xff]  ;;  %v656_v41 = vadd.f32 %v7213_v26, %v632_v59  ;;  %v7223_v26 = vld [vmem:[#allocation72_spill] sm:$0xff] }
 0x187   :  { %7202 = vst [vmem:[#allocation30_spill] sm:$0xff] %v5463_v30  ;;  %v636_v46 = vadd.f32 %v7210_v6, %v612_v53  ;;  %v659_v21 = vadd.f32 %v7211_v37, %v635_v55  ;;  %v661_v27 = vadd.f32 %v7212_v2, %v637_v45  ;;  %v7218_v44 = vld [vmem:[#allocation69_spill] sm:$0xff]  ;;  %v2823_v55 = vmul.f32 0.0010283801, %v5440_v16  ;;  %v7219_v59 = vld [vmem:[#allocation71_spill] sm:$0xff] }
 0x188   :  { %v5471_v17 = vpop.permute.xlu0 %1266  ;;  %1898 = vrot.lane.b32.xlu1 %v5450_v40, %s3786_s7  ;;  %v5489_v40 = vmul.f32 0.036000773, %v5329_v39  ;;  %v2841_v6 = vrot.slane %v2829_v35, 1  ;;  %v2859_v2 = vmul.f32 0.036000773, %v5440_v16  ;;  %v680_v56 = vadd.f32 %v7223_v26, %v656_v41  ;;  %v7235_v26 = vld [vmem:[#allocation9_spill] sm:$0xff] }
 0x189   :  { %7208 = vst [vmem:[#allocation12_spill] sm:$0xff] %v5471_v17  ;;  %v7215_v17 = vld [vmem:[#allocation67_spill] sm:$0xff]  ;;  %v683_v53 = vadd.f32 %v7218_v44, %v659_v21  ;;  %v685_v45 = vadd.f32 %v7219_v59, %v661_v27  ;;  %v5508_v37 = vmul.f32 0.10936069, %v5478_v36  ;;  %v7222_v21 = vld [vmem:[#allocation70_spill] sm:$0xff]  ;;  %v7224_v44 = vld [vmem:[#allocation73_spill] sm:$0xff] }
 0x18a   :  { %v681_v15 = vadd.f32 %v7215_v17, %v657_v48  ;;  %1864 = vrot.lane.b32.xlu0 %v5461_v31, %s3785_s6  ;;  %7216 = vst [vmem:[#allocation36_spill] sm:$0xff] %v5489_v40  ;;  %v5491_v7 = vpop.permute.xlu1 %1292  ;;  %v5502_v48 = vmul.f32 0.10936069, %v5140_v63  ;;  %v5505_v17 = vmul.f32 0.10936069, %v5440_v16  ;;  %v660_v35 = vadd.f32 %v7222_v21, %v636_v46  ;;  %v7225_v59 = vld [vmem:[#allocation77_spill] sm:$0xff] }
 0x18b   :  { %7217 = vst [vmem:[#allocation35_spill] sm:$0xff] %v5491_v7  ;;  %v682_v31 = vadd.f32 %v7225_v59, %v658_v5  ;;  %v5519_v7 = vmul.f32 0.036000773, %v5349_v38  ;;  %v704_v46 = vadd.f32 %v7230_v34, %v680_v56  ;;  %v2853_v21 = vadd.f32 %v2841_v6, %v2823_v55  ;;  %v7233_v34 = vld [vmem:[#allocation29_spill] sm:$0xff]  ;;  %v7234_v6 = vld [vmem:[#allocation84_spill] sm:$0xff] }
 0x18c   :  { %v5497_v60 = vpop.permute.xlu0 %1270  ;;  %1930 = vrot.lane.b32.xlu1 %v5476_v28, %s3787_s8  ;;  %7221 = vst [vmem:[#allocation37_spill] sm:$0xff] %v5502_v48  ;;  %v705_v27 = vadd.f32 %v7224_v44, %v681_v15  ;;  %v7227_v28 = vld [vmem:[#allocation31_spill] sm:$0xff]  ;;  %v2871_v41 = vrot.slane %v2859_v2, 2  ;;  %v5525_v15 = vmul.f32 0.21300554, %v5440_v16  ;;  %v684_v55 = vadd.f32 %v7233_v34, %v660_v35  ;;  %v7237_v44 = vld [vmem:[#allocation85_spill] sm:$0xff] }
 0x18d   :  { %7220 = vst [vmem:[#allocation38_spill] sm:$0xff] %v5497_v60  ;;  %v7226_v60 = vld [vmem:[#allocation28_spill] sm:$0xff]  ;;  %v709_v1 = vadd.f32 %v7227_v28, %v685_v45  ;;  %7228 = vst [vmem:[#allocation39_spill] sm:$0xff] %v5519_v7  ;;  %v5532_v28 = vmul.f32 0.21300554, %v4969_v32  ;;  %v2916_v45 = vrot.slane %v5508_v37, 3  ;;  %v706_v2 = vadd.f32 %v7234_v6, %v682_v31 }
 0x18e   :  { %v707_v51 = vadd.f32 %v7226_v60, %v683_v53  ;;  %2554 = vrot.lane.b32.xlu0 %v5489_v40, %s3785_s6  ;;  %v5521_v4 = vpop.permute.xlu1 %1296  ;;  %v2915_v53 = vrot.slane %v5505_v17, 3  ;;  %v5537_v60 = vmul.f32 0.21300554, %v5478_v36  ;;  %v5542_v56 = vadd.f32 %v7235_v26, %v705_v27  ;;  %v7239_v40 = vld [vmem:[#allocation10_spill] sm:$0xff]  ;;  %v3712_v34 = vld [vmem:[#allocation2] sm:$0xff] }
 0x18f   :  { %7229 = vst [vmem:[#allocation40_spill] sm:$0xff] %v5521_v4  ;;  %7232 = vst [vmem:[#allocation41_spill] sm:$0xff] %v5532_v28  ;;  %v5545_v59 = vadd.f32 %v7237_v44, %v704_v46  ;;  %v5556_v30 = vmul.f32 0.21300554, %v4965_v58  ;;  %v5561_v31 = vmul.f32 0.21300554, %v5049_v0  ;;  %v2883_v27 = vadd.f32 %v2871_v41, %v2853_v21 }
 0x190   :  { %v5527_v5 = vpop.permute.xlu0 %1286  ;;  %2588 = vrot.lane.b32.xlu1 %v5502_v48, %s3786_s7  ;;  %7236 = vst [vmem:[#allocation44_spill] sm:$0xff] %v5542_v56  ;;  %v5548_v48 = vadd.f32 %v7239_v40, %v707_v51  ;;  %v2969_v46 = vrot.slane %v5525_v15, 4  ;;  %v3713_v51 = vld [vmem:[#allocation4] sm:$0xff]  ;;  %v2970_v6 = vrot.slane %v5537_v60, 4  ;;  %v2998_v26 = vmul.f32 0.26601171, %v5440_v16 }
 0x191   :  { %7231 = vst [vmem:[#allocation15_spill] sm:$0xff] %v5527_v5  ;;  %7238 = vst [vmem:[#allocation43_spill] sm:$0xff] %v5545_v59  ;;  %v7241_v5 = vld [vmem:[#allocation27_spill] sm:$0xff]  ;;  %v5564_v40 = vmul.f32 %v3713_v51, %v3712_v34  ;;  %v2999_v44 = vmul.f32 0.26601171, %v5478_v36  ;;  %v5576_v21 = vmul.f32 %v5542_v56, %v5542_v56  ;;  %v7248_v41 = vld [vmem:[#allocation86_spill] sm:$0xff] }
 0x192   :  { %7240 = vst [vmem:[#allocation46_spill] sm:$0xff] %v5548_v48  ;;  %v5551_v4 = vadd.f32 %v7241_v5, %v709_v1  ;;  %1866 = vrot.lane.b32.xlu0 %v5519_v7, %s3785_s6  ;;  %7243 = vst [vmem:[#allocation50_spill] sm:$0xff] %v5556_v30  ;;  %v5558_v35 = vpop.permute.xlu1 %1312  ;;  %v2917_v5 = vsel %vm153_vm0, %v2915_v53, %v2916_v45  ;;  %v5579_v34 = vadd.f32 %v7248_v41, %v706_v2  ;;  %v7250_v51 = vld [vmem:[#allocation24_spill] sm:$0xff] }
 0x193   :  { %7244 = vst [vmem:[#allocation49_spill] sm:$0xff] %v5558_v35  ;;  %7245 = vst [vmem:[#allocation53_spill] sm:$0xff] %v5561_v31  ;;  %v708_v7 = vadd.f32 %v7250_v51, %v684_v55  ;;  %v5593_v16 = vmul.f32 0.036000773, %v5380_v57  ;;  %v5599_v2 = vmul.f32 %v5545_v59, %v5545_v59  ;;  %v5602_v55 = vmul.f32 0.21300554, %v4982_v50 }
 0x194   :  { %7242 = vst [vmem:[#allocation47_spill] sm:$0xff] %v5551_v4  ;;  %v5566_v1 = vpop.permute.xlu0 %1290  ;;  %2620 = vrot.lane.b32.xlu1 %v5532_v28, %s3787_s8  ;;  %7247 = vst [vmem:[#allocation56_spill] sm:$0xff] %v5576_v21  ;;  %v5584_v28 = vmul.f32 %v5548_v48, %v5548_v48  ;;  %v5588_v53 = vmul.f32 %v5551_v4, %v5551_v4  ;;  %v2937_v41 = vadd.f32 %v2917_v5, %v2883_v27  ;;  %v3714_v48 = vld [vmem:[#allocation2 + $0x8] sm:$0xff]  ;;  %v7261_v59 = vld [vmem:[#allocation16_spill] sm:$0xff] }
 0x195   :  { %7246 = vst [vmem:[#allocation52_spill] sm:$0xff] %v5566_v1  ;;  %7249 = vst [vmem:[#allocation55_spill] sm:$0xff] %v5579_v34  ;;  %v2828_v51 = vmul.f32 0.007598758, %v5564_v40  ;;  %v3715_v1 = vld [vmem:[#allocation4 + $0x8] sm:$0xff] }
 0x196   :  { %7251 = vst [vmem:[#allocation57_spill] sm:$0xff] %v5584_v28  ;;  %7252 = vst [vmem:[#allocation58_spill] sm:$0xff] %v5588_v53  ;;  %1928 = vrot.lane.b32.xlu0 %v5556_v30, %s3787_s8  ;;  %v5595_v45 = vpop.permute.xlu1 %1316  ;;  %v2971_v30 = vsel %vm208_vm1, %v2969_v46, %v2970_v6  ;;  %v3023_v53 = vrot.slane %v2998_v26, 5  ;;  %v3024_v28 = vrot.slane %v2999_v44, 5  ;;  %v5610_v21 = vmul.f32 %v3715_v1, %v3714_v48  ;;  %v7259_v27 = vld [vmem:[#allocation89_spill] sm:$0xff]  ;;  %v7265_v46 = vld [vmem:[#allocation51_spill] sm:$0xff] }
 0x197   :  { %7253 = vst [vmem:[#allocation60_spill] sm:$0xff] %v5593_v16  ;;  %7254 = vst [vmem:[#allocation59_spill] sm:$0xff] %v5595_v45  ;;  %v5617_v5 = vadd.f32 %v7259_v27, %v708_v7  ;;  %v7263_v45 = vld [vmem:[#allocation45_spill] sm:$0xff]  ;;  %v7266_v6 = vld [vmem:[#allocation90_spill] sm:$0xff]  ;;  %v5628_v48 = vmul.f32 0.21300554, %v4971_v3 }
 0x198   :  { %7255 = vst [vmem:[#allocation62_spill] sm:$0xff] %v5599_v2  ;;  %7256 = vst [vmem:[#allocation61_spill] sm:$0xff] %v5602_v55  ;;  %v5605_v4 = vpop.permute.xlu0 %1294  ;;  %1932 = vrot.lane.b32.xlu1 %v5561_v31, %s3787_s8  ;;  %v5614_v2 = vmul.f32 %v5579_v34, %v5579_v34  ;;  %v7264_v31 = vld [vmem:[#allocation88_spill] sm:$0xff]  ;;  %v1141_v26 = vadd.f32 %v7266_v6, %v7265_v46  ;;  %v5633_v7 = vmul.f32 0.21300554, %v5244_v9  ;;  %v3053_v44 = vrot.slane %v5525_v15, 6 }
 0x199   :  { %7257 = vst [vmem:[#allocation64_spill] sm:$0xff] %v5605_v4  ;;  %7260 = vst [vmem:[#allocation65_spill] sm:$0xff] %v5617_v5  ;;  %v7262_v4 = vld [vmem:[#allocation34_spill] sm:$0xff]  ;;  %v1139_v35 = vadd.f32 %v7264_v31, %v7263_v45  ;;  %v2840_v31 = vrot.slane %v2828_v51, 1  ;;  %v2858_v45 = vmul.f32 0.036000773, %v5564_v40  ;;  %v3025_v46 = vsel %vm263_vm2, %v3023_v53, %v3024_v28 }
 0x19a   :  { %7258 = vst [vmem:[#allocation63_spill] sm:$0xff] %v5614_v2  ;;  %v1137_v56 = vadd.f32 %v7262_v4, %v7261_v59  ;;  %2556 = vrot.lane.b32.xlu0 %v5593_v16, %s3785_s6  ;;  %7267 = vst [vmem:[#allocation66_spill] sm:$0xff] %v5628_v48  ;;  %v5630_v1 = vpop.permute.xlu1 %1320  ;;  %v2991_v4 = vadd.f32 %v2971_v30, %v2937_v41  ;;  %v2822_v59 = vmul.f32 0.0010283801, %v5564_v40  ;;  %v3054_v6 = vrot.slane %v5537_v60, 6  ;;  %v7269_v30 = vld [vmem:[#allocation42_spill] sm:$0xff] }
 0x19b   :  { %7268 = vst [vmem:[#allocation68_spill] sm:$0xff] %v5633_v7  ;;  %v5645_v16 = vmul.f32 0.10936069, %v5564_v40  ;;  %v5648_v15 = vmul.f32 0.10936069, %v5610_v21  ;;  %v1136_v41 = vadd.f32 %v5185_v19, %v7269_v30  ;;  %v7270_v51 = vld [vmem:[#allocation48_spill] sm:$0xff]  ;;  %v1140_v28 = vadd.f32 %v5234_v11, %v4993_v14 }
 0x19c   :  { %v5638_v27 = vpop.permute.xlu0 %1310  ;;  %2622 = vrot.lane.b32.xlu1 %v5602_v55, %s3787_s8  ;;  %v1138_v5 = vadd.f32 %v5210_v52, %v7270_v51  ;;  %v1173_v2 = vadd.f32 %v5199_v47, %v1137_v56  ;;  %v1175_v55 = vadd.f32 %v5226_v61, %v1139_v35  ;;  %v5661_v60 = vmul.f32 0.10936069, %v5308_v12 }
 0x19d   :  { %v5664_v53 = vmul.f32 0.10936069, %v5329_v39  ;;  %v1953_v52 = vmul.f32 0.26601171, %v4716_v33  ;;  %v3045_v30 = vadd.f32 %v3025_v46, %v2991_v4  ;;  %v2852_v47 = vadd.f32 %v2840_v31, %v2822_v59 }
 0x19e   :  { %2618 = vrot.lane.b32.xlu0 %v5628_v48, %s3787_s8  ;;  %7271 = vst [vmem:[#allocation67_spill] sm:$0xff] %v5661_v60  ;;  %v5666_v19 = vpop.permute.xlu1 %1336  ;;  %v2870_v56 = vrot.slane %v2858_v45, 2  ;;  %v5670_v61 = vmul.f32 0.21300554, %v5564_v40  ;;  %v3055_v11 = vsel %vm294_vm3, %v3053_v44, %v3054_v6  ;;  %v2912_v35 = vrot.slane %v5645_v16, 3 }
 0x19f   :  { %7272 = vst [vmem:[#allocation69_spill] sm:$0xff] %v5664_v53  ;;  %v2913_v51 = vrot.slane %v5648_v15, 3  ;;  %v5680_v48 = vmul.f32 0.21300554, %v5610_v21  ;;  %v5683_v4 = vmul.f32 0.10936069, %v5349_v38  ;;  %v1177_v46 = vadd.f32 %v5254_v18, %v1141_v26 }
 0x1a0   :  { %v5672_v14 = vpop.permute.xlu0 %1314  ;;  %1934 = vrot.lane.b32.xlu1 %v5633_v7, %s3787_s8  ;;  %v5686_v59 = vmul.f32 0.26601171, %v4965_v58  ;;  %v3083_v31 = vrot.slane %v5505_v17, 7  ;;  %v3084_v45 = vrot.slane %v5508_v37, 7  ;;  %v5696_v6 = vmul.f32 0.21300554, %v5140_v63 }
 0x1a1   :  { %7273 = vst [vmem:[#allocation71_spill] sm:$0xff] %v5672_v14  ;;  %v2643_v33 = vmul.f32 0.26601171, %v4969_v32  ;;  %v5700_v7 = vmul.f32 0.26601171, %v4971_v3  ;;  %v3075_v17 = vadd.f32 %v3055_v11, %v3045_v30  ;;  %v2882_v37 = vadd.f32 %v2870_v56, %v2852_v47 }
 0x1a2   :  { %1900 = vrot.lane.b32.xlu0 %v5661_v60, %s3786_s7  ;;  %v5693_v44 = vpop.permute.xlu1 %1340  ;;  %v5703_v58 = vmul.f32 0.26601171, %v5049_v0  ;;  %v2966_v18 = vrot.slane %v5670_v61, 4  ;;  %v2914_v60 = vsel %vm153_vm0, %v2912_v35, %v2913_v51  ;;  %v2967_v34 = vrot.slane %v5680_v48, 4 }
 0x1a3   :  { %v2996_v32 = vmul.f32 0.26601171, %v5564_v40  ;;  %v2997_v3 = vmul.f32 0.26601171, %v5610_v21  ;;  %v5714_v14 = vmul.f32 0.21300554, %v5308_v12  ;;  %v3085_v56 = vsel %vm325_vm4, %v3083_v31, %v3084_v45 }
 0x1a4   :  { %v5706_v26 = vpop.permute.xlu0 %1318  ;;  %1966 = vrot.lane.b32.xlu1 %v1953_v52, %s3788_s9  ;;  %v5717_v30 = vmul.f32 0.26601171, %v4982_v50  ;;  %v5720_v47 = vmul.f32 0.21300554, %v5329_v39  ;;  %v1172_v52 = vadd.f32 %v5260_v43, %v1136_v41  ;;  %v5729_v40 = vmul.f32 0.26601171, %v5244_v9 }
 0x1a5   :  { %v5732_v35 = vmul.f32 0.21300554, %v5349_v38  ;;  %v5735_v51 = vmul.f32 0.26601171, %v5140_v63  ;;  %v1209_v50 = vadd.f32 %v5275_v10, %v1173_v2  ;;  %v3111_v31 = vmul.f32 0.036000773, %v5478_v36 }
 0x1a6   :  { %2590 = vrot.lane.b32.xlu0 %v5664_v53, %s3786_s7  ;;  %v5726_v11 = vpop.permute.xlu1 %1344  ;;  %v3123_v43 = vmul.f32 0.007598758, %v5478_v36  ;;  %v2936_v41 = vadd.f32 %v2914_v60, %v2882_v37  ;;  %v3105_v9 = vadd.f32 %v3085_v56, %v3075_v17  ;;  %v2968_v0 = vsel %vm208_vm1, %v2966_v18, %v2967_v34 }
 0x1a7   :  { %v3020_v53 = vrot.slane %v2996_v32, 5  ;;  %v3021_v38 = vrot.slane %v2997_v3, 5  ;;  %v1174_v63 = vadd.f32 %v5281_v22, %v1138_v5  ;;  %v1211_v39 = vadd.f32 %v5294_v25, %v1175_v55 }
 0x1a8   :  { %v5740_v45 = vpop.permute.xlu0 %1334  ;;  %2624 = vrot.lane.b32.xlu1 %v5696_v6, %s3787_s8  ;;  %v5748_v10 = vmul.f32 0.10936069, %v5380_v57  ;;  %v5751_v2 = vmul.f32 0.21300554, %v5380_v57  ;;  %v1176_v60 = vadd.f32 %v5301_v24, %v1140_v28  ;;  %v1208_v37 = vadd.f32 %v5319_v20, %v1172_v52  ;;  %v3716_v28 = vld [vmem:[#allocation2 + $0x20] sm:$0xff] }
 0x1a9   :  { %v1213_v17 = vadd.f32 %v5316_v42, %v1177_v46  ;;  %v5759_v3 = vmul.f32 0.0010283801, %v5478_v36  ;;  %v1245_v22 = vadd.f32 %v5333_v29, %v1209_v50  ;;  %v3135_v25 = vrot.slane %v3123_v43, 1  ;;  %v3717_v46 = vld [vmem:[#allocation4 + $0x20] sm:$0xff] }
 0x1aa   :  { %1902 = vrot.lane.b32.xlu0 %v5683_v4, %s3786_s7  ;;  %v1361_v32 = vpop.permute.xlu1 %1360  ;;  %v2990_v34 = vadd.f32 %v2968_v0, %v2936_v41  ;;  %v3050_v55 = vrot.slane %v5670_v61, 6  ;;  %v3117_v24 = vadd.f32 %v3111_v31, %v3105_v9  ;;  %v3022_v42 = vsel %vm263_vm2, %v3020_v53, %v3021_v38  ;;  %v3719_v53 = vld [vmem:[#allocation4 + $0x28] sm:$0xff]  ;;  %v7297_v38 = vld [vmem:[#allocation71_spill] sm:$0xff] }
 0x1ab   :  { %v3051_v20 = vrot.slane %v5680_v48, 6  ;;  %v5768_v18 = vmul.f32 %v3717_v46, %v3716_v28  ;;  %v1210_v36 = vadd.f32 %v5337_v13, %v1174_v63  ;;  %v1281_v50 = vadd.f32 %v5382_v8, %v1245_v22  ;;  %v3718_v48 = vld [vmem:[#allocation2 + $0x28] sm:$0xff]  ;;  %v7274_v8 = vld [vmem:[#allocation30_spill] sm:$0xff] }
 0x1ac   :  { %v5763_v5 = vpop.permute.xlu0 %1338  ;;  %2656 = vrot.lane.b32.xlu1 %v2643_v33, %s3788_s9  ;;  %v3080_v0 = vrot.slane %v5645_v16, 7  ;;  %v3081_v29 = vrot.slane %v5648_v15, 7  ;;  %v1212_v61 = vadd.f32 %v5354_v23, %v1176_v60  ;;  %v1247_v33 = vadd.f32 %v5351_v62, %v1211_v39  ;;  %v7279_v46 = vld [vmem:[#allocation18_spill] sm:$0xff] }
 0x1ad   :  { %v5779_v56 = vmul.f32 %v3719_v53, %v3718_v48  ;;  %v1244_v63 = vadd.f32 %v5368_v49, %v1208_v37  ;;  %v1249_v13 = vadd.f32 %v5366_v54, %v1213_v17  ;;  %v1305_v16 = vadd.f32 %v7274_v8, %v1281_v50  ;;  %v7275_v49 = vld [vmem:[#allocation25_spill] sm:$0xff]  ;;  %v3721_v48 = vld [vmem:[#allocation4 + $0x30] sm:$0xff]  ;;  %v7280_v8 = vld [vmem:[#allocation23_spill] sm:$0xff] }
 0x1ae   :  { %1964 = vrot.lane.b32.xlu0 %v5686_v59, %s3788_s9  ;;  %v1365_v9 = vpop.permute.xlu1 %1364  ;;  %v3044_v15 = vadd.f32 %v3022_v42, %v2990_v34  ;;  %v5788_v39 = vadd.f32 %v3135_v25, %v3117_v24  ;;  %v3052_v62 = vsel %vm294_vm3, %v3050_v55, %v3051_v20  ;;  %v5792_v59 = vmul.f32 0.036000773, %v5610_v21  ;;  %v7276_v54 = vld [vmem:[#allocation49_spill] sm:$0xff]  ;;  %v7278_v55 = vld [vmem:[#allocation35_spill] sm:$0xff] }
 0x1af   :  { %v2830_v52 = vmul.f32 0.007598758, %v5768_v18  ;;  %v1283_v31 = vadd.f32 %v7275_v49, %v1247_v33  ;;  %v1329_v43 = vadd.f32 %v7276_v54, %v1305_v16  ;;  %v5798_v41 = vsel %vm325_vm4, %v3080_v0, %v3081_v29  ;;  %v3720_v33 = vld [vmem:[#allocation2 + $0x30] sm:$0xff]  ;;  %v7281_v16 = vld [vmem:[#allocation59_spill] sm:$0xff] }
 0x1b0   :  { %v5784_v23 = vpop.permute.xlu0 %1342  ;;  %1968 = vrot.lane.b32.xlu1 %v5703_v58, %s3788_s9  ;;  %v5801_v60 = vmul.f32 0.036000773, %v5768_v18  ;;  %v7277_v58 = vld [vmem:[#allocation19_spill] sm:$0xff]  ;;  %v5807_v22 = vmul.f32 0.007598758, %v5610_v21  ;;  %v5817_v20 = vadd.f32 %v3052_v62, %v3044_v15  ;;  %v5826_v53 = vmul.f32 %v3721_v48, %v3720_v33 }
 0x1b1   :  { %v1246_v37 = vadd.f32 %v7277_v58, %v1210_v36  ;;  %v5810_v25 = vmul.f32 0.10936069, %v5768_v18  ;;  %v5813_v34 = vmul.f32 0.10936069, %v5779_v56  ;;  %v1307_v24 = vadd.f32 %v7278_v55, %v1283_v31  ;;  %v7282_v31 = vld [vmem:[#allocation21_spill] sm:$0xff]  ;;  %v7283_v58 = vld [vmem:[#allocation40_spill] sm:$0xff] }
 0x1b2   :  { %2592 = vrot.lane.b32.xlu0 %v5748_v10, %s3786_s7  ;;  %v1369_v17 = vpop.permute.xlu1 %1368  ;;  %v1353_v42 = vadd.f32 %v5666_v19, %v1329_v43  ;;  %v5820_v28 = vmul.f32 0.21300554, %v5768_v18  ;;  %v1248_v36 = vadd.f32 %v7279_v46, %v1212_v61  ;;  %v2824_v0 = vmul.f32 0.0010283801, %v5768_v18  ;;  %v3722_v33 = vld [vmem:[#allocation2 + $0x38] sm:$0xff] }
 0x1b3   :  { %v2842_v29 = vrot.slane %v2830_v52, 1  ;;  %v1285_v19 = vadd.f32 %v7280_v8, %v1249_v13  ;;  %v1331_v15 = vadd.f32 %v7281_v16, %v1307_v24  ;;  %v1280_v61 = vadd.f32 %v7282_v31, %v1244_v63  ;;  %v3723_v48 = vld [vmem:[#allocation4 + $0x38] sm:$0xff] }
 0x1b4   :  { %v1359_v50 = vpop.permute.xlu0 %1358  ;;  %2658 = vrot.lane.b32.xlu1 %v5717_v30, %s3788_s9  ;;  %v1377_v62 = vadd.f32 %v1361_v32, %v1353_v42  ;;  %v5837_v43 = vmul.f32 0.21300554, %v5779_v56  ;;  %v7284_v42 = vld [vmem:[#allocation15_spill] sm:$0xff]  ;;  %v5845_v8 = vmul.f32 %v3723_v48, %v3722_v33  ;;  %v2831_v16 = vmul.f32 0.007598758, %v5826_v53  ;;  %v7292_v48 = vld [vmem:[#allocation32_spill] sm:$0xff] }
 0x1b5   :  { %v1309_v13 = vadd.f32 %v7283_v58, %v1285_v19  ;;  %v1355_v55 = vadd.f32 %v5693_v44, %v1331_v15  ;;  %v1304_v63 = vadd.f32 %v7284_v42, %v1280_v61  ;;  %v7286_v15 = vld [vmem:[#allocation44_spill] sm:$0xff]  ;;  %v5860_v58 = vmul.f32 0.10936069, %v5826_v53 }
 0x1b6   :  { %2654 = vrot.lane.b32.xlu0 %v5700_v7, %s3788_s9  ;;  %v1391_v30 = vpop.permute.xlu1 %1390  ;;  %v2854_v7 = vadd.f32 %v2842_v29, %v2824_v0  ;;  %v7288_v61 = vld [vmem:[#allocation12_spill] sm:$0xff]  ;;  %v2861_v29 = vmul.f32 0.036000773, %v5826_v53  ;;  %v5873_v24 = vmul.f32 0.10936069, %v5845_v8 }
 0x1b7   :  { %v1407_v32 = vadd.f32 %v1391_v30, %v1377_v62  ;;  %v1333_v19 = vadd.f32 %v5630_v1, %v1309_v13  ;;  %v1379_v31 = vadd.f32 %v1365_v9, %v1355_v55  ;;  %v1282_v30 = vadd.f32 %v7288_v61, %v1246_v37  ;;  %v7289_v13 = vld [vmem:[#allocation56_spill] sm:$0xff] }
 0x1b8   :  { %v1363_v46 = vpop.permute.xlu0 %1362  ;;  %1970 = vrot.lane.b32.xlu1 %v5729_v40, %s3788_s9  ;;  %v1328_v1 = vadd.f32 %v5638_v27, %v1304_v63  ;;  %v2843_v61 = vrot.slane %v2831_v16, 1  ;;  %v7293_v27 = vld [vmem:[#allocation52_spill] sm:$0xff]  ;;  %v2921_v16 = vrot.slane %v5860_v58, 3 }
 0x1b9   :  { %v5849_v44 = vmul.f32 %v1407_v32, %v1407_v32  ;;  %v5852_v62 = vmul.f32 %v1407_v32, %v7286_v15  ;;  %v1357_v9 = vadd.f32 %v5726_v11, %v1333_v19  ;;  %v7291_v32 = vld [vmem:[#allocation38_spill] sm:$0xff]  ;;  %v2825_v15 = vmul.f32 0.0010283801, %v5826_v53 }
 0x1ba   :  { %1936 = vrot.lane.b32.xlu0 %v5714_v14, %s3787_s8  ;;  %v1395_v40 = vpop.permute.xlu1 %1394  ;;  %v1284_v42 = vadd.f32 %v7291_v32, %v1248_v36  ;;  %v1306_v63 = vadd.f32 %v7293_v27, %v1282_v30  ;;  %v1352_v11 = vadd.f32 %v5740_v45, %v1328_v1  ;;  %v7295_v36 = vld [vmem:[#allocation46_spill] sm:$0xff]  ;;  %v2873_v32 = vrot.slane %v2861_v29, 2  ;;  %v7298_v45 = vld [vmem:[#allocation57_spill] sm:$0xff] }
 0x1bb   :  { %7285 = vst [vmem:[#allocation70_spill] sm:$0xff] %v5849_v44  ;;  %7287 = vst [vmem:[#allocation72_spill] sm:$0xff] %v5852_v62  ;;  %v5866_v55 = vadd.f32 %v5849_v44, %v7289_v13  ;;  %v1409_v37 = vadd.f32 %v1395_v40, %v1379_v31  ;;  %v1381_v19 = vadd.f32 %v1369_v17, %v1357_v9  ;;  %v7300_v9 = vld [vmem:[#allocation64_spill] sm:$0xff] }
 0x1bc   :  { %v1367_v33 = vpop.permute.xlu0 %1366  ;;  %1990 = vrot.lane.b32.xlu1 %v7292_v48, %s3789_s10  ;;  %v5886_v48 = vmul.f32 0.21300554, %v5826_v53  ;;  %v1330_v30 = vadd.f32 %v7297_v38, %v1306_v63  ;;  %v1376_v27 = vadd.f32 %v1359_v50, %v1352_v11  ;;  %v1308_v54 = vadd.f32 %v7300_v9, %v1284_v42  ;;  %v7302_v11 = vld [vmem:[#allocation47_spill] sm:$0xff] }
 0x1bd   :  { %7290 = vst [vmem:[#allocation73_spill] sm:$0xff] %v5866_v55  ;;  %v5877_v0 = vmul.f32 %v1409_v37, %v1409_v37  ;;  %v5882_v31 = vmul.f32 %v1409_v37, %v7295_v36  ;;  %v2855_v29 = vadd.f32 %v2843_v61, %v2825_v15  ;;  %v2922_v37 = vrot.slane %v5873_v24, 3 }
 0x1be   :  { %2626 = vrot.lane.b32.xlu0 %v5720_v47, %s3787_s8  ;;  %v1399_v40 = vpop.permute.xlu1 %1398  ;;  %v5898_v36 = vmul.f32 0.21300554, %v5845_v8  ;;  %v1354_v38 = vadd.f32 %v5763_v5, %v1330_v30  ;;  %v1332_v42 = vadd.f32 %v5706_v26, %v1308_v54  ;;  %v7304_v15 = vrot.slane %v5801_v60, 2  ;;  %v7308_v26 = vld [vmem:[#allocation43_spill] sm:$0xff] }
 0x1bf   :  { %7294 = vst [vmem:[#allocation77_spill] sm:$0xff] %v5877_v0  ;;  %7296 = vst [vmem:[#allocation28_spill] sm:$0xff] %v5882_v31  ;;  %v5891_v17 = vadd.f32 %v5877_v0, %v7298_v45  ;;  %v1411_v1 = vadd.f32 %v1399_v40, %v1381_v19  ;;  %v7305_v19 = vrot.slane %v5813_v34, 3  ;;  %v7306_v5 = vrot.slane %v5810_v25, 3  ;;  %v3728_v0 = vld [vmem:[#allocation2 + $0x50] sm:$0xff] }
 0x1c0   :  { %v1389_v52 = vpop.permute.xlu0 %1388  ;;  %2660 = vrot.lane.b32.xlu1 %v5735_v51, %s3788_s9  ;;  %v2884_v61 = vadd.f32 %v7304_v15, %v2854_v7  ;;  %v2975_v40 = vrot.slane %v5886_v48, 4  ;;  %v1378_v30 = vadd.f32 %v1363_v46, %v1354_v38  ;;  %v7312_v7 = vld [vmem:[#allocation41_spill] sm:$0xff]  ;;  %v2923_v15 = vsel %vm153_vm0, %v2921_v16, %v2922_v37 }
 0x1c1   :  { %7299 = vst [vmem:[#allocation31_spill] sm:$0xff] %v5891_v17  ;;  %v1406_v50 = vadd.f32 %v1389_v52, %v1376_v27  ;;  %v5901_v63 = vmul.f32 %v1411_v1, %v1411_v1  ;;  %v5904_v49 = vmul.f32 %v1411_v1, %v7302_v11  ;;  %v2920_v52 = vsel %vm153_vm0, %v7306_v5, %v7305_v19  ;;  %v7310_v1 = vld [vmem:[#allocation58_spill] sm:$0xff] }
 0x1c2   :  { %1938 = vrot.lane.b32.xlu0 %v5732_v35, %s3787_s8  ;;  %v5909_v51 = vpop.permute.xlu1 %1822  ;;  %v2885_v11 = vadd.f32 %v2873_v32, %v2855_v29  ;;  %v3002_v19 = vmul.f32 0.26601171, %v5826_v53  ;;  %v3003_v46 = vmul.f32 0.26601171, %v5845_v8  ;;  %v1356_v38 = vadd.f32 %v5784_v23, %v1332_v42  ;;  %v7313_v5 = vld [vmem:[#allocation62_spill] sm:$0xff]  ;;  %v7317_v42 = vld [vmem:[#allocation55_spill] sm:$0xff] }
 0x1c3   :  { %7301 = vst [vmem:[#allocation82_spill] sm:$0xff] %v5901_v63  ;;  %7303 = vst [vmem:[#allocation29_spill] sm:$0xff] %v5904_v49  ;;  %v5919_v27 = vmul.f32 %v1406_v50, %v1406_v50  ;;  %v5922_v54 = vmul.f32 %v1406_v50, %v7308_v26  ;;  %v5926_v9 = vadd.f32 %v5901_v63, %v7310_v1  ;;  %v2976_v49 = vrot.slane %v5898_v36, 4 }
 0x1c4   :  { %v1393_v60 = vpop.permute.xlu0 %1392  ;;  %2680 = vrot.lane.b32.xlu1 %v7312_v7, %s3789_s10  ;;  %v3104_v32 = vadd.f32 %v5798_v41, %v5817_v20  ;;  %v3152_v53 = vmul.f32 0.0010283801, %v5610_v21  ;;  %v3000_v16 = vmul.f32 0.26601171, %v5768_v18  ;;  %v3001_v23 = vmul.f32 0.26601171, %v5779_v56 }
 0x1c5   :  { %7307 = vst [vmem:[#allocation84_spill] sm:$0xff] %v5919_v27  ;;  %7309 = vst [vmem:[#allocation9_spill] sm:$0xff] %v5922_v54  ;;  %v5936_v50 = vadd.f32 %v5919_v27, %v7313_v5  ;;  %v1408_v26 = vadd.f32 %v1393_v60, %v1378_v30  ;;  %v7315_v54 = vld [vmem:[#allocation50_spill] sm:$0xff]  ;;  %v1380_v29 = vadd.f32 %v1367_v33, %v1356_v38  ;;  %v7321_v41 = vld [vmem:[#allocation53_spill] sm:$0xff]  ;;  %v7322_v18 = vrot.slane %v5837_v43, 4 }
 0x1c6   :  { %7311 = vst [vmem:[#allocation85_spill] sm:$0xff] %v5926_v9  ;;  %1988 = vrot.lane.b32.xlu0 %v7315_v54, %s3789_s10  ;;  %v5941_v7 = vpop.permute.xlu1 %2512  ;;  %v7319_v54 = vrot.slane %v5759_v3, 2  ;;  %v2938_v21 = vadd.f32 %v2920_v52, %v2884_v61  ;;  %v7323_v20 = vrot.slane %v5820_v28, 4  ;;  %v2939_v38 = vadd.f32 %v2923_v15, %v2885_v11  ;;  %v7326_v15 = vld [vmem:[#allocation65_spill] sm:$0xff] }
 0x1c7   :  { %7314 = vst [vmem:[#allocation10_spill] sm:$0xff] %v5936_v50  ;;  %v5948_v37 = vmul.f32 %v1408_v26, %v1408_v26  ;;  %v5951_v30 = vmul.f32 %v1408_v26, %v7317_v42  ;;  %v3029_v62 = vrot.slane %v3002_v19, 5  ;;  %v7324_v26 = vld [vmem:[#allocation63_spill] sm:$0xff]  ;;  %v3116_v52 = vadd.f32 %v5792_v59, %v3104_v32 }
 0x1c8   :  { %v5956_v60 = vadd.f32 %v7319_v54, %v5788_v39  ;;  %v1397_v31 = vpop.permute.xlu0 %1396  ;;  %1992 = vrot.lane.b32.xlu1 %v7321_v41, %s3789_s10  ;;  %v2974_v33 = vsel %vm208_vm1, %v7323_v20, %v7322_v18  ;;  %v2977_v39 = vsel %vm208_vm1, %v2975_v40, %v2976_v49  ;;  %v3030_v54 = vrot.slane %v3003_v46, 5  ;;  %v7331_v46 = vld [vmem:[#allocation61_spill] sm:$0xff] }
 0x1c9   :  { %7316 = vst [vmem:[#allocation27_spill] sm:$0xff] %v5948_v37  ;;  %7318 = vst [vmem:[#allocation86_spill] sm:$0xff] %v5951_v30  ;;  %v5967_v42 = vadd.f32 %v5948_v37, %v7324_v26  ;;  %v1410_v3 = vadd.f32 %v1397_v31, %v1380_v29  ;;  %v3134_v41 = vrot.slane %v5807_v22, 1  ;;  %v3026_v18 = vrot.slane %v3000_v16, 5 }
 0x1ca   :  { %7320 = vst [vmem:[#allocation24_spill] sm:$0xff] %v5956_v60  ;;  %2628 = vrot.lane.b32.xlu0 %v5751_v2, %s3787_s8  ;;  %v5972_v61 = vpop.permute.xlu1 %2514  ;;  %v3027_v11 = vrot.slane %v3001_v23, 5  ;;  %v5978_v19 = vmul.f32 %v7326_v15, %v7326_v15  ;;  %v1956_v31 = vmul.f32 0.26601171, %v5308_v12  ;;  %v5991_v59 = vmul.f32 0.007598758, %v5956_v60 }
 0x1cb   :  { %7325 = vst [vmem:[#allocation89_spill] sm:$0xff] %v5967_v42  ;;  %v5980_v20 = vmul.f32 %v1410_v3, %v1410_v3  ;;  %v5983_v49 = vmul.f32 %v1410_v3, %v7326_v15  ;;  %v3164_v22 = vrot.slane %v3152_v53, 2  ;;  %v2992_v32 = vadd.f32 %v2974_v33, %v2938_v21 }
 0x1cc   :  { %7327 = vst [vmem:[#allocation16_spill] sm:$0xff] %v5978_v19  ;;  %v5986_v40 = vpop.permute.xlu0 %1820  ;;  %2682 = vrot.lane.b32.xlu1 %v7331_v46, %s3789_s10  ;;  %v2993_v16 = vadd.f32 %v2977_v39, %v2939_v38  ;;  %v3031_v29 = vsel %vm263_vm2, %v3029_v62, %v3030_v54  ;;  %v3059_v3 = vrot.slane %v5886_v48, 6  ;;  %v3060_v15 = vrot.slane %v5898_v36, 6  ;;  %v7336_v39 = vld [vmem:[#allocation102_spill] sm:$0xff] }
 0x1cd   :  { %7328 = vst [vmem:[#allocation34_spill] sm:$0xff] %v5980_v20  ;;  %7329 = vst [vmem:[#allocation45_spill] sm:$0xff] %v5983_v49  ;;  %v5995_v23 = vadd.f32 %v5980_v20, %v5978_v19  ;;  %v7333_v49 = vld [vmem:[#allocation66_spill] sm:$0xff]  ;;  %v3146_v30 = vadd.f32 %v3134_v41, %v3116_v52  ;;  %v3028_v53 = vsel %vm263_vm2, %v3026_v18, %v3027_v11  ;;  %v3056_v21 = vrot.slane %v5820_v28, 6 }
 0x1ce   :  { %7330 = vst [vmem:[#allocation88_spill] sm:$0xff] %v5986_v40  ;;  %2678 = vrot.lane.b32.xlu0 %v7333_v49, %s3789_s10  ;;  %v6002_v46 = vpop.permute.xlu1 %1856  ;;  %v3057_v33 = vrot.slane %v5837_v43, 6  ;;  %v2646_v62 = vmul.f32 0.26601171, %v7336_v39  ;;  %v3047_v48 = vadd.f32 %v3031_v29, %v2993_v16  ;;  %v3046_v36 = vadd.f32 %v3028_v53, %v2992_v32  ;;  %v7339_v32 = vld [vmem:[#allocation68_spill] sm:$0xff]  ;;  %v7341_v53 = vld [vmem:[#allocation103_spill] sm:$0xff] }
 0x1cf   :  { %7332 = vst [vmem:[#allocation51_spill] sm:$0xff] %v5995_v23  ;;  %7334 = vst [vmem:[#allocation90_spill] sm:$0xff] %v6002_v46  ;;  %v3061_v54 = vsel %vm294_vm3, %v3059_v3, %v3060_v15  ;;  %v3089_v49 = vrot.slane %v5860_v58, 7  ;;  %v3090_v52 = vrot.slane %v5873_v24, 7  ;;  %v6016_v28 = vadd.f32 %v3164_v22, %v3146_v30  ;;  %v3724_v22 = vld [vmem:[#allocation2 + $0x40] sm:$0xff] }
 0x1d0   :  { %v6007_v38 = vpop.permute.xlu0 %2510  ;;  %3202 = vrot.lane.b32.xlu1 %v5991_v59, %s3784_s1  ;;  %v3058_v41 = vsel %vm294_vm3, %v3056_v21, %v3057_v33  ;;  %v3086_v18 = vrot.slane %v5810_v25, 7  ;;  %v3087_v11 = vrot.slane %v5813_v34, 7  ;;  %v3077_v58 = vadd.f32 %v3061_v54, %v3047_v48  ;;  %v3725_v34 = vld [vmem:[#allocation4 + $0x40] sm:$0xff] }
 0x1d1   :  { %7335 = vst [vmem:[#allocation42_spill] sm:$0xff] %v6007_v38  ;;  %7337 = vst [vmem:[#allocation48_spill] sm:$0xff] %v6016_v28  ;;  %v3076_v29 = vadd.f32 %v3058_v41, %v3046_v36  ;;  %v3091_v24 = vsel %vm325_vm4, %v3089_v49, %v3090_v52  ;;  %v6030_v30 = vmul.f32 0.007598758, %v6016_v28  ;;  %v2818_v3 = vmul.f32 %v3725_v34, %v3724_v22  ;;  %v7342_v49 = vld [vmem:[#allocation105_spill] sm:$0xff] }
 0x1d2   :  { %1972 = vrot.lane.b32.xlu0 %v1956_v31, %s3788_s9  ;;  %v6018_v43 = vpop.permute.xlu1 %2516  ;;  %v3088_v25 = vsel %vm325_vm4, %v3086_v18, %v3087_v11  ;;  %v3107_v21 = vadd.f32 %v3091_v24, %v3077_v58  ;;  %v3113_v33 = vmul.f32 0.036000773, %v5845_v8  ;;  %v3112_v36 = vmul.f32 0.036000773, %v5779_v56  ;;  %v3726_v11 = vld [vmem:[#allocation2 + $0x48] sm:$0xff] }
 0x1d3   :  { %7338 = vst [vmem:[#allocation30_spill] sm:$0xff] %v6018_v43  ;;  %7340 = vst [vmem:[#allocation25_spill] sm:$0xff] %v6030_v30  ;;  %v3106_v48 = vadd.f32 %v3088_v25, %v3076_v29  ;;  %v3124_v54 = vmul.f32 0.007598758, %v5779_v56  ;;  %v1957_v52 = vmul.f32 0.26601171, %v7342_v49 }
 0x1d4   :  { %v6023_v16 = vpop.permute.xlu0 %1824  ;;  %1994 = vrot.lane.b32.xlu1 %v7339_v32, %s3789_s10  ;;  %v2832_v18 = vmul.f32 0.007598758, %v2818_v3  ;;  %v3727_v32 = vld [vmem:[#allocation4 + $0x48] sm:$0xff]  ;;  %v3119_v29 = vadd.f32 %v3113_v33, %v3107_v21  ;;  %v3155_v22 = vmul.f32 0.0010283801, %v5845_v8  ;;  %v7413_v43 = vld [vmem:[#allocation39_spill] sm:$0xff] }
 0x1d5   :  { %v6048_v58 = vmul.f32 %v3727_v32, %v3726_v11  ;;  %v3118_v34 = vadd.f32 %v3112_v36, %v3106_v48  ;;  %v3154_v9 = vmul.f32 0.0010283801, %v5779_v56  ;;  %v2826_v23 = vmul.f32 0.0010283801, %v2818_v3 }
 0x1d6   :  { %2662 = vrot.lane.b32.xlu0 %v2646_v62, %s3788_s9  ;;  %v6032_v31 = vpop.permute.xlu1 %2548  ;;  %v3125_v62 = vmul.f32 0.007598758, %v5845_v8  ;;  %v2844_v11 = vrot.slane %v2832_v18, 1  ;;  %v2862_v32 = vmul.f32 0.036000773, %v2818_v3  ;;  %v7345_v8 = vld [vmem:[#allocation108_spill] sm:$0xff] }
 0x1d7   :  { %v6059_v63 = vmul.f32 0.10936069, %v2818_v3  ;;  %v6062_v19 = vmul.f32 0.10936069, %v6048_v58  ;;  %v3167_v33 = vrot.slane %v3155_v22, 2 }
 0x1d8   :  { %v6035_v15 = vpop.permute.xlu0 %1826  ;;  %2014 = vrot.lane.b32.xlu1 %v7341_v53, %s3790_s11  ;;  %v3137_v25 = vrot.slane %v3125_v62, 1  ;;  %v3136_v53 = vrot.slane %v3124_v54, 1  ;;  %v3166_v62 = vrot.slane %v3154_v9, 2  ;;  %v6068_v48 = vmul.f32 0.21300554, %v2818_v3  ;;  %v7346_v54 = vld [vmem:[#allocation109_spill] sm:$0xff] }
 0x1d9   :  { %v6071_v36 = vmul.f32 0.21300554, %v6048_v58  ;;  %v2856_v20 = vadd.f32 %v2844_v11, %v2826_v23  ;;  %v2874_v17 = vrot.slane %v2862_v32, 2  ;;  %v2925_v9 = vrot.slane %v6062_v19, 3 }
 0x1da   :  { %3200 = vrot.lane.b32.xlu0 %v6030_v30, %s3784_s1  ;;  %v6046_v41 = vpop.permute.xlu1 %1860  ;;  %v3149_v21 = vadd.f32 %v3137_v25, %v3119_v29  ;;  %v3148_v56 = vadd.f32 %v3136_v53, %v3118_v34  ;;  %v2924_v25 = vrot.slane %v6059_v63, 3  ;;  %v3004_v45 = vmul.f32 0.26601171, %v2818_v3  ;;  %v7350_v3 = vld [vmem:[#allocation20_spill] sm:$0xff] }
 0x1db   :  { %v2979_v23 = vrot.slane %v6071_v36, 4  ;;  %v2886_v11 = vadd.f32 %v2874_v17, %v2856_v20  ;;  %v3005_v42 = vmul.f32 0.26601171, %v6048_v58 }
 0x1dc   :  { %v6050_v24 = vpop.permute.xlu0 %1858  ;;  %2684 = vrot.lane.b32.xlu1 %v5696_v6, %s3789_s10  ;;  %v6084_v34 = vadd.f32 %v3167_v33, %v3149_v21  ;;  %v6086_v53 = vadd.f32 %v3166_v62, %v3148_v56  ;;  %v3731_v21 = vld [vmem:[#allocation4 + $0x58] sm:$0xff]  ;;  %v3032_v50 = vrot.slane %v3004_v45, 5 }
 0x1dd   :  { %7343 = vst [vmem:[#allocation49_spill] sm:$0xff] %v6050_v24  ;;  %v3033_v37 = vrot.slane %v3005_v42, 5  ;;  %v7433_v24 = vld [vmem:[#allocation92_spill] sm:$0xff] }
 0x1de   :  { %1974 = vrot.lane.b32.xlu0 %v1957_v52, %s3788_s9  ;;  %v6057_v1 = vpop.permute.xlu1 %2550  ;;  %v2647_v52 = vmul.f32 0.26601171, %v5380_v57  ;;  %v6102_v62 = vmul.f32 0.007598758, %v6084_v34  ;;  %v6105_v17 = vmul.f32 0.007598758, %v6086_v53 }
 0x1df   :  { %v3034_v55 = vsel %vm263_vm2, %v3032_v50, %v3033_v37 }
 0x1e0   :  { %v6064_v6 = vpop.permute.xlu0 %2546  ;;  %2704 = vrot.lane.b32.xlu1 %v7345_v8, %s3790_s11  ;;  %v3729_v8 = vld [vmem:[#allocation4 + $0x50] sm:$0xff]  ;;  %7348 = vst [vmem:[#allocation18_spill] sm:$0xff] %v6102_v62  ;;  %7349 = vst [vmem:[#allocation23_spill] sm:$0xff] %v6105_v17 }
 0x1e1   :  { %7344 = vst [vmem:[#allocation19_spill] sm:$0xff] %v6064_v6  ;;  %v2820_v29 = vmul.f32 %v3729_v8, %v3728_v0  ;;  %v2926_v8 = vsel %vm153_vm0, %v2924_v25, %v2925_v9 }
 0x1e2   :  { %2012 = vrot.lane.b32.xlu0 %v7346_v54, %s3790_s11  ;;  %v6076_v18 = vpop.permute.xlu1 %1862  ;;  %v2978_v54 = vrot.slane %v6068_v48, 4  ;;  %v2940_v25 = vadd.f32 %v2926_v8, %v2886_v11  ;;  %v3063_v11 = vrot.slane %v6071_v36, 6  ;;  %v3092_v36 = vrot.slane %v6059_v63, 7  ;;  %v7356_v63 = vld [vmem:[#allocation22_spill] sm:$0xff] }
 0x1e3   :  { %v2833_v32 = vmul.f32 0.007598758, %v2820_v29  ;;  %v2827_v9 = vmul.f32 0.0010283801, %v2820_v29 }
 0x1e4   :  { %v6080_v22 = vpop.permute.xlu0 %1828  ;;  %1996 = vrot.lane.b32.xlu1 %v5714_v14, %s3789_s10  ;;  %v3730_v14 = vld [vmem:[#allocation2 + $0x58] sm:$0xff]  ;;  %v2980_v20 = vsel %vm208_vm1, %v2978_v54, %v2979_v23  ;;  %v6122_v54 = vmul.f32 0.036000773, %v5956_v60  ;;  %v3062_v23 = vrot.slane %v6068_v48, 6 }
 0x1e5   :  { %v6095_v33 = vmul.f32 %v3731_v21, %v3730_v14  ;;  %v2845_v14 = vrot.slane %v2833_v32, 1  ;;  %v2863_v21 = vmul.f32 0.036000773, %v2820_v29  ;;  %v2994_v42 = vadd.f32 %v2980_v20, %v2940_v25  ;;  %v7354_v25 = vld [vmem:[#allocation13_spill] sm:$0xff] }
 0x1e6   :  { %2664 = vrot.lane.b32.xlu0 %v2647_v52, %s3788_s9  ;;  %v6091_v0 = vpop.permute.xlu1 %1894  ;;  %v3093_v20 = vrot.slane %v6062_v19, 7  ;;  %v3064_v37 = vsel %vm294_vm3, %v3062_v23, %v3063_v11  ;;  %v7357_v19 = vld [vmem:[#allocation8_spill] sm:$0xff] }
 0x1e7   :  { %7347 = vst [vmem:[#allocation35_spill] sm:$0xff] %v6091_v0  ;;  %v6115_v27 = vmul.f32 0.10936069, %v6095_v33  ;;  %v2857_v32 = vadd.f32 %v2845_v14, %v2827_v9  ;;  %v2875_v8 = vrot.slane %v2863_v21, 2  ;;  %v2953_v13 = vmul.f32 0.21300554, %v6095_v33 }
 0x1e8   :  { %v6097_v56 = vpop.permute.xlu0 %2518  ;;  %2686 = vrot.lane.b32.xlu1 %v5720_v47, %s3789_s10  ;;  %v6112_v47 = vmul.f32 0.10936069, %v2820_v29  ;;  %v3048_v50 = vadd.f32 %v3034_v55, %v2994_v42  ;;  %v3007_v46 = vmul.f32 0.26601171, %v6095_v33  ;;  %v6154_v55 = vmul.f32 0.036000773, %v6016_v28 }
 0x1e9   :  { %v2928_v44 = vrot.slane %v6115_v27, 3  ;;  %v2887_v14 = vadd.f32 %v2875_v8, %v2857_v32  ;;  %v2982_v38 = vrot.slane %v2953_v13, 4  ;;  %v7423_v0 = vld [vmem:[#allocation76_spill] sm:$0xff] }
 0x1ea   :  { %2702 = vrot.lane.b32.xlu0 %v7350_v3, %s3790_s11  ;;  %v6110_v52 = vpop.permute.xlu1 %2552  ;;  %v2952_v3 = vmul.f32 0.21300554, %v2820_v29  ;;  %v2927_v5 = vrot.slane %v6112_v47, 3  ;;  %v3078_v11 = vadd.f32 %v3064_v37, %v3048_v50  ;;  %v3036_v32 = vrot.slane %v3007_v46, 5  ;;  %v7361_v37 = vld [vmem:[#allocation37_spill] sm:$0xff] }
 0x1eb   :  { %7351 = vst [vmem:[#allocation59_spill] sm:$0xff] %v6110_v52  ;;  %v3114_v50 = vmul.f32 0.036000773, %v6048_v58  ;;  %v3066_v46 = vrot.slane %v2953_v13, 6  ;;  %v3096_v13 = vrot.slane %v6115_v27, 7  ;;  %v7406_v52 = vld [vmem:[#allocation95_spill] sm:$0xff] }
 0x1ec   :  { %v6117_v26 = vpop.permute.xlu0 %1830  ;;  %3206 = vrot.lane.b32.xlu1 %v6102_v62, %s3784_s1  ;;  %v2981_v21 = vrot.slane %v2952_v3, 4  ;;  %v2929_v6 = vsel %vm153_vm0, %v2927_v5, %v2928_v44  ;;  %v3094_v44 = vsel %vm325_vm4, %v3092_v36, %v3093_v20  ;;  %v7415_v62 = vld [vmem:[#allocation74_spill] sm:$0xff] }
 0x1ed   :  { %7352 = vst [vmem:[#allocation21_spill] sm:$0xff] %v6117_v26  ;;  %v2941_v42 = vadd.f32 %v2929_v6, %v2887_v14  ;;  %v3126_v6 = vmul.f32 0.007598758, %v6048_v58 }
 0x1ee   :  { %3204 = vrot.lane.b32.xlu0 %v6105_v17, %s3784_s1  ;;  %v6128_v45 = vpop.permute.xlu1 %2584  ;;  %v2983_v5 = vsel %vm208_vm1, %v2981_v21, %v2982_v38 }
 0x1ef   :  { %v2995_v36 = vadd.f32 %v2983_v5, %v2941_v42 }
 0x1f0   :  { %v6134_v48 = vpop.permute.xlu0 %1892  ;;  %3238 = vrot.lane.b32.xlu1 %v6122_v54, %s3785_s6 }
 0x1f1   :  { %7353 = vst [vmem:[#allocation40_spill] sm:$0xff] %v6134_v48  ;;  %v3006_v48 = vmul.f32 0.26601171, %v2820_v29 }
 0x1f2   :  { %2016 = vrot.lane.b32.xlu0 %v7354_v25, %s3790_s11  ;;  %v6142_v9 = vpop.permute.xlu1 %1896  ;;  %v7359_v25 = vld [vmem:[#allocation96_spill] sm:$0xff] }
 0x1f3   :  { %v3035_v29 = vrot.slane %v3006_v48, 5  ;;  %v3065_v48 = vrot.slane %v2952_v3, 6  ;;  %v3095_v3 = vrot.slane %v6112_v47, 7 }
 0x1f4   :  { %v6147_v26 = vpop.permute.xlu0 %2520  ;;  %2018 = vrot.lane.b32.xlu1 %v7356_v63, %s3790_s11 }
 0x1f5   :  { %7355 = vst [vmem:[#allocation15_spill] sm:$0xff] %v6147_v26  ;;  %v3037_v38 = vsel %vm263_vm2, %v3035_v29, %v3036_v32  ;;  %v3067_v42 = vsel %vm294_vm3, %v3065_v48, %v3066_v46  ;;  %v7364_v29 = vld [vmem:[#allocation94_spill] sm:$0xff]  ;;  %v7365_v32 = vld [vmem:[#allocation83_spill] sm:$0xff]  ;;  %v3097_v47 = vsel %vm325_vm4, %v3095_v3, %v3096_v13  ;;  %v3115_v46 = vmul.f32 0.036000773, %v6095_v33 }
 0x1f6   :  { %2706 = vrot.lane.b32.xlu0 %v7357_v19, %s3790_s11  ;;  %v6156_v23 = vpop.permute.xlu1 %2586  ;;  %v3108_v19 = vadd.f32 %v3094_v44, %v3078_v11  ;;  %v3138_v11 = vrot.slane %v3126_v6, 1  ;;  %v3156_v44 = vmul.f32 0.0010283801, %v6048_v58  ;;  %v3157_v13 = vmul.f32 0.0010283801, %v6095_v33  ;;  %v7388_v26 = vld [vmem:[#allocation79_spill] sm:$0xff] }
 0x1f8   :  { %v6160_v8 = vpop.permute.xlu0 %2582  ;;  %2038 = vrot.lane.b32.xlu1 %v7359_v25, %s3791_s12  ;;  %v3120_v21 = vadd.f32 %v3114_v50, %v3108_v19  ;;  %v3049_v25 = vadd.f32 %v3037_v38, %v2995_v36  ;;  %v3168_v50 = vrot.slane %v3156_v44, 2  ;;  %v7370_v44 = vld [vmem:[#allocation99_spill] sm:$0xff] }
 0x1f9   :  { %7358 = vst [vmem:[#allocation44_spill] sm:$0xff] %v6160_v8 }
 0x1fa   :  { %3236 = vrot.lane.b32.xlu0 %v6154_v55, %s3785_s6  ;;  %v6166_v63 = vpop.permute.xlu1 %1898  ;;  %v3150_v58 = vadd.f32 %v3138_v11, %v3120_v21  ;;  %v3079_v6 = vadd.f32 %v3067_v42, %v3049_v25  ;;  %v7369_v11 = vld [vmem:[#allocation97_spill] sm:$0xff] }
 0x1fb   :  { %7360 = vst [vmem:[#allocation12_spill] sm:$0xff] %v6166_v63 }
 0x1fc   :  { %v6171_v20 = vpop.permute.xlu0 %1864  ;;  %2708 = vrot.lane.b32.xlu1 %v7361_v37, %s3790_s11  ;;  %v6201_v27 = vadd.f32 %v3168_v50, %v3150_v58  ;;  %v3109_v48 = vadd.f32 %v3097_v47, %v3079_v6  ;;  %v3127_v37 = vmul.f32 0.007598758, %v6095_v33  ;;  %v6224_v58 = vmul.f32 0.036000773, %v6084_v34 }
 0x1fd   :  { %v3169_v47 = vrot.slane %v3157_v13, 2  ;;  %v6235_v33 = vmul.f32 0.10936069, %v5956_v60 }
 0x1fe   :  { %1998 = vrot.lane.b32.xlu0 %v5732_v35, %s3789_s10  ;;  %v6177_v14 = vpop.permute.xlu1 %1930  ;;  %v6188_v35 = vmul.f32 0.036000773, %v6086_v53  ;;  %v6214_v25 = vmul.f32 0.007598758, %v6201_v27  ;;  %v3121_v42 = vadd.f32 %v3115_v46, %v3109_v48  ;;  %v3139_v3 = vrot.slane %v3127_v37, 1  ;;  %v7375_v48 = vld [vmem:[#allocation67_spill] sm:$0xff] }
 0x1ff   :  { %7362 = vst [vmem:[#allocation38_spill] sm:$0xff] %v6177_v14 }
 0x200   :  { %v6183_v5 = vpop.permute.xlu0 %2554  ;;  %2728 = vrot.lane.b32.xlu1 %v7364_v29, %s3791_s12  ;;  %7371 = vst [vmem:[#allocation64_spill] sm:$0xff] %v6214_v25  ;;  %v3151_v6 = vadd.f32 %v3139_v3, %v3121_v42  ;;  %v7377_v42 = vld [vmem:[#allocation69_spill] sm:$0xff] }
 0x201   :  { %7363 = vst [vmem:[#allocation32_spill] sm:$0xff] %v6183_v5 }
 0x202   :  { %2036 = vrot.lane.b32.xlu0 %v7365_v32, %s3791_s12  ;;  %v6192_v19 = vpop.permute.xlu1 %2588  ;;  %v7373_v32 = vld [vmem:[#allocation98_spill] sm:$0xff]  ;;  %v6239_v46 = vadd.f32 %v3169_v47, %v3151_v6  ;;  %v7381_v6 = vld [vmem:[#allocation100_spill] sm:$0xff]  ;;  %v6261_v47 = vmul.f32 0.10936069, %v6016_v28 }
 0x203   :  { %7366 = vst [vmem:[#allocation52_spill] sm:$0xff] %v6192_v19 }
 0x204   :  { %v6195_v36 = vpop.permute.xlu0 %1866  ;;  %3240 = vrot.lane.b32.xlu1 %v6188_v35, %s3785_s6  ;;  %v6250_v3 = vmul.f32 0.007598758, %v6239_v46 }
 0x205   :  { %7367 = vst [vmem:[#allocation46_spill] sm:$0xff] %v6195_v36  ;;  %v7398_v36 = vld [vmem:[#allocation81_spill] sm:$0xff] }
 0x206   :  { %2688 = vrot.lane.b32.xlu0 %v5751_v2, %s3789_s10  ;;  %v6203_v38 = vpop.permute.xlu1 %2620  ;;  %7378 = vst [vmem:[#allocation50_spill] sm:$0xff] %v6250_v3 }
 0x208   :  { %v6207_v21 = vpop.permute.xlu0 %1928  ;;  %2040 = vrot.lane.b32.xlu1 %v7369_v11, %s3791_s12 }
 0x209   :  { %7368 = vst [vmem:[#allocation71_spill] sm:$0xff] %v6207_v21  ;;  %v7389_v21 = vld [vmem:[#allocation78_spill] sm:$0xff] }
 0x20a   :  { %2726 = vrot.lane.b32.xlu0 %v7370_v44, %s3791_s12  ;;  %v6216_v2 = vpop.permute.xlu1 %1932 }
 0x20c   :  { %v6219_v29 = vpop.permute.xlu0 %2556  ;;  %2730 = vrot.lane.b32.xlu1 %v7373_v32, %s3791_s12 }
 0x20d   :  { %7372 = vst [vmem:[#allocation47_spill] sm:$0xff] %v6219_v29 }
 0x20e   :  { %3208 = vrot.lane.b32.xlu0 %v6214_v25, %s3784_s1  ;;  %v6228_v50 = vpop.permute.xlu1 %2622 }
 0x210   :  { %v6230_v11 = vpop.permute.xlu0 %2618  ;;  %3242 = vrot.lane.b32.xlu1 %v6224_v58, %s3785_s6 }
 0x211   :  { %7374 = vst [vmem:[#allocation43_spill] sm:$0xff] %v6230_v11 }
 0x212   :  { %2020 = vrot.lane.b32.xlu0 %v7375_v48, %s3790_s11  ;;  %v6241_v37 = vpop.permute.xlu1 %1934 }
 0x213   :  { %7376 = vst [vmem:[#allocation41_spill] sm:$0xff] %v6241_v37 }
 0x214   :  { %v6243_v44 = vpop.permute.xlu0 %1900  ;;  %3274 = vrot.lane.b32.xlu1 %v6235_v33, %s3786_s7 }
 0x216   :  { %2710 = vrot.lane.b32.xlu0 %v7377_v42, %s3790_s11  ;;  %v6252_v13 = vpop.permute.xlu1 %1966  ;;  %v7384_v42 = vld [vmem:[#allocation11_spill] sm:$0xff] }
 0x217   :  { %7379 = vst [vmem:[#allocation55_spill] sm:$0xff] %v6252_v13 }
 0x218   :  { %v6254_v32 = vpop.permute.xlu0 %2590  ;;  %2042 = vrot.lane.b32.xlu1 %v7381_v6, %s3791_s12  ;;  %v7386_v6 = vld [vmem:[#allocation106_spill] sm:$0xff] }
 0x219   :  { %7380 = vst [vmem:[#allocation53_spill] sm:$0xff] %v6254_v32 }
 0x21a   :  { %3210 = vrot.lane.b32.xlu0 %v6250_v3, %s3784_s1  ;;  %v6263_v48 = vpop.permute.xlu1 %2624 }
 0x21b   :  { %7382 = vst [vmem:[#allocation65_spill] sm:$0xff] %v6263_v48 }
 0x21c   :  { %v6265_v11 = vpop.permute.xlu0 %1902  ;;  %2062 = vrot.lane.b32.xlu1 %v7384_v42, %s3792_s13  ;;  %v6286_v42 = vmul.f32 0.10936069, %v6086_v53 }
 0x21d   :  { %7383 = vst [vmem:[#allocation61_spill] sm:$0xff] %v6265_v11 }
 0x21e   :  { %3272 = vrot.lane.b32.xlu0 %v6261_v47, %s3786_s7  ;;  %v6271_v25 = vpop.permute.xlu1 %2656 }
 0x220   :  { %v6273_v8 = vpop.permute.xlu0 %1964  ;;  %2732 = vrot.lane.b32.xlu1 %v7386_v6, %s3791_s12 }
 0x221   :  { %7385 = vst [vmem:[#allocation66_spill] sm:$0xff] %v6273_v8 }
 0x222   :  { %2022 = vrot.lane.b32.xlu0 %v5683_v4, %s3790_s11  ;;  %v6279_v3 = vpop.permute.xlu1 %1968 }
 0x224   :  { %v6281_v29 = vpop.permute.xlu0 %2592  ;;  %2752 = vrot.lane.b32.xlu1 %v7388_v26, %s3792_s13  ;;  %v7393_v26 = vld [vmem:[#allocation91_spill] sm:$0xff] }
 0x225   :  { %7387 = vst [vmem:[#allocation102_spill] sm:$0xff] %v6281_v29  ;;  %v7394_v29 = vld [vmem:[#allocation80_spill] sm:$0xff] }
 0x226   :  { %2060 = vrot.lane.b32.xlu0 %v7389_v21, %s3792_s13  ;;  %v6290_v8 = vpop.permute.xlu1 %2658  ;;  %v6307_v21 = vmul.f32 0.036000773, %v6201_v27 }
 0x228   :  { %v6292_v11 = vpop.permute.xlu0 %2654  ;;  %3276 = vrot.lane.b32.xlu1 %v6286_v42, %s3786_s7  ;;  %7395 = vst [vmem:[#allocation108_spill] sm:$0xff] %v6307_v21 }
 0x229   :  { %7390 = vst [vmem:[#allocation68_spill] sm:$0xff] %v6292_v11 }
 0x22a   :  { %2712 = vrot.lane.b32.xlu0 %v5748_v10, %s3790_s11  ;;  %v6298_v4 = vpop.permute.xlu1 %1970  ;;  %v6316_v10 = vmul.f32 0.10936069, %v6084_v34 }
 0x22b   :  { %7391 = vst [vmem:[#allocation103_spill] sm:$0xff] %v6298_v4 }
 0x22c   :  { %v6300_v6 = vpop.permute.xlu0 %1936  ;;  %2064 = vrot.lane.b32.xlu1 %v7393_v26, %s3792_s13 }
 0x22d   :  { %7392 = vst [vmem:[#allocation105_spill] sm:$0xff] %v6300_v6  ;;  %v6440_v6 = vmul.f32 0.0010283801, %v7433_v24  ;;  %v3332_v24 = vmul.f32 0.26601171, %v6016_v28 }
 0x22e   :  { %2750 = vrot.lane.b32.xlu0 %v7394_v29, %s3792_s13  ;;  %v6309_v11 = vpop.permute.xlu1 %1990  ;;  %v6327_v29 = vmul.f32 0.21300554, %v5956_v60 }
 0x22f   :  { %7396 = vst [vmem:[#allocation109_spill] sm:$0xff] %v6309_v11  ;;  %v7401_v11 = vld [vmem:[#allocation26_spill] sm:$0xff] }
 0x230   :  { %v6311_v48 = vpop.permute.xlu0 %2626  ;;  %2754 = vrot.lane.b32.xlu1 %v7398_v36, %s3792_s13 }
 0x231   :  { %7397 = vst [vmem:[#allocation20_spill] sm:$0xff] %v6311_v48  ;;  %v6378_v48 = vmul.f32 0.0010283801, %v7415_v62 }
 0x232   :  { %3244 = vrot.lane.b32.xlu0 %v6307_v21, %s3785_s6  ;;  %v6320_v26 = vpop.permute.xlu1 %2660 }
 0x233   :  { %7399 = vst [vmem:[#allocation13_spill] sm:$0xff] %v6320_v26  ;;  %v7403_v26 = vld [vmem:[#allocation36_spill] sm:$0xff]  ;;  %7416 = vst [vmem:[#allocation98_spill] sm:$0xff] %v6378_v48 }
 0x234   :  { %v6322_v19 = vpop.permute.xlu0 %1938  ;;  %3278 = vrot.lane.b32.xlu1 %v6316_v10, %s3786_s7 }
 0x235   :  { %7400 = vst [vmem:[#allocation22_spill] sm:$0xff] %v6322_v19  ;;  %v6340_v19 = vmul.f32 0.036000773, %v6239_v46 }
 0x236   :  { %2044 = vrot.lane.b32.xlu0 %v7401_v11, %s3791_s12  ;;  %v6331_v36 = vpop.permute.xlu1 %2680  ;;  %v7407_v11 = vld [vmem:[#allocation54_spill] sm:$0xff] }
 0x237   :  { %7404 = vst [vmem:[#allocation96_spill] sm:$0xff] %v6340_v19  ;;  %v6349_v30 = vmul.f32 0.0010283801, %v7407_v11 }
 0x238   :  { %v6333_v40 = vpop.permute.xlu0 %1988  ;;  %3310 = vrot.lane.b32.xlu1 %v6327_v29, %s3787_s8 }
 0x239   :  { %7402 = vst [vmem:[#allocation8_spill] sm:$0xff] %v6333_v40  ;;  %v6354_v40 = vmul.f32 0.21300554, %v6016_v28  ;;  %v7441_v28 = vld [vmem:[#allocation107_spill] sm:$0xff] }
 0x23a   :  { %2734 = vrot.lane.b32.xlu0 %v7403_v26, %s3791_s12  ;;  %v6342_v21 = vpop.permute.xlu1 %1992 }
 0x23c   :  { %v6344_v13 = vpop.permute.xlu0 %2628  ;;  %2066 = vrot.lane.b32.xlu1 %v7406_v52, %s3792_s13 }
 0x23d   :  { %7405 = vst [vmem:[#allocation37_spill] sm:$0xff] %v6344_v13  ;;  %v7411_v13 = vld [vmem:[#allocation93_spill] sm:$0xff] }
 0x23e   :  { %3246 = vrot.lane.b32.xlu0 %v6340_v19, %s3785_s6  ;;  %v6356_v26 = vpop.permute.xlu1 %2682  ;;  %v7412_v19 = vld [vmem:[#allocation75_spill] sm:$0xff] }
 0x23f   :  { %v6371_v14 = vmul.f32 0.0010283801, %v7412_v19 }
 0x240   :  { %v6358_v4 = vpop.permute.xlu0 %2678  ;;  %2092 = vrot.lane.b32.xlu1 %v6349_v30, %s3793_s14 }
 0x241   :  { %7408 = vst [vmem:[#allocation94_spill] sm:$0xff] %v6358_v4 }
 0x242   :  { %3308 = vrot.lane.b32.xlu0 %v6354_v40, %s3787_s8  ;;  %v6364_v52 = vpop.permute.xlu1 %3202 }
 0x243   :  { %7409 = vst [vmem:[#allocation83_spill] sm:$0xff] %v6364_v52  ;;  %v6385_v52 = vmul.f32 0.21300554, %v6086_v53 }
 0x244   :  { %v6366_v11 = vpop.permute.xlu0 %1972  ;;  %2756 = vrot.lane.b32.xlu1 %v7411_v13, %s3792_s13 }
 0x245   :  { %7410 = vst [vmem:[#allocation97_spill] sm:$0xff] %v6366_v11  ;;  %v6403_v11 = vmul.f32 0.0010283801, %v7423_v0  ;;  %v3299_v0 = vmul.f32 0.21300554, %v6084_v34 }
 0x246   :  { %2046 = vrot.lane.b32.xlu0 %v7413_v43, %s3791_s12  ;;  %v6375_v4 = vpop.permute.xlu1 %1994  ;;  %v7420_v43 = vld [vmem:[#allocation14_spill] sm:$0xff] }
 0x247   :  { %7414 = vst [vmem:[#allocation99_spill] sm:$0xff] %v6375_v4  ;;  %v6396_v62 = vmul.f32 0.0010283801, %v7420_v43  ;;  %v7421_v4 = vld [vmem:[#allocation60_spill] sm:$0xff]  ;;  %7424 = vst [vmem:[#allocation106_spill] sm:$0xff] %v6403_v11 }
 0x248   :  { %v6380_v37 = vpop.permute.xlu0 %2662  ;;  %2782 = vrot.lane.b32.xlu1 %v6371_v14, %s3793_s14  ;;  %v6415_v43 = vmul.f32 0.10936069, %v6201_v27 }
 0x249   :  { %7417 = vst [vmem:[#allocation67_spill] sm:$0xff] %v6380_v37 }
 0x24a   :  { %2090 = vrot.lane.b32.xlu0 %v6378_v48, %s3793_s14  ;;  %v6389_v19 = vpop.permute.xlu1 %2014  ;;  %v7430_v48 = vld [vmem:[#allocation101_spill] sm:$0xff] }
 0x24b   :  { %7418 = vst [vmem:[#allocation69_spill] sm:$0xff] %v6389_v19 }
 0x24c   :  { %v6391_v13 = vpop.permute.xlu0 %3200  ;;  %3312 = vrot.lane.b32.xlu1 %v6385_v52, %s3787_s8 }
 0x24d   :  { %7419 = vst [vmem:[#allocation100_spill] sm:$0xff] %v6391_v13  ;;  %v7426_v13 = vld [vmem:[#allocation33_spill] sm:$0xff] }
 0x24e   :  { %2736 = vrot.lane.b32.xlu0 %v7421_v4, %s3791_s12  ;;  %v6400_v37 = vpop.permute.xlu1 %2684  ;;  %v6410_v19 = vmul.f32 0.0010283801, %v7426_v13 }
 0x24f   :  { %7422 = vst [vmem:[#allocation11_spill] sm:$0xff] %v6400_v37 }
 0x250   :  { %v6405_v32 = vpop.permute.xlu0 %1974  ;;  %2094 = vrot.lane.b32.xlu1 %v6396_v62, %s3793_s14 }
 0x251   :  { %7425 = vst [vmem:[#allocation79_spill] sm:$0xff] %v6405_v32 }
 0x252   :  { %2780 = vrot.lane.b32.xlu0 %v6403_v11, %s3793_s14  ;;  %v6417_v4 = vpop.permute.xlu1 %2704  ;;  %v3333_v11 = vmul.f32 0.26601171, %v5956_v60 }
 0x254   :  { %v6419_v37 = vpop.permute.xlu0 %2012  ;;  %2784 = vrot.lane.b32.xlu1 %v6410_v19, %s3793_s14 }
 0x255   :  { %7427 = vst [vmem:[#allocation78_spill] sm:$0xff] %v6419_v37 }
 0x256   :  { %3280 = vrot.lane.b32.xlu0 %v6415_v43, %s3786_s7  ;;  %v6426_v13 = vpop.permute.xlu1 %1996 }
 0x257   :  { %7428 = vst [vmem:[#allocation91_spill] sm:$0xff] %v6426_v13  ;;  %v7434_v13 = vld [vmem:[#allocation104_spill] sm:$0xff] }
 0x258   :  { %v6428_v32 = vpop.permute.xlu0 %2664  ;;  %3314 = vrot.lane.b32.xlu1 %v3299_v0, %s3787_s8 }
 0x259   :  { %7429 = vst [vmem:[#allocation80_spill] sm:$0xff] %v6428_v32  ;;  %v6445_v32 = vmul.f32 0.10936069, %v6239_v46 }
 0x25a   :  { %2068 = vrot.lane.b32.xlu0 %v7430_v48, %s3792_s13  ;;  %v6434_v37 = vpop.permute.xlu1 %2686  ;;  %v7437_v48 = vld [vmem:[#allocation87_spill] sm:$0xff] }
 0x25b   :  { %7431 = vst [vmem:[#allocation81_spill] sm:$0xff] %v6434_v37  ;;  %7435 = vst [vmem:[#allocation36_spill] sm:$0xff] %v6445_v32  ;;  %v3334_v37 = vmul.f32 0.26601171, %v6086_v53 }
 0x25c   :  { %v6436_v63 = vpop.permute.xlu0 %2702  ;;  %3346 = vrot.lane.b32.xlu1 %v3333_v11, %s3788_s9 }
 0x25d   :  { %7432 = vst [vmem:[#allocation26_spill] sm:$0xff] %v6436_v63  ;;  %v6454_v63 = vmul.f32 0.0010283801, %v7437_v48 }
 0x25e   :  { %2758 = vrot.lane.b32.xlu0 %v7434_v13, %s3792_s13  ;;  %v6447_v17 = vpop.permute.xlu1 %3206 }
 0x25f   :  { %7436 = vst [vmem:[#allocation95_spill] sm:$0xff] %v6447_v17  ;;  %7438 = vst [vmem:[#allocation54_spill] sm:$0xff] %v6454_v63 }
 0x260   :  { %v6449_v60 = vpop.permute.xlu0 %3204  ;;  %2096 = vrot.lane.b32.xlu1 %v6440_v6, %s3793_s14 }
 0x262   :  { %3282 = vrot.lane.b32.xlu0 %v6445_v32, %s3786_s7  ;;  %v6459_v11 = vpop.permute.xlu1 %3238  ;;  %v6473_v32 = vmul.f32 0.0010283801, %v7336_v39 }
 0x263   :  { %7439 = vst [vmem:[#allocation93_spill] sm:$0xff] %v6459_v11 }
 0x264   :  { %v6461_v13 = vpop.permute.xlu0 %2016  ;;  %2786 = vrot.lane.b32.xlu1 %v6454_v63, %s3793_s14 }
 0x266   :  { %3344 = vrot.lane.b32.xlu0 %v3332_v24, %s3788_s9  ;;  %v6467_v17 = vpop.permute.xlu1 %2018  ;;  %v3335_v24 = vmul.f32 0.26601171, %v6084_v34 }
 0x267   :  { %7440 = vst [vmem:[#allocation75_spill] sm:$0xff] %v6467_v17  ;;  %v7444_v17 = vld [vmem:[#allocation17_spill] sm:$0xff] }
 0x268   :  { %v6469_v48 = vpop.permute.xlu0 %2706  ;;  %3348 = vrot.lane.b32.xlu1 %v3334_v37, %s3788_s9  ;;  %v3300_v37 = vmul.f32 0.21300554, %v6201_v27 }
 0x26a   :  { %2070 = vrot.lane.b32.xlu0 %v7441_v28, %s3792_s13  ;;  %v6477_v11 = vpop.permute.xlu1 %2038 }
 0x26b   :  { %7442 = vst [vmem:[#allocation39_spill] sm:$0xff] %v6477_v11 }
 0x26c   :  { %v6479_v5 = vpop.permute.xlu0 %3236  ;;  %2788 = vrot.lane.b32.xlu1 %v6473_v32, %s3793_s14 }
 0x26d   :  { %7443 = vst [vmem:[#allocation74_spill] sm:$0xff] %v6479_v5  ;;  %v6494_v5 = vmul.f32 0.0010283801, %v5308_v12 }
 0x26e   :  { %2760 = vrot.lane.b32.xlu0 %v7444_v17, %s3792_s13  ;;  %v6487_v63 = vpop.permute.xlu1 %2708  ;;  %v6501_v17 = vmul.f32 0.0010283801, %v5380_v57 }
 0x26f   :  { %7445 = vst [vmem:[#allocation14_spill] sm:$0xff] %v6487_v63 }
 0x270   :  { %v6489_v39 = vpop.permute.xlu0 %1998  ;;  %3350 = vrot.lane.b32.xlu1 %v3335_v24, %s3788_s9  ;;  %7448 = vst [vmem:[#allocation33_spill] sm:$0xff] %v6501_v17 }
 0x271   :  { %7446 = vst [vmem:[#allocation60_spill] sm:$0xff] %v6489_v39  ;;  %v3301_v39 = vmul.f32 0.21300554, %v6239_v46 }
 0x272   :  { %3316 = vrot.lane.b32.xlu0 %v3300_v37, %s3787_s8  ;;  %v2729_v28 = vpop.permute.xlu1 %2728 }
 0x274   :  { %v6496_v11 = vpop.permute.xlu0 %2036  ;;  %3370 = vrot.lane.b32.xlu1 %v6327_v29, %s3789_s10  ;;  %v6522_v29 = vmul.f32 0.0010283801, %v7342_v49 }
 0x275   :  { %7447 = vst [vmem:[#allocation76_spill] sm:$0xff] %v6496_v11 }
 0x276   :  { %2098 = vrot.lane.b32.xlu0 %v6494_v5, %s3793_s14  ;;  %v3241_v24 = vpop.permute.xlu1 %3240  ;;  %7451 = vst [vmem:[#allocation104_spill] sm:$0xff] %v6522_v29 }
 0x278   :  { %v6506_v63 = vpop.permute.xlu0 %2688  ;;  %2790 = vrot.lane.b32.xlu1 %v6501_v17, %s3793_s14 }
 0x279   :  { %7449 = vst [vmem:[#allocation101_spill] sm:$0xff] %v6506_v63 }
 0x27a   :  { %3318 = vrot.lane.b32.xlu0 %v3301_v39, %s3787_s8  ;;  %v6511_v12 = vpop.permute.xlu1 %2040 }
 0x27c   :  { %v6513_v11 = vpop.permute.xlu0 %2726  ;;  %3372 = vrot.lane.b32.xlu1 %v6385_v52, %s3789_s10 }
 0x27d   :  { %7450 = vst [vmem:[#allocation92_spill] sm:$0xff] %v6513_v11  ;;  %v3336_v11 = vmul.f32 0.26601171, %v6201_v27 }
 0x27e   :  { %3368 = vrot.lane.b32.xlu0 %v6354_v40, %s3789_s10  ;;  %v6519_v57 = vpop.permute.xlu1 %2730  ;;  %v3337_v40 = vmul.f32 0.26601171, %v6239_v46 }
 0x280   :  { %v6524_v63 = vpop.permute.xlu0 %3208  ;;  %3374 = vrot.lane.b32.xlu1 %v3299_v0, %s3789_s10  ;;  %v2529_v0 = vadd.f32 %v5941_v7, %v6371_v14 }
 0x281   :  { %7452 = vst [vmem:[#allocation87_spill] sm:$0xff] %v6524_v63 }
 0x282   :  { %2100 = vrot.lane.b32.xlu0 %v6522_v29, %s3793_s14  ;;  %v6530_v17 = vpop.permute.xlu1 %3242  ;;  %v2565_v29 = vadd.f32 %v6032_v31, %v2529_v0  ;;  %v7459_v0 = vld [vmem:[#allocation49_spill] sm:$0xff] }
 0x284   :  { %v6532_v52 = vpop.permute.xlu0 %2020  ;;  %3394 = vrot.lane.b32.xlu1 %v6235_v33, %s3790_s11 }
 0x285   :  { %7453 = vst [vmem:[#allocation107_spill] sm:$0xff] %v6532_v52  ;;  %v6548_v52 = vmul.f32 0.0010283801, %v6239_v46  ;;  %v1840_v46 = vadd.f32 %v6023_v16, %v6396_v62  ;;  %v6581_v62 = vmul.f32 0.0010283801, %v6086_v53 }
 0x286   :  { %3352 = vrot.lane.b32.xlu0 %v3336_v11, %s3788_s9  ;;  %v6538_v49 = vpop.permute.xlu1 %3274  ;;  %v2601_v11 = vadd.f32 %v6128_v45, %v2565_v29 }
 0x287   :  { %7454 = vst [vmem:[#allocation17_spill] sm:$0xff] %v6538_v49  ;;  %v3220_v53 = vadd.f32 %v6449_v60, %v6581_v62 }
 0x288   :  { %v6542_v63 = vpop.permute.xlu0 %2710  ;;  %3396 = vrot.lane.b32.xlu1 %v6286_v42, %s3790_s11  ;;  %v2637_v7 = vadd.f32 %v6203_v38, %v2601_v11  ;;  %v1876_v38 = vadd.f32 %v6046_v41, %v1840_v46 }
 0x28a   :  { %3354 = vrot.lane.b32.xlu0 %v3337_v40, %s3788_s9  ;;  %v6551_v33 = vpop.permute.xlu1 %2042  ;;  %v2673_v42 = vadd.f32 %v6271_v25, %v2637_v7  ;;  %v1912_v16 = vadd.f32 %v6142_v9, %v1876_v38  ;;  %v7460_v7 = vld [vmem:[#allocation12_spill] sm:$0xff]  ;;  %v7463_v38 = vld [vmem:[#allocation97_spill] sm:$0xff] }
 0x28c   :  { %v3211_v49 = vpop.permute.xlu0 %3210  ;;  %3398 = vrot.lane.b32.xlu1 %v6316_v10, %s3790_s11  ;;  %v2697_v10 = vadd.f32 %v6331_v36, %v2673_v42 }
 0x28d   :  { %v6558_v14 = vadd.f32 %v3211_v49, %v6548_v52 }
 0x28e   :  { %3392 = vrot.lane.b32.xlu0 %v6261_v47, %s3790_s11  ;;  %v6562_v31 = vpop.permute.xlu1 %2062  ;;  %v2530_v47 = vadd.f32 %v5972_v61, %v6410_v19  ;;  %v2721_v25 = vadd.f32 %v6417_v4, %v2697_v10 }
 0x290   :  { %v6567_v45 = vpop.permute.xlu0 %3272  ;;  %3418 = vrot.lane.b32.xlu1 %v6122_v54, %s3791_s12  ;;  %v2566_v41 = vadd.f32 %v6057_v1, %v2530_v47  ;;  %v1948_v54 = vadd.f32 %v6216_v2, %v1912_v16  ;;  %v2745_v36 = vadd.f32 %v2729_v28, %v2721_v25  ;;  %v3256_v2 = vadd.f32 %v3241_v24, %v3220_v53  ;;  %v7464_v47 = vld [vmem:[#allocation95_spill] sm:$0xff] }
 0x291   :  { %v7465_v25 = vld [vmem:[#allocation87_spill] sm:$0xff] }
 0x292   :  { %3376 = vrot.lane.b32.xlu0 %v3300_v37, %s3789_s10  ;;  %v6574_v29 = vpop.permute.xlu1 %2732  ;;  %v2602_v9 = vadd.f32 %v6156_v23, %v2566_v41  ;;  %v1984_v19 = vadd.f32 %v6279_v3, %v1948_v54  ;;  %v1842_v3 = vadd.f32 %v6080_v22, %v6494_v5  ;;  %v1841_v22 = vadd.f32 %v6035_v15, %v6440_v6 }
 0x293   :  { %v6622_v5 = vmul.f32 0.0010283801, %v6084_v34  ;;  %v1839_v15 = vadd.f32 %v5909_v51, %v6349_v30  ;;  %v7455_v34 = vld [vmem:[#allocation32_spill] sm:$0xff]  ;;  %v7461_v51 = vld [vmem:[#allocation53_spill] sm:$0xff] }
 0x294   :  { %v6583_v40 = vpop.permute.xlu0 %2022  ;;  %3420 = vrot.lane.b32.xlu1 %v6188_v35, %s3791_s12  ;;  %v2638_v1 = vadd.f32 %v6228_v50, %v2602_v9  ;;  %v2008_v35 = vadd.f32 %v6342_v21, %v1984_v19  ;;  %v7468_v19 = vld [vmem:[#allocation20_spill] sm:$0xff] }
 0x295   :  { %v1875_v11 = vadd.f32 %v7459_v0, %v1839_v15  ;;  %v3221_v16 = vadd.f32 %v7464_v47, %v6622_v5  ;;  %v7476_v15 = vld [vmem:[#allocation25_spill] sm:$0xff] }
 0x296   :  { %3378 = vrot.lane.b32.xlu0 %v3301_v39, %s3789_s10  ;;  %v2753_v61 = vpop.permute.xlu1 %2752  ;;  %v2674_v60 = vadd.f32 %v6290_v8, %v2638_v1  ;;  %v2032_v39 = vadd.f32 %v6461_v13, %v2008_v35  ;;  %v2532_v8 = vadd.f32 %v6097_v56, %v6473_v32  ;;  %v1877_v56 = vadd.f32 %v6076_v18, %v1841_v22  ;;  %v7462_v18 = vld [vmem:[#allocation36_spill] sm:$0xff]  ;;  %v7469_v35 = vld [vmem:[#allocation18_spill] sm:$0xff] }
 0x297   :  { %v6594_v4 = vadd.f32 %v2753_v61, %v2745_v36  ;;  %v7467_v61 = vld [vmem:[#allocation41_spill] sm:$0xff] }
 0x298   :  { %v6596_v37 = vpop.permute.xlu0 %2060  ;;  %3422 = vrot.lane.b32.xlu1 %v6224_v58, %s3791_s12  ;;  %v1878_v58 = vadd.f32 %v6171_v20, %v1842_v3  ;;  %v2698_v50 = vadd.f32 %v6356_v26, %v2674_v60  ;;  %v6629_v26 = vmul.f32 0.0010283801, %v6201_v27  ;;  %v2568_v32 = vadd.f32 %v7455_v34, %v2532_v8  ;;  %v7471_v3 = vld [vmem:[#allocation91_spill] sm:$0xff]  ;;  %v7474_v8 = vld [vmem:[#allocation38_spill] sm:$0xff] }
 0x299   :  { %v1913_v46 = vadd.f32 %v7460_v7, %v1877_v56  ;;  %v7477_v34 = vld [vmem:[#allocation67_spill] sm:$0xff] }
 0x29a   :  { %3416 = vrot.lane.b32.xlu0 %v6154_v55, %s3791_s12  ;;  %v3277_v23 = vpop.permute.xlu1 %3276  ;;  %v2056_v55 = vadd.f32 %v6511_v12, %v2032_v39  ;;  %v2722_v20 = vadd.f32 %v6469_v48, %v2698_v50  ;;  %v7458_v48 = vld [vmem:[#allocation24_spill] sm:$0xff]  ;;  %v2604_v30 = vadd.f32 %v7461_v51, %v2568_v32  ;;  %v3222_v41 = vadd.f32 %v7465_v25, %v6629_v26  ;;  %v7472_v50 = vld [vmem:[#allocation54_spill] sm:$0xff]  ;;  %v7482_v51 = vld [vmem:[#allocation99_spill] sm:$0xff] }
 0x29b   :  { %v6608_v28 = vadd.f32 %v3277_v23, %v3256_v2  ;;  %v3183_v12 = vmul.f32 0.0010283801, %v7458_v48  ;;  %v1949_v9 = vadd.f32 %v7467_v61, %v1913_v46  ;;  %v7470_v2 = vld [vmem:[#allocation83_spill] sm:$0xff]  ;;  %v3257_v39 = vadd.f32 %v6530_v17, %v3221_v16  ;;  %v7485_v16 = vld [vmem:[#allocation98_spill] sm:$0xff]  ;;  %v7486_v25 = vld [vmem:[#allocation88_spill] sm:$0xff] }
 0x29c   :  { %v6610_v49 = vpop.permute.xlu0 %2712  ;;  %3442 = vrot.lane.b32.xlu1 %v5991_v59, %s3792_s13  ;;  %v1914_v59 = vadd.f32 %v6243_v44, %v1878_v58  ;;  %v7457_v44 = vld [vmem:[#allocation105_spill] sm:$0xff]  ;;  %v2746_v27 = vadd.f32 %v6519_v57, %v2722_v20  ;;  %v7466_v57 = vld [vmem:[#allocation35_spill] sm:$0xff]  ;;  %v2640_v53 = vadd.f32 %v7468_v19, %v2604_v30 }
 0x29d   :  { %v1911_v36 = vadd.f32 %v7466_v57, %v1875_v11  ;;  %v3219_v23 = vadd.f32 %v7470_v2, %v3183_v12  ;;  %v7481_v11 = vld [vmem:[#allocation55_spill] sm:$0xff]  ;;  %v7487_v57 = vld [vmem:[#allocation104_spill] sm:$0xff]  ;;  %v7492_v2 = vld [vmem:[#allocation109_spill] sm:$0xff] }
 0x29e   :  { %3400 = vrot.lane.b32.xlu0 %v6415_v43, %s3790_s11  ;;  %v2065_v21 = vpop.permute.xlu1 %2064  ;;  %v7456_v43 = vld [vmem:[#allocation23_spill] sm:$0xff]  ;;  %v1950_v24 = vadd.f32 %v7457_v44, %v1914_v59  ;;  %v2676_v32 = vadd.f32 %v7477_v34, %v2640_v53  ;;  %v7490_v53 = vld [vmem:[#allocation48_spill] sm:$0xff] }
 0x29f   :  { %v6631_v13 = vadd.f32 %v2065_v21, %v2056_v55  ;;  %v7473_v55 = vld [vmem:[#allocation30_spill] sm:$0xff]  ;;  %v1947_v21 = vadd.f32 %v7474_v8, %v1911_v36  ;;  %v7475_v59 = vld [vmem:[#allocation103_spill] sm:$0xff]  ;;  %v7488_v36 = vld [vmem:[#allocation21_spill] sm:$0xff] }
 0x2a0   :  { %v6637_v6 = vpop.permute.xlu0 %2750  ;;  %3444 = vrot.lane.b32.xlu1 %v7456_v43, %s3792_s13  ;;  %v1986_v10 = vadd.f32 %v7463_v38, %v1950_v24  ;;  %v2531_v22 = vadd.f32 %v7473_v55, %v7472_v50  ;;  %v1985_v20 = vadd.f32 %v7475_v59, %v1949_v9  ;;  %v7478_v43 = vld [vmem:[#allocation93_spill] sm:$0xff]  ;;  %v7479_v24 = vld [vmem:[#allocation107_spill] sm:$0xff]  ;;  %v1843_v61 = vadd.f32 %v7488_v36, %v7487_v57  ;;  %v7489_v9 = vld [vmem:[#allocation52_spill] sm:$0xff] }
 0x2a1   :  { %v3255_v44 = vadd.f32 %v7478_v43, %v3219_v23  ;;  %v1983_v7 = vadd.f32 %v7481_v11, %v1947_v21  ;;  %v7484_v38 = vld [vmem:[#allocation17_spill] sm:$0xff]  ;;  %v7494_v55 = vld [vmem:[#allocation90_spill] sm:$0xff] }
 0x2a2   :  { %3402 = vrot.lane.b32.xlu0 %v7462_v18, %s3790_s11  ;;  %v2755_v42 = vpop.permute.xlu1 %2754  ;;  %v2010_v60 = vadd.f32 %v7471_v3, %v1986_v10  ;;  %v2009_v30 = vadd.f32 %v7482_v51, %v1985_v20  ;;  %v7483_v18 = vld [vmem:[#allocation81_spill] sm:$0xff]  ;;  %v7493_v3 = vld [vmem:[#allocation75_spill] sm:$0xff]  ;;  %v7495_v8 = vld [vmem:[#allocation46_spill] sm:$0xff] }
 0x2a3   :  { %v6654_v54 = vadd.f32 %v2755_v42, %v2746_v27  ;;  %v7480_v27 = vld [vmem:[#allocation59_spill] sm:$0xff]  ;;  %v2700_v42 = vadd.f32 %v7483_v18, %v2676_v32  ;;  %v3291_v10 = vadd.f32 %v7484_v38, %v3255_v44  ;;  %v2007_v23 = vadd.f32 %v7492_v2, %v1983_v7  ;;  %v7496_v20 = vld [vmem:[#allocation65_spill] sm:$0xff]  ;;  %v7498_v44 = vld [vmem:[#allocation40_spill] sm:$0xff] }
 0x2a4   :  { %v3245_v1 = vpop.permute.xlu0 %3244  ;;  %3446 = vrot.lane.b32.xlu1 %v7469_v35, %s3792_s13  ;;  %v2034_v48 = vadd.f32 %v7479_v24, %v2010_v60  ;;  %v2567_v0 = vadd.f32 %v7480_v27, %v2531_v22  ;;  %v2033_v60 = vadd.f32 %v7493_v3, %v2009_v30  ;;  %v1879_v21 = vadd.f32 %v7495_v8, %v1843_v61  ;;  %v7499_v24 = vld [vmem:[#allocation61_spill] sm:$0xff]  ;;  %v7500_v27 = vld [vmem:[#allocation96_spill] sm:$0xff]  ;;  %v7503_v51 = vld [vmem:[#allocation39_spill] sm:$0xff] }
 0x2a5   :  { %v6664_v58 = vadd.f32 %v3245_v1, %v3222_v41  ;;  %v1838_v41 = vadd.f32 %v7486_v25, %v7485_v16  ;;  %v3182_v1 = vmul.f32 0.0010283801, %v7490_v53  ;;  %v7501_v11 = vld [vmem:[#allocation13_spill] sm:$0xff]  ;;  %v7505_v38 = vld [vmem:[#allocation22_spill] sm:$0xff]  ;;  %v7506_v25 = vld [vmem:[#allocation11_spill] sm:$0xff] }
 0x2a6   :  { %3440 = vrot.lane.b32.xlu0 %v7476_v15, %s3792_s13  ;;  %v3279_v56 = vpop.permute.xlu1 %3278  ;;  %v2603_v19 = vadd.f32 %v7489_v9, %v2567_v0  ;;  %v2057_v32 = vadd.f32 %v6551_v33, %v2033_v60  ;;  %v7507_v57 = vld [vmem:[#allocation74_spill] sm:$0xff]  ;;  %v7511_v2 = vld [vmem:[#allocation15_spill] sm:$0xff] }
 0x2a7   :  { %v6675_v17 = vadd.f32 %v3279_v56, %v3257_v39  ;;  %v2724_v39 = vadd.f32 %v6542_v63, %v2700_v42  ;;  %v1874_v22 = vadd.f32 %v7494_v55, %v1838_v41  ;;  %v7497_v56 = vld [vmem:[#allocation69_spill] sm:$0xff]  ;;  %v7504_v42 = vld [vmem:[#allocation71_spill] sm:$0xff]  ;;  %v7509_v53 = vld [vmem:[#allocation42_spill] sm:$0xff] }
 0x2a8   :  { %v2045_v46 = vpop.permute.xlu0 %2044  ;;  %3472 = vrot.lane.b32.xlu1 %v3183_v12, %s3793_s14  ;;  %v7491_v12 = vld [vmem:[#allocation108_spill] sm:$0xff]  ;;  %v2639_v15 = vadd.f32 %v7496_v20, %v2603_v19  ;;  %v2031_v34 = vadd.f32 %v7497_v56, %v2007_v23  ;;  %v7508_v19 = vld [vmem:[#allocation106_spill] sm:$0xff]  ;;  %v7516_v20 = vld [vmem:[#allocation47_spill] sm:$0xff] }
 0x2a9   :  { %v6683_v47 = vadd.f32 %v2045_v46, %v2034_v48  ;;  %v1910_v63 = vadd.f32 %v7498_v44, %v1874_v22  ;;  %v1915_v48 = vadd.f32 %v7499_v24, %v1879_v21  ;;  %v7502_v46 = vld [vmem:[#allocation100_spill] sm:$0xff]  ;;  %v7512_v3 = vld [vmem:[#allocation66_spill] sm:$0xff] }
 0x2aa   :  { %3424 = vrot.lane.b32.xlu0 %v7491_v12, %s3791_s12  ;;  %v3311_v35 = vpop.permute.xlu1 %3310  ;;  %v2675_v7 = vadd.f32 %v7501_v11, %v2639_v15  ;;  %v2055_v30 = vadd.f32 %v7503_v51, %v2031_v34  ;;  %v2528_v12 = vadd.f32 %v7509_v53, %v7508_v19  ;;  %v7514_v22 = vld [vmem:[#allocation14_spill] sm:$0xff]  ;;  %v7517_v56 = vld [vmem:[#allocation8_spill] sm:$0xff] }
 0x2ab   :  { %v6696_v50 = vadd.f32 %v3311_v35, %v3291_v10  ;;  %v1946_v33 = vadd.f32 %v7504_v42, %v1910_v63  ;;  %v1951_v10 = vadd.f32 %v7505_v38, %v1915_v48  ;;  %v7510_v35 = vld [vmem:[#allocation33_spill] sm:$0xff]  ;;  %v7518_v44 = vld [vmem:[#allocation60_spill] sm:$0xff]  ;;  %v7523_v51 = vld [vmem:[#allocation78_spill] sm:$0xff] }
 0x2ac   :  { %v2735_v59 = vpop.permute.xlu0 %2734  ;;  %3474 = vrot.lane.b32.xlu1 %v6581_v62, %s3793_s14  ;;  %v3218_v62 = vadd.f32 %v7502_v46, %v3182_v1  ;;  %v2699_v41 = vadd.f32 %v7506_v25, %v2675_v7  ;;  %v2079_v61 = vadd.f32 %v6562_v31, %v2055_v30  ;;  %v2533_v23 = vadd.f32 %v7511_v2, %v7510_v35  ;;  %v7519_v48 = vld [vmem:[#allocation56_spill] sm:$0xff]  ;;  %v7522_v46 = vld [vmem:[#allocation102_spill] sm:$0xff] }
 0x2ad   :  { %v6705_v43 = vadd.f32 %v2735_v59, %v2724_v39  ;;  %v1982_v60 = vadd.f32 %v7512_v3, %v1946_v33  ;;  %v7513_v39 = vld [vmem:[#allocation79_spill] sm:$0xff]  ;;  %v7521_v11 = vld [vmem:[#allocation64_spill] sm:$0xff]  ;;  %v7528_v19 = vld [vmem:[#allocation50_spill] sm:$0xff] }
 0x2ae   :  { %3426 = vrot.lane.b32.xlu0 %v7500_v27, %s3791_s12  ;;  %v2067_v0 = vpop.permute.xlu1 %2066  ;;  %v3254_v36 = vadd.f32 %v7507_v57, %v3218_v62  ;;  %v1987_v55 = vadd.f32 %v7513_v39, %v1951_v10  ;;  %v2723_v8 = vadd.f32 %v7514_v22, %v2699_v41  ;;  %v2569_v15 = vadd.f32 %v7516_v20, %v2533_v23  ;;  %v7524_v33 = vld [vmem:[#allocation43_spill] sm:$0xff]  ;;  %v7525_v10 = vld [vmem:[#allocation37_spill] sm:$0xff]  ;;  %v7526_v25 = vld [vmem:[#allocation76_spill] sm:$0xff] }
 0x2af   :  { %v6714_v18 = vadd.f32 %v2067_v0, %v2057_v32  ;;  %v2006_v34 = vadd.f32 %v7517_v56, %v1982_v60  ;;  %v7530_v23 = vld [vmem:[#allocation94_spill] sm:$0xff] }
 0x2b0   :  { %v3247_v16 = vpop.permute.xlu0 %3246  ;;  %3476 = vrot.lane.b32.xlu1 %v6622_v5, %s3793_s14  ;;  %v3290_v31 = vadd.f32 %v6567_v45, %v3254_v36  ;;  %v2747_v63 = vadd.f32 %v6574_v29, %v2723_v8  ;;  %v7520_v45 = vld [vmem:[#allocation44_spill] sm:$0xff]  ;;  %v2605_v62 = vadd.f32 %v7522_v46, %v2569_v15  ;;  %v7532_v22 = vld [vmem:[#allocation70_spill] sm:$0xff]  ;;  %v7537_v46 = vld [vmem:[#allocation63_spill] sm:$0xff] }
 0x2b1   :  { %v6724_v9 = vadd.f32 %v3247_v16, %v6558_v14  ;;  %v7515_v14 = vld [vmem:[#allocation19_spill] sm:$0xff]  ;;  %v2030_v30 = vadd.f32 %v7523_v51, %v2006_v34  ;;  %v7527_v36 = vld [vmem:[#allocation68_spill] sm:$0xff]  ;;  %v7534_v20 = vld [vmem:[#allocation62_spill] sm:$0xff] }
 0x2b2   :  { %3470 = vrot.lane.b32.xlu0 %v3182_v1, %s3793_s14  ;;  %v2093_v5 = vpop.permute.xlu1 %2092  ;;  %v2564_v59 = vadd.f32 %v7515_v14, %v2528_v12  ;;  %v2011_v1 = vadd.f32 %v7518_v44, %v1987_v55  ;;  %v2641_v16 = vadd.f32 %v7525_v10, %v2605_v62  ;;  %v7529_v12 = vld [vmem:[#allocation80_spill] sm:$0xff]  ;;  %v7535_v34 = vld [vmem:[#allocation73_spill] sm:$0xff] }
 0x2b3   :  { %v2109_v21 = vadd.f32 %v2093_v5, %v2079_v61  ;;  %v2054_v41 = vadd.f32 %v7526_v25, %v2030_v30  ;;  %v7531_v5 = vld [vmem:[#allocation101_spill] sm:$0xff]  ;;  %v7536_v44 = vld [vmem:[#allocation92_spill] sm:$0xff] }
 0x2b4   :  { %v3309_v32 = vpop.permute.xlu0 %3308  ;;  %3480 = vrot.lane.b32.xlu1 %v6548_v52, %s3793_s14  ;;  %v2600_v0 = vadd.f32 %v7520_v45, %v2564_v59  ;;  %v2035_v52 = vadd.f32 %v6583_v40, %v2011_v1  ;;  %v2677_v35 = vadd.f32 %v7529_v12, %v2641_v16  ;;  %v7540_v16 = vld [vmem:[#allocation10_spill] sm:$0xff] }
 0x2b5   :  { %v6742_v24 = vadd.f32 %v3309_v32, %v3290_v31  ;;  %v2115_v27 = vsub.f32 %v2109_v21, %v7519_v48  ;;  %v2078_v40 = vadd.f32 %v6596_v37, %v2054_v41  ;;  %v7533_v31 = vld [vmem:[#allocation26_spill] sm:$0xff]  ;;  %v3537_v32 = vadd.f32 6.5025, %v7535_v34 }
 0x2b6   :  { %3448 = vrot.lane.b32.xlu0 %v7521_v11, %s3792_s13  ;;  %v2757_v7 = vpop.permute.xlu1 %2756  ;;  %v2636_v29 = vadd.f32 %v7524_v33, %v2600_v0  ;;  %v2701_v39 = vadd.f32 %v7531_v5, %v2677_v35  ;;  %v3536_v25 = vadd.f32 6.5025, %v7540_v16 }
 0x2b7   :  { %v6751_v42 = vadd.f32 %v2757_v7, %v2747_v63 }
 0x2b8   :  { %v2047_v38 = vpop.permute.xlu0 %2046  ;;  %v2672_v61 = vadd.f32 %v7527_v36, %v2636_v29  ;;  %v2725_v59 = vadd.f32 %v6610_v49, %v2701_v39 }
 0x2b9   :  { %v6756_v57 = vadd.f32 %v2047_v38, %v2035_v52  ;;  %v7539_v38 = vld [vmem:[#allocation27_spill] sm:$0xff] }
 0x2ba   :  { %3450 = vrot.lane.b32.xlu0 %v7528_v19, %s3792_s13  ;;  %v2783_v53 = vpop.permute.xlu1 %2782  ;;  %v2696_v3 = vadd.f32 %v7530_v23, %v2672_v61  ;;  %v7541_v19 = vld [vmem:[#allocation89_spill] sm:$0xff] }
 0x2bb   :  { %v2799_v2 = vadd.f32 %v2783_v53, %v6594_v4  ;;  %v3538_v53 = vadd.f32 6.5025, %v7541_v19 }
 0x2bc   :  { %v2091_v60 = vpop.permute.xlu0 %2090  ;;  %v2720_v21 = vadd.f32 %v7533_v31, %v2696_v3 }
 0x2bd   :  { %v2108_v55 = vadd.f32 %v2091_v60, %v2078_v40  ;;  %v2805_v8 = vsub.f32 %v2799_v2, %v7532_v22 }
 0x2be   :  { %3478 = vrot.lane.b32.xlu0 %v6629_v26, %s3793_s14  ;;  %v3313_v14 = vpop.permute.xlu1 %3312  ;;  %v2744_v1 = vadd.f32 %v7536_v44, %v2720_v21 }
 0x2bf   :  { %v2114_v37 = vsub.f32 %v2108_v55, %v7534_v20  ;;  %v3543_v15 = vadd.f32 %v2805_v8, %v2115_v27  ;;  %v3328_v4 = vadd.f32 %v3313_v14, %v6608_v28  ;;  %v7538_v28 = vld [vmem:[#allocation84_spill] sm:$0xff]  ;;  %v7542_v55 = vld [vmem:[#allocation57_spill] sm:$0xff] }
 0x2c0   :  { %v2737_v56 = vpop.permute.xlu0 %2736  ;;  %v2768_v0 = vadd.f32 %v6637_v6, %v2744_v1 }
 0x2c1   :  { %v2749_v63 = vadd.f32 %v2737_v56, %v2725_v59  ;;  %v3549_v48 = vadd.f32 58.5225, %v3543_v15 }
 0x2c2   :  { %v2095_v45 = vpop.permute.xlu1 %2094 }
 0x2c3   :  { %v6776_v11 = vmul.f32 %v3549_v48, %v3537_v32  ;;  %v2110_v26 = vadd.f32 %v2095_v45, %v6631_v13  ;;  %v7545_v48 = vld [vmem:[#allocation34_spill] sm:$0xff] }
 0x2c4   :  { %v2781_v49 = vpop.permute.xlu0 %2780 }
 0x2c5   :  { %v2798_v7 = vadd.f32 %v2781_v49, %v2768_v0  ;;  %v2116_v27 = vsub.f32 %v2110_v26, %v7537_v46  ;;  %3680 = vrcp.f32 %v6776_v11 }
 0x2c6   :  { %v2785_v62 = vpop.permute.xlu1 %2784 }
 0x2c7   :  { %v2804_v51 = vsub.f32 %v2798_v7, %v7538_v28  ;;  %v2800_v30 = vadd.f32 %v2785_v62, %v6654_v54  ;;  %v7546_v62 = vld [vmem:[#allocation16_spill] sm:$0xff] }
 0x2c8   :  { %v3281_v52 = vpop.permute.xlu0 %3280 }
 0x2c9   :  { %v3542_v33 = vadd.f32 %v2804_v51, %v2114_v37  ;;  %v3294_v29 = vadd.f32 %v3281_v52, %v6664_v58  ;;  %v2806_v10 = vsub.f32 %v2800_v30, %v7539_v38  ;;  %v7547_v52 = vld [vmem:[#allocation82_spill] sm:$0xff]  ;;  %v7548_v38 = vld [vmem:[#allocation51_spill] sm:$0xff] }
 0x2ca   :  { %v3315_v6 = vpop.permute.xlu1 %3314 }
 0x2cb   :  { %v3548_v41 = vadd.f32 58.5225, %v3542_v33  ;;  %v3544_v13 = vadd.f32 %v2806_v10, %v2116_v27  ;;  %v3329_v36 = vadd.f32 %v3315_v6, %v6675_v17  ;;  %v3540_v10 = vadd.f32 6.5025, %v7548_v38 }
 0x2cc   :  { %v2069_v61 = vpop.permute.xlu0 %2068 }
 0x2cd   :  { %v6787_v12 = vmul.f32 %v3548_v41, %v3536_v25  ;;  %v2082_v54 = vadd.f32 %v2069_v61, %v6683_v47  ;;  %v3550_v35 = vadd.f32 58.5225, %v3544_v13  ;;  %v7549_v61 = vld [vmem:[#allocation58_spill] sm:$0xff] }
 0x2ce   :  { %v3347_v40 = vpop.permute.xlu1 %3346 }
 0x2cf   :  { %v6790_v2 = vmul.f32 %v3550_v35, %v3538_v53  ;;  %v6793_v58 = vadd.f32 %v3347_v40, %v6696_v50  ;;  %v7543_v50 = vld [vmem:[#allocation77_spill] sm:$0xff] }
 0x2d0   :  { %v2759_v23 = vpop.permute.xlu0 %2758  ;;  %v7550_v40 = vld [vmem:[#allocation85_spill] sm:$0xff] }
 0x2d1   :  { %v2772_v3 = vadd.f32 %v2759_v23, %v6705_v43  ;;  %v3541_v23 = vadd.f32 6.5025, %v7550_v40  ;;  %3682 = vrcp.f32 %v6790_v2  ;;  %v3681_v40 = vpop.eup %3680 }
 0x2d2   :  { %v2097_v60 = vpop.permute.xlu1 %2096 }
 0x2d3   :  { %v2111_v17 = vadd.f32 %v2097_v60, %v6714_v18  ;;  %v7544_v18 = vld [vmem:[#allocation31_spill] sm:$0xff] }
 0x2d4   :  { %v3283_v5 = vpop.permute.xlu0 %3282  ;;  %v3539_v15 = vadd.f32 6.5025, %v7544_v18 }
 0x2d5   :  { %v6798_v39 = vadd.f32 %v3283_v5, %v6724_v9  ;;  %v2117_v22 = vsub.f32 %v2111_v17, %v7542_v55 }
 0x2d6   :  { %v2787_v47 = vpop.permute.xlu1 %2786 }
 0x2d7   :  { %v2801_v8 = vadd.f32 %v2787_v47, %v6751_v42 }
 0x2d8   :  { %v3345_v31 = vpop.permute.xlu0 %3344 }
 0x2d9   :  { %v6803_v21 = vadd.f32 %v3345_v31, %v6742_v24  ;;  %v2807_v14 = vsub.f32 %v2801_v8, %v7543_v50 }
 0x2da   :  { %v3349_v59 = vpop.permute.xlu1 %3348 }
 0x2db   :  { %v3545_v43 = vadd.f32 %v2807_v14, %v2117_v22  ;;  %v3364_v20 = vadd.f32 %v3349_v59, %v3328_v4 }
 0x2dc   :  { %v2071_v37 = vpop.permute.xlu0 %2070 }
 0x2dd   :  { %v2083_v9 = vadd.f32 %v2071_v37, %v6756_v57  ;;  %v3551_v56 = vadd.f32 58.5225, %v3545_v43 }
 0x2de   :  { %v2789_v34 = vpop.permute.xlu1 %2788 }
 0x2df   :  { %v6808_v32 = vmul.f32 %v3551_v56, %v3539_v15  ;;  %v2802_v44 = vadd.f32 %v2789_v34, %v2772_v3 }
 0x2e0   :  { %v2761_v42 = vpop.permute.xlu0 %2760 }
 0x2e1   :  { %v2773_v1 = vadd.f32 %v2761_v42, %v2749_v63  ;;  %v2808_v24 = vsub.f32 %v2802_v44, %v7545_v48  ;;  %3684 = vrcp.f32 %v6808_v32 }
 0x2e2   :  { %v3351_v45 = vpop.permute.xlu1 %3350  ;;  %3686 = vrcp.f32 %v6787_v12 }
 0x2e3   :  { %v3365_v0 = vadd.f32 %v3351_v45, %v3329_v36 }
 0x2e4   :  { %v3317_v26 = vpop.permute.xlu0 %3316 }
 0x2e5   :  { %v6811_v49 = vadd.f32 %v3317_v26, %v3294_v29 }
 0x2e6   :  { %v3371_v4 = vpop.permute.xlu1 %3370 }
 0x2e7   :  { %v3387_v18 = vadd.f32 %v3371_v4, %v6793_v58 }
 0x2e8   :  { %v2099_v7 = vpop.permute.xlu0 %2098 }
 0x2e9   :  { %v2112_v46 = vadd.f32 %v2099_v7, %v2082_v54 }
 0x2ea   :  { %v2791_v27 = vpop.permute.xlu1 %2790 }
 0x2eb   :  { %v2118_v57 = vsub.f32 %v2112_v46, %v7546_v62  ;;  %v2803_v28 = vadd.f32 %v2791_v27, %v2773_v1  ;;  %v7551_v46 = vld [vmem:[#allocation72_spill] sm:$0xff] }
 0x2ec   :  { %v6814_v51 = vpop.permute.xlu0 %3318  ;;  %v3501_v27 = vmul.f32 2.0, %v7551_v46 }
 0x2ed   :  { %v3546_v30 = vadd.f32 %v2808_v24, %v2118_v57  ;;  %v2809_v33 = vsub.f32 %v2803_v28, %v7547_v52  ;;  %v3331_v2 = vadd.f32 %v6814_v51, %v6798_v39 }
 0x2ee   :  { %v3373_v63 = vpop.permute.xlu1 %3372 }
 0x2ef   :  { %v3552_v6 = vadd.f32 58.5225, %v3546_v30  ;;  %v3388_v34 = vadd.f32 %v3373_v63, %v3364_v20  ;;  %v3507_v63 = vadd.f32 6.5025, %v3501_v27 }
 0x2f0   :  { %v3369_v16 = vpop.permute.xlu0 %3368 }
 0x2f1   :  { %v6818_v25 = vmul.f32 %v3552_v6, %v3540_v10  ;;  %v3386_v57 = vadd.f32 %v3369_v16, %v6803_v21  ;;  %v7553_v16 = vld [vmem:[#allocation28_spill] sm:$0xff] }
 0x2f2   :  { %v3375_v29 = vpop.permute.xlu1 %3374 }
 0x2f3   :  { %v3389_v45 = vadd.f32 %v3375_v29, %v3365_v0  ;;  %v7552_v0 = vld [vmem:[#allocation86_spill] sm:$0xff] }
 0x2f4   :  { %v2101_v41 = vpop.permute.xlu0 %2100  ;;  %v3502_v38 = vmul.f32 2.0, %v7552_v0 }
 0x2f5   :  { %v2113_v13 = vadd.f32 %v2101_v41, %v2083_v9 }
 0x2f6   :  { %v3395_v36 = vpop.permute.xlu1 %3394 }
 0x2f7   :  { %v2119_v19 = vsub.f32 %v2113_v13, %v7549_v61  ;;  %v3411_v9 = vadd.f32 %v3395_v36, %v3387_v18  ;;  %v3503_v13 = vmul.f32 2.0, %v7553_v16 }
 0x2f8   :  { %v6821_v53 = vpop.permute.xlu0 %3352 }
 0x2f9   :  { %v3547_v54 = vadd.f32 %v2809_v33, %v2119_v19  ;;  %v3366_v39 = vadd.f32 %v6821_v53, %v6811_v49 }
 0x2fa   :  { %v3397_v35 = vpop.permute.xlu1 %3396 }
 0x2fb   :  { %v3553_v3 = vadd.f32 58.5225, %v3547_v54  ;;  %v3412_v1 = vadd.f32 %v3397_v35, %v3388_v34 }
 0x2fc   :  { %v3355_v60 = vpop.permute.xlu0 %3354 }
 0x2fd   :  { %v6824_v17 = vmul.f32 %v3553_v3, %v3541_v23  ;;  %v3508_v23 = vadd.f32 6.5025, %v3502_v38  ;;  %v3367_v3 = vadd.f32 %v3355_v60, %v3331_v2  ;;  %v3683_v60 = vpop.eup %3682 }
 0x2fe   :  { %v3399_v5 = vpop.permute.xlu1 %3398 }
 0x2ff   :  { %v3413_v58 = vadd.f32 %v3399_v5, %v3389_v45  ;;  %3688 = vrcp.f32 %v6824_v17 }
 0x300   :  { %v3393_v55 = vpop.permute.xlu0 %3392  ;;  %3690 = vrcp.f32 %v6818_v25 }
 0x301   :  { %v3410_v30 = vadd.f32 %v3393_v55, %v3386_v57 }
 0x302   :  { %v3419_v22 = vpop.permute.xlu1 %3418 }
 0x303   :  { %v3435_v44 = vadd.f32 %v3419_v22, %v3411_v9  ;;  %v3509_v9 = vadd.f32 6.5025, %v3503_v13 }
 0x304   :  { %v6826_v47 = vpop.permute.xlu0 %3376 }
 0x306   :  { %v3421_v8 = vpop.permute.xlu1 %3420 }
 0x307   :  { %v3436_v26 = vadd.f32 %v3421_v8, %v3412_v1 }
 0x308   :  { %v3379_v31 = vpop.permute.xlu0 %3378 }
 0x309   :  { %v3391_v51 = vadd.f32 %v3379_v31, %v3367_v3 }
 0x30a   :  { %v3423_v50 = vpop.permute.xlu1 %3422 }
 0x30b   :  { %v3437_v52 = vadd.f32 %v3423_v50, %v3413_v58  ;;  %v7554_v50 = vld [vmem:[#allocation9_spill] sm:$0xff] }
 0x30c   :  { %v3417_v14 = vpop.permute.xlu0 %3416 }
 0x30d   :  { %v3434_v6 = vadd.f32 %v3417_v14, %v3410_v30  ;;  %v3500_v14 = vmul.f32 2.0, %v7554_v50 }
 0x30e   :  { %v3443_v59 = vpop.permute.xlu1 %3442 }
 0x30f   :  { %v3459_v48 = vadd.f32 %v3443_v59, %v3435_v44 }
 0x310   :  { %v6828_v43 = vpop.permute.xlu0 %3400 }
 0x312   :  { %v3445_v37 = vpop.permute.xlu1 %3444 }
 0x313   :  { %v3460_v4 = vadd.f32 %v3445_v37, %v3436_v26  ;;  %v3685_v26 = vpop.eup %3684 }
 0x314   :  { %v3403_v15 = vpop.permute.xlu0 %3402 }
 0x315   :  { %v3415_v44 = vadd.f32 %v3403_v15, %v3391_v51 }
 0x316   :  { %v3447_v56 = vpop.permute.xlu1 %3446 }
 0x317   :  { %v3461_v29 = vadd.f32 %v3447_v56, %v3437_v52  ;;  %v3390_v56 = vadd.f32 %v6826_v47, %v3366_v39  ;;  %v3687_v47 = vpop.eup %3686 }
 0x318   :  { %v3441_v42 = vpop.permute.xlu0 %3440  ;;  %v3689_v2 = vpop.eup %3688 }
 0x319   :  { %v3458_v61 = vadd.f32 %v3441_v42, %v3434_v6  ;;  %v3414_v49 = vadd.f32 %v6828_v43, %v3390_v56  ;;  %v7555_v43 = vld [vmem:[#allocation29_spill] sm:$0xff] }
 0x31a   :  { %v3473_v24 = vpop.permute.xlu1 %3472  ;;  %v3505_v52 = vmul.f32 2.0, %v7555_v43 }
 0x31b   :  { %v3489_v7 = vadd.f32 %v3473_v24, %v3459_v48  ;;  %v3506_v24 = vadd.f32 6.5025, %v3500_v14 }
 0x31c   :  { %v3425_v62 = vpop.permute.xlu0 %3424  ;;  %v3511_v6 = vadd.f32 6.5025, %v3505_v52 }
 0x31d   :  { %v3495_v28 = vsub.f32 %v3489_v7, %v7551_v46  ;;  %v3438_v27 = vadd.f32 %v3425_v62, %v3414_v49  ;;  %v7556_v62 = vld [vmem:[#allocation45_spill] sm:$0xff] }
 0x31e   :  { %v3475_v20 = vpop.permute.xlu1 %3474 }
 0x31f   :  { %v3513_v33 = vmul.f32 2.0, %v3495_v28  ;;  %v3490_v11 = vadd.f32 %v3475_v20, %v3460_v4 }
 0x320   :  { %v3427_v10 = vpop.permute.xlu0 %3426 }
 0x321   :  { %v3519_v41 = vadd.f32 58.5225, %v3513_v33  ;;  %v3496_v21 = vsub.f32 %v3490_v11, %v7552_v0  ;;  %v3439_v53 = vadd.f32 %v3427_v10, %v3415_v44  ;;  %v3504_v0 = vmul.f32 2.0, %v7556_v62 }
 0x322   :  { %v3477_v36 = vpop.permute.xlu1 %3476 }
 0x323   :  { %v3525_v19 = vmul.f32 %v3519_v41, %v3507_v63  ;;  %v3514_v54 = vmul.f32 2.0, %v3496_v21  ;;  %v3491_v35 = vadd.f32 %v3477_v36, %v3461_v29  ;;  %v3510_v25 = vadd.f32 6.5025, %v3504_v0 }
 0x324   :  { %v3471_v5 = vpop.permute.xlu0 %3470 }
 0x325   :  { %v3488_v55 = vadd.f32 %v3471_v5, %v3458_v61  ;;  %v3520_v22 = vadd.f32 58.5225, %v3514_v54  ;;  %v3497_v8 = vsub.f32 %v3491_v35, %v7553_v16  ;;  %v3567_v32 = vmul.f32 %v3681_v40, %v3525_v19  ;;  %v3691_v19 = vpop.eup %3690 }
 0x326   :  { %v3481_v46 = vpop.permute.xlu1 %3480 }
 0x327   :  { %v3494_v59 = vsub.f32 %v3488_v55, %v7554_v50  ;;  %v3526_v37 = vmul.f32 %v3520_v22, %v3508_v23  ;;  %v3515_v18 = vmul.f32 2.0, %v3497_v8  ;;  %v3576_v12 = vsel %vm3572_vm5, %v3567_v32, 0.0 }
 0x328   :  { %v3449_v34 = vpop.permute.xlu0 %3448  ;;  %3577 = vadd.xlane.f32.xlu1 %v3576_v12  ;;  %v3597_v23 = vlaneseq }
 0x329   :  { %v3512_v42 = vmul.f32 2.0, %v3494_v59  ;;  %v3521_v1 = vadd.f32 58.5225, %v3515_v18  ;;  %v3568_v48 = vmul.f32 %v3683_v60, %v3526_v37  ;;  %v3462_v15 = vadd.f32 %v3449_v34, %v3438_v27 }
 0x32a   :  { %v3598_v3 = vand.u32 127, %v3597_v23  ;;  %v3600_v5 = vshrl.u32 %v3597_v23, 7 }
 0x32b   :  { %v3518_v31 = vadd.f32 58.5225, %v3512_v42  ;;  %v3527_v45 = vmul.f32 %v3521_v1, %v3509_v9  ;;  %v3579_v17 = vsel %vm3572_vm5, %v3568_v48, 0.0 }
 0x32c   :  { %v3451_v7 = vpop.permute.xlu0 %3450  ;;  %v3601_v22 = vsub.s32 %v3598_v3, %v3600_v5  ;;  %vm3643_vm11 = vcmp.lt.s32.totalorder %v3600_v5, 6 }
 0x32d   :  { %v3524_v57 = vmul.f32 %v3518_v31, %v3506_v24  ;;  %v3463_v58 = vadd.f32 %v3451_v7, %v3439_v53  ;;  %v3569_v4 = vmul.f32 %v3685_v26, %v3527_v45 }
 0x32f   :  { %v3493_v28 = vadd.f32 %v3481_v46, %v3463_v58  ;;  %v3566_v20 = vmul.f32 %v3687_v47, %v3524_v57  ;;  %v3582_v13 = vsel %vm3572_vm5, %v3569_v4, 0.0 }
 0x330   :  { %v3479_v30 = vpop.permute.xlu0 %3478 }
 0x331   :  { %v3499_v33 = vsub.f32 %v3493_v28, %v7555_v43  ;;  %v3492_v11 = vadd.f32 %v3479_v30, %v3462_v15  ;;  %v3573_v63 = vsel %vm3572_vm5, %v3566_v20, 0.0 }
 0x332   :  { %3574 = vadd.xlane.f32.xlu0 %v3573_v63 }
 0x333   :  { %v3517_v38 = vmul.f32 2.0, %v3499_v33  ;;  %v3498_v10 = vsub.f32 %v3492_v11, %v7556_v62 }
 0x335   :  { %v3523_v29 = vadd.f32 58.5225, %v3517_v38  ;;  %v3516_v41 = vmul.f32 2.0, %v3498_v10 }
 0x336   :  { %3580 = vadd.xlane.f32.xlu0 %v3579_v17 }
 0x337   :  { %v3529_v21 = vmul.f32 %v3523_v29, %v3511_v6  ;;  %v3522_v16 = vadd.f32 58.5225, %v3516_v41 }
 0x339   :  { %v3528_v36 = vmul.f32 %v3522_v16, %v3510_v25  ;;  %v3571_v61 = vmul.f32 %v3689_v2, %v3529_v21 }
 0x33a   :  { %3583 = vadd.xlane.f32.xlu0 %v3582_v13 }
 0x33b   :  { %v3570_v54 = vmul.f32 %v3691_v19, %v3528_v36  ;;  %v3588_v35 = vsel %vm3572_vm5, %v3571_v61, 0.0 }
 0x33d   :  { %v3585_v40 = vsel %vm3572_vm5, %v3570_v54, 0.0 }
 0x33e   :  { %3586 = vadd.xlane.f32.xlu1 %v3585_v40  ;;  %3589 = vadd.xlane.f32.xlu0 %v3588_v35 }
 0x3b5   :  { %v3578_v32 = vpop.xlane.xlu1 %3577 }
 0x3b6   :  { %v3606_v50 = vrot.slane %v3578_v32, %v3601_v22 }
 0x3bf   :  { %v3575_v55 = vpop.xlane.xlu0 %3574 }
 0x3c0   :  { %v3602_v14 = vrot.slane %v3575_v55, %v3601_v22 }
 0x3c2   :  { %v3624_v37 = vsel %vm3623_vm6, %v3606_v50, %v3602_v14 }
 0x3c3   :  { %v3581_v8 = vpop.xlane.xlu0 %3580 }
 0x3c4   :  { %v3610_v51 = vrot.slane %v3581_v8, %v3601_v22 }
 0x3c6   :  { %v3626_v60 = vsel %vm3625_vm7, %v3610_v51, %v3624_v37 }
 0x3c7   :  { %v3584_v39 = vpop.xlane.xlu0 %3583 }
 0x3c8   :  { %v3614_v59 = vrot.slane %v3584_v39, %v3601_v22 }
 0x3ca   :  { %v3628_v34 = vsel %vm3627_vm8, %v3614_v59, %v3626_v60 }
 0x3cb   :  { %v3587_v18 = vpop.xlane.xlu1 %3586  ;;  %v3590_v12 = vpop.xlane.xlu0 %3589 }
 0x3cc   :  { %v3618_v9 = vrot.slane %v3587_v18, %v3601_v22  ;;  %v3622_v56 = vrot.slane %v3590_v12, %v3601_v22 }
 0x3ce   :  { %v3630_v44 = vsel %vm3629_vm9, %v3618_v9, %v3628_v34 }
 0x3cf   :  { %v3632_v42 = vsel %vm3631_vm10, %v3622_v56, %v3630_v44 }
 0x3d0   :  { %v3634_v1 = vsel %vm3572_vm5, %v3632_v42, 0.0 }
 0x3d1   :  { %3635 = vadd.xlane.f32.xlu1 %v3634_v1 }
 0x45e   :  { %v3636_v48 = vpop.xlane.xlu1 %3635 }
 0x45f   :  { %v3637_v24 = vmul.f32 0.027777778, %v3636_v48 }
 0x461   :  { %v3644_v49 = vsel %vm3643_vm11, %v3637_v24, 0.0 }
 0x462   :  { %v3646_v53 = vsel %vm3645_vm12, %v3644_v49, 0.0 }
 0x463   :  { %3647 = vadd.xlane.f32.xlu0 %v3646_v53 }
 0x4f0   :  { %v3648_v31 = vpop.xlane.xlu0 %3647 }
 0x4f1   :  { %v3649_v45 = vrot.slane %v3648_v31, 4 }
 0x4f3   :  { %v3650_v26 = vadd.f32 %v3649_v45, %v3648_v31 }
 0x4f5   :  { %v3651_v7 = vrot.slane %v3650_v26, 2 }
 0x4f7   :  { %v3652_v46 = vadd.f32 %v3651_v7, %v3650_v26 }
 0x4f9   :  { %v3653_v27 = vrot.slane %v3652_v46, 1 }
 0x4fb   :  { %v3654_v57 = vadd.f32 %v3653_v27, %v3652_v46 }
 0x4fd   :  { %3664 = vpush %v3654_v57 }
 0x52e   :  { %s3665_s15 = spop %3664 }
 0x52f   :  { %v3656_v58 = vstv %s3665_s15 }
 0x530   :  { %3657 = vst [vmem:[%s6868_s2] sm:$0xff] %v3656_v58 }
 0x531   :  { %3662 = vsyncpa [#allocation3], 1 }
 0x532   :  { %3663 = vsyncpa [#allocation5], 1 }

</bundles_post_ra>
